<compile_context>
chip_gen: v7x
topology: tpu7x:2x2x1
jax: 0.10.0
libtpu: 0.0.40
codegen_flags: <defaults>
</compile_context>

<pallas_src>
import numpy as np
import jax
import jax.numpy as jnp
from jax.experimental import pallas as pl
from jax.experimental.pallas import tpu as pltpu


L_IN = 510          # input length implied by the module (fc5 expects 30 conv features)
L1, L2, L3, L4 = 254, 126, 62, 30   # conv-chain lengths (k=4, stride=2): 510->254->126->62->30
X_LANES = 512       # lane padding for the input and conv1/conv2 feature maps
F_LANES = 128       # lane padding for conv3/conv4/fc feature maps
OUT_LANES = 8       # narrow output block; only lanes 0..1 are real (keep slice coupled!)


# ----------------------------------------------------------------------------
# Deterministic synthetic parameters (PyTorch-style uniform fan-in init).
# ----------------------------------------------------------------------------
def make_params(key):
    def uni(k, shape, fan_in):
        bound = 1.0 / np.sqrt(fan_in)
        return jax.random.uniform(k, shape, jnp.float32, -bound, bound)

    ks = jax.random.split(key, 14)
    conv_defs = [(2, 1, 4), (4, 2, 4), (2, 4, 4), (1, 2, 4)]   # (C_out, C_in, K)
    fc_defs = [(12, 30), (6, 12), (2, 6)]                      # (out, in)

    conv_params, i = [], 0
    for (co, ci, k) in conv_defs:
        w = uni(ks[i], (co, ci, k), ci * k)
        b = uni(ks[i + 1], (co,), ci * k)
        conv_params.append((w, b))
        i += 2
    fc_params = []
    for (o, n) in fc_defs:
        w = uni(ks[i], (o, n), n)
        b = uni(ks[i + 1], (o,), n)
        fc_params.append((w, b))
        i += 2
    return conv_params, fc_params


# ----------------------------------------------------------------------------
# One-time operand construction (Toeplitz matrices / bias rows, lane-padded).
# ----------------------------------------------------------------------------
def _conv1_operands(w, b):
    # x lanes p = 0..509 ; output lanes [co*254 + v], v = 0..253.
    w = np.asarray(w, np.float32); b = np.asarray(b, np.float32)
    co_n, _, k = w.shape                                     # (2, 1, 4)
    m = np.zeros((X_LANES, X_LANES), np.float32)
    brow = np.zeros((1, X_LANES), np.float32)
    for co in range(co_n):
        for v in range(L1):
            for kk in range(k):
                m[2 * v + kk, co * L1 + v] = w[co, 0, kk]
        brow[0, co * L1:(co + 1) * L1] = b[co]
    return m, brow


def _conv2_operands(w, b):
    # input lanes [ci*254 + u] ; output lanes [co*126 + v], v = 0..125.
    w = np.asarray(w, np.float32); b = np.asarray(b, np.float32)
    co_n, ci_n, k = w.shape                                  # (4, 2, 4)
    m = np.zeros((X_LANES, X_LANES), np.float32)
    brow = np.zeros((1, X_LANES), np.float32)
    for co in range(co_n):
        for ci in range(ci_n):
            for v in range(L2):
                for kk in range(k):
                    m[ci * L1 + 2 * v + kk, co * L2 + v] = w[co, ci, kk]
        brow[0, co * L2:(co + 1) * L2] = b[co]
    return m, brow


def _conv3_operands(w, b):
    # input lanes [ci*126 + u] ; output lanes [co*62 + v] -> single (512,128) matmul.
    w = np.asarray(w, np.float32); b = np.asarray(b, np.float32)
    co_n, ci_n, k = w.shape                                  # (2, 4, 4)
    m = np.zeros((X_LANES, F_LANES), np.float32)
    brow = np.zeros((1, F_LANES), np.float32)
    for co in range(co_n):
        for ci in range(ci_n):
            for v in range(L3):
                for kk in range(k):
                    m[ci * L2 + 2 * v + kk, co * L3 + v] = w[co, ci, kk]
        brow[0, co * L3:(co + 1) * L3] = b[co]
    return m, brow


def _conv4_operands(w, b):
    # input lanes [ci*62 + u] ; output lanes [t], t = 0..29.
    w = np.asarray(w, np.float32); b = np.asarray(b, np.float32)
    _, ci_n, k = w.shape                                     # (1, 2, 4)
    m = np.zeros((F_LANES, F_LANES), np.float32)
    brow = np.zeros((1, F_LANES), np.float32)
    for ci in range(ci_n):
        for t in range(L4):
            for kk in range(k):
                m[ci * L3 + 2 * t + kk, t] = w[0, ci, kk]
    brow[0, :L4] = b[0]
    return m, brow


def _fc_operands(w, b):
    w = np.asarray(w, np.float32); b = np.asarray(b, np.float32)
    o, n = w.shape
    m = np.zeros((F_LANES, F_LANES), np.float32)
    m[:n, :o] = w.T
    brow = np.zeros((1, F_LANES), np.float32)
    brow[0, :o] = b
    return m, brow


def _choose_tb(batch):
    # Tiles of 128..512 rows: big enough to amortise the ~0.35 us per-step
    # pipeline overhead, small enough to give >=2 grid steps when batch > 128
    # (so the "parallel" batch axis feeds both v7x TensorCores).
    if batch <= 128:
        return 128
    tb = min(512, -(-batch // 2))
    return ((tb + 127) // 128) * 128


# ----------------------------------------------------------------------------
# Fused forward pass factory.
# ----------------------------------------------------------------------------
def make_forward(conv_params, fc_params):
    (w1, b1), (w2, b2), (w3, b3), (w4, b4) = conv_params
    (w5, b5), (w6, b6), (w7, b7) = fc_params

    t1, br1 = _conv1_operands(w1, b1)
    t2, br2 = _conv2_operands(w2, b2)
    t3, br3 = _conv3_operands(w3, b3)
    t4, br4 = _conv4_operands(w4, b4)
    m5, br5 = _fc_operands(w5, b5)
    m6, br6 = _fc_operands(w6, b6)
    m7, br7 = _fc_operands(w7, b7)

    weight_ops = (
        jnp.asarray(t1, jnp.bfloat16), jnp.asarray(t2, jnp.bfloat16),
        jnp.asarray(t3, jnp.bfloat16), jnp.asarray(t4, jnp.bfloat16),
        jnp.asarray(m5, jnp.bfloat16), jnp.asarray(m6, jnp.bfloat16),
        jnp.asarray(m7, jnp.bfloat16),
        jnp.asarray(br1), jnp.asarray(br2), jnp.asarray(br3), jnp.asarray(br4),
        jnp.asarray(br5), jnp.asarray(br6), jnp.asarray(br7),    # f32 bias rows
    )

    def kernel(x_ref,
               t1_ref, t2_ref, t3_ref, t4_ref, w5_ref, w6_ref, w7_ref,
               b1_ref, b2_ref, b3_ref, b4_ref, b5_ref, b6_ref, b7_ref,
               o_ref):
        f32 = jnp.float32

        def layer(h, w_ref, b_ref, relu=True):
            y = jnp.dot(h.astype(jnp.bfloat16), w_ref[...],
                        preferred_element_type=f32) + b_ref[...]
            return jnp.maximum(y, 0.0) if relu else y

        h = x_ref[...]                        # (TB, 512) bf16, lanes 510/511 zero
        h = layer(h, t1_ref, b1_ref)          # conv1 -> (TB, 512), lanes >=508 zero
        h = layer(h, t2_ref, b2_ref)          # conv2 -> (TB, 512), lanes >=504 zero
        h = layer(h, t3_ref, b3_ref)          # conv3 -> (TB, 128), lanes >=124 zero
        h = layer(h, t4_ref, b4_ref)          # conv4 -> (TB, 128), lanes >=30  zero
        h = layer(h, w5_ref, b5_ref)          # fc5
        h = layer(h, w6_ref, b6_ref)          # fc6
        h = layer(h, w7_ref, b7_ref, relu=False)   # fc7 (no ReLU)
        o_ref[...] = h[:, :OUT_LANES]         # narrow write: only lanes 0..1 are real

    const = lambda i: (0, 0)
    batch_ix = lambda i: (i, 0)

    weight_specs = [
        pl.BlockSpec((X_LANES, X_LANES), const),      # conv1 Toeplitz
        pl.BlockSpec((X_LANES, X_LANES), const),      # conv2 Toeplitz
        pl.BlockSpec((X_LANES, F_LANES), const),      # conv3 (fused K=512)
        pl.BlockSpec((F_LANES, F_LANES), const),      # conv4
        pl.BlockSpec((F_LANES, F_LANES), const),      # fc5
        pl.BlockSpec((F_LANES, F_LANES), const),      # fc6
        pl.BlockSpec((F_LANES, F_LANES), const),      # fc7
        pl.BlockSpec((1, X_LANES), const),            # bias conv1
        pl.BlockSpec((1, X_LANES), const),            # bias conv2
    ] + [pl.BlockSpec((1, F_LANES), const)] * 5       # biases conv3/4, fc5/6/7

    @jax.jit
    def _forward(x, *ops):
        batch, length = x.shape
        assert length == L_IN, f"module requires L={L_IN}, got {length}"

        tb = _choose_tb(batch)
        b_pad = -(-batch // tb) * tb
        grid = (b_pad // tb,)

        # One pad + bf16 cast: the input slab is the dominant HBM stream.
        xp = jnp.pad(x.astype(jnp.bfloat16),
                     ((0, b_pad - batch), (0, X_LANES - length)))

        out = pl.pallas_call(
            kernel,
            out_shape=jax.ShapeDtypeStruct((b_pad, OUT_LANES), jnp.float32),
            grid=grid,
            in_specs=[pl.BlockSpec((tb, X_LANES), batch_ix)] + weight_specs,
            out_specs=pl.BlockSpec((tb, OUT_LANES), batch_ix),
            compiler_params=pltpu.CompilerParams(
                dimension_semantics=("parallel",),
                vmem_limit_bytes=32 * 1024 * 1024,
            ),
        )(xp, *ops)

        # PyTorch forward returns (B, 1, 2); padded rows / extra lanes are garbage.
        return out[:batch, :2].reshape(batch, 1, 2)

    def forward(x):
        return _forward(x, *weight_ops)

    return forward


# ----------------------------------------------------------------------------
# Pure-JAX reference (exact PyTorch semantics) for verification.
# ----------------------------------------------------------------------------
def ref_forward(x, conv_params, fc_params):
    h = x[:, None, :].astype(jnp.float32)              # (B, 1, L)  NCW
    for (w, b) in conv_params:
        h = jax.lax.conv_general_dilated(
            h, w, window_strides=(2,), padding='VALID',
            dimension_numbers=('NCH', 'OIH', 'NCH')) + b[None, :, None]
        h = jnp.maximum(h, 0.0)
    for i, (w, b) in enumerate(fc_params):
        h = h @ w.T + b
        if i < len(fc_params) - 1:
            h = jnp.maximum(h, 0.0)
    return h                                            # (B, 1, 2)


if __name__ == "__main__":
    key = jax.random.PRNGKey(0)
    k_x, k_p = jax.random.split(key)

    B = 256                       # -> TB=128, 2 grid steps (exercises the batch pipeline)
    x = jax.random.normal(k_x, (B, L_IN), jnp.float32)

    conv_params, fc_params = make_params(k_p)
    forward = make_forward(conv_params, fc_params)   # operands built & placed once

    y = jax.block_until_ready(forward(x))
    assert y.shape == (B, 1, 2)

    y_ref = ref_forward(x, conv_params, fc_params)
    # bf16 inputs + bf16 weights on every matmul layer -> loosened tolerance.
    np.testing.assert_allclose(np.asarray(y), np.asarray(y_ref),
                               rtol=5e-2, atol=5e-2)

    print("KERNEL_OK")
</pallas_src>

<mosaic_0001>
module attributes {stable_mosaic.version = 11 : i64} {
  func.func @kernel(%arg0: i32, %arg1: memref<128x512xbf16, #tpu.memory_space<vmem>>, %arg2: memref<512x512xbf16, #tpu.memory_space<vmem>>, %arg3: memref<512x512xbf16, #tpu.memory_space<vmem>>, %arg4: memref<512x128xbf16, #tpu.memory_space<vmem>>, %arg5: memref<128x128xbf16, #tpu.memory_space<vmem>>, %arg6: memref<128x128xbf16, #tpu.memory_space<vmem>>, %arg7: memref<128x128xbf16, #tpu.memory_space<vmem>>, %arg8: memref<128x128xbf16, #tpu.memory_space<vmem>>, %arg9: memref<1x512xf32, #tpu.memory_space<vmem>>, %arg10: memref<1x512xf32, #tpu.memory_space<vmem>>, %arg11: memref<1x128xf32, #tpu.memory_space<vmem>>, %arg12: memref<1x128xf32, #tpu.memory_space<vmem>>, %arg13: memref<1x128xf32, #tpu.memory_space<vmem>>, %arg14: memref<1x128xf32, #tpu.memory_space<vmem>>, %arg15: memref<1x128xf32, #tpu.memory_space<vmem>>, %arg16: memref<128x8xf32, #tpu.memory_space<vmem>>) attributes {dimension_semantics = [#tpu.dimension_semantics<parallel>], iteration_bounds = array<i64: 2>, scalar_prefetch = 0 : i64, scratch_operands = 0 : i64, tpu.core_type = #tpu.core_type<tc>, window_params = [{transform_indices = @transform_0, window_bounds = array<i64: 128, 512>}, {pipeline_mode = #tpu.pipeline_mode<synchronous>, transform_indices = @transform_1, window_bounds = array<i64: 512, 512>}, {pipeline_mode = #tpu.pipeline_mode<synchronous>, transform_indices = @transform_2, window_bounds = array<i64: 512, 512>}, {pipeline_mode = #tpu.pipeline_mode<synchronous>, transform_indices = @transform_3, window_bounds = array<i64: 512, 128>}, {pipeline_mode = #tpu.pipeline_mode<synchronous>, transform_indices = @transform_4, window_bounds = array<i64: 128, 128>}, {pipeline_mode = #tpu.pipeline_mode<synchronous>, transform_indices = @transform_5, window_bounds = array<i64: 128, 128>}, {pipeline_mode = #tpu.pipeline_mode<synchronous>, transform_indices = @transform_6, window_bounds = array<i64: 128, 128>}, {pipeline_mode = #tpu.pipeline_mode<synchronous>, transform_indices = @transform_7, window_bounds = array<i64: 128, 128>}, {pipeline_mode = #tpu.pipeline_mode<synchronous>, transform_indices = @transform_8, window_bounds = array<i64: 1, 512>}, {pipeline_mode = #tpu.pipeline_mode<synchronous>, transform_indices = @transform_9, window_bounds = array<i64: 1, 512>}, {pipeline_mode = #tpu.pipeline_mode<synchronous>, transform_indices = @transform_10, window_bounds = array<i64: 1, 128>}, {pipeline_mode = #tpu.pipeline_mode<synchronous>, transform_indices = @transform_11, window_bounds = array<i64: 1, 128>}, {pipeline_mode = #tpu.pipeline_mode<synchronous>, transform_indices = @transform_12, window_bounds = array<i64: 1, 128>}, {pipeline_mode = #tpu.pipeline_mode<synchronous>, transform_indices = @transform_13, window_bounds = array<i64: 1, 128>}, {pipeline_mode = #tpu.pipeline_mode<synchronous>, transform_indices = @transform_14, window_bounds = array<i64: 1, 128>}, {transform_indices = @transform_15, window_bounds = array<i64: 128, 8>}]} {
    %c0 = arith.constant 0 : index
    %c0_0 = arith.constant 0 : index
    %0 = vector.load %arg1[%c0, %c0_0] : memref<128x512xbf16, #tpu.memory_space<vmem>>, vector<128x512xbf16>
    %c0_1 = arith.constant 0 : index
    %c0_2 = arith.constant 0 : index
    %1 = vector.load %arg2[%c0_1, %c0_2] : memref<512x512xbf16, #tpu.memory_space<vmem>>, vector<512x512xbf16>
    %cst = arith.constant dense<0.000000e+00> : vector<128x512xf32>
    %2 = tpu.matmul %0, %1, %cst {dimension_numbers = #tpu.dot_dimension_numbers<[1], [0], [0], [1], [0, 0, 1, 1], [], []>} : vector<128x512xbf16>, vector<512x512xbf16>, vector<128x512xf32> -> vector<128x512xf32>
    %c0_3 = arith.constant 0 : index
    %c0_4 = arith.constant 0 : index
    %3 = vector.load %arg9[%c0_3, %c0_4] : memref<1x512xf32, #tpu.memory_space<vmem>>, vector<1x512xf32>
    %4 = vector.broadcast %3 : vector<1x512xf32> to vector<128x512xf32>
    %5 = arith.addf %2, %4 : vector<128x512xf32>
    %cst_5 = arith.constant 0.000000e+00 : f32
    %6 = vector.broadcast %cst_5 : f32 to vector<128x512xf32>
    %7 = arith.maximumf %5, %6 : vector<128x512xf32>
    %8 = arith.truncf %7 : vector<128x512xf32> to vector<128x512xbf16>
    %c0_6 = arith.constant 0 : index
    %c0_7 = arith.constant 0 : index
    %9 = vector.load %arg3[%c0_6, %c0_7] : memref<512x512xbf16, #tpu.memory_space<vmem>>, vector<512x512xbf16>
    %cst_8 = arith.constant dense<0.000000e+00> : vector<128x512xf32>
    %10 = tpu.matmul %8, %9, %cst_8 {dimension_numbers = #tpu.dot_dimension_numbers<[1], [0], [0], [1], [0, 0, 1, 1], [], []>} : vector<128x512xbf16>, vector<512x512xbf16>, vector<128x512xf32> -> vector<128x512xf32>
    %c0_9 = arith.constant 0 : index
    %c0_10 = arith.constant 0 : index
    %11 = vector.load %arg10[%c0_9, %c0_10] : memref<1x512xf32, #tpu.memory_space<vmem>>, vector<1x512xf32>
    %12 = vector.broadcast %11 : vector<1x512xf32> to vector<128x512xf32>
    %13 = arith.addf %10, %12 : vector<128x512xf32>
    %cst_11 = arith.constant 0.000000e+00 : f32
    %14 = vector.broadcast %cst_11 : f32 to vector<128x512xf32>
    %15 = arith.maximumf %13, %14 : vector<128x512xf32>
    %16 = arith.truncf %15 : vector<128x512xf32> to vector<128x512xbf16>
    %c0_12 = arith.constant 0 : index
    %c0_13 = arith.constant 0 : index
    %17 = vector.load %arg4[%c0_12, %c0_13] : memref<512x128xbf16, #tpu.memory_space<vmem>>, vector<512x128xbf16>
    %cst_14 = arith.constant dense<0.000000e+00> : vector<128x128xf32>
    %18 = tpu.matmul %16, %17, %cst_14 {dimension_numbers = #tpu.dot_dimension_numbers<[1], [0], [0], [1], [0, 0, 1, 1], [], []>} : vector<128x512xbf16>, vector<512x128xbf16>, vector<128x128xf32> -> vector<128x128xf32>
    %c0_15 = arith.constant 0 : index
    %c0_16 = arith.constant 0 : index
    %19 = vector.load %arg11[%c0_15, %c0_16] : memref<1x128xf32, #tpu.memory_space<vmem>>, vector<1x128xf32>
    %20 = vector.broadcast %19 : vector<1x128xf32> to vector<128x128xf32>
    %21 = arith.addf %18, %20 : vector<128x128xf32>
    %cst_17 = arith.constant 0.000000e+00 : f32
    %22 = vector.broadcast %cst_17 : f32 to vector<128x128xf32>
    %23 = arith.maximumf %21, %22 : vector<128x128xf32>
    %24 = arith.truncf %23 : vector<128x128xf32> to vector<128x128xbf16>
    %c0_18 = arith.constant 0 : index
    %c0_19 = arith.constant 0 : index
    %25 = vector.load %arg5[%c0_18, %c0_19] : memref<128x128xbf16, #tpu.memory_space<vmem>>, vector<128x128xbf16>
    %cst_20 = arith.constant dense<0.000000e+00> : vector<128x128xf32>
    %26 = tpu.matmul %24, %25, %cst_20 {dimension_numbers = #tpu.dot_dimension_numbers<[1], [0], [0], [1], [0, 0, 1, 1], [], []>} : vector<128x128xbf16>, vector<128x128xbf16>, vector<128x128xf32> -> vector<128x128xf32>
    %c0_21 = arith.constant 0 : index
    %c0_22 = arith.constant 0 : index
    %27 = vector.load %arg12[%c0_21, %c0_22] : memref<1x128xf32, #tpu.memory_space<vmem>>, vector<1x128xf32>
    %28 = vector.broadcast %27 : vector<1x128xf32> to vector<128x128xf32>
    %29 = arith.addf %26, %28 : vector<128x128xf32>
    %cst_23 = arith.constant 0.000000e+00 : f32
    %30 = vector.broadcast %cst_23 : f32 to vector<128x128xf32>
    %31 = arith.maximumf %29, %30 : vector<128x128xf32>
    %32 = arith.truncf %31 : vector<128x128xf32> to vector<128x128xbf16>
    %c0_24 = arith.constant 0 : index
    %c0_25 = arith.constant 0 : index
    %33 = vector.load %arg6[%c0_24, %c0_25] : memref<128x128xbf16, #tpu.memory_space<vmem>>, vector<128x128xbf16>
    %cst_26 = arith.constant dense<0.000000e+00> : vector<128x128xf32>
    %34 = tpu.matmul %32, %33, %cst_26 {dimension_numbers = #tpu.dot_dimension_numbers<[1], [0], [0], [1], [0, 0, 1, 1], [], []>} : vector<128x128xbf16>, vector<128x128xbf16>, vector<128x128xf32> -> vector<128x128xf32>
    %c0_27 = arith.constant 0 : index
    %c0_28 = arith.constant 0 : index
    %35 = vector.load %arg13[%c0_27, %c0_28] : memref<1x128xf32, #tpu.memory_space<vmem>>, vector<1x128xf32>
    %36 = vector.broadcast %35 : vector<1x128xf32> to vector<128x128xf32>
    %37 = arith.addf %34, %36 : vector<128x128xf32>
    %cst_29 = arith.constant 0.000000e+00 : f32
    %38 = vector.broadcast %cst_29 : f32 to vector<128x128xf32>
    %39 = arith.maximumf %37, %38 : vector<128x128xf32>
    %40 = arith.truncf %39 : vector<128x128xf32> to vector<128x128xbf16>
    %c0_30 = arith.constant 0 : index
    %c0_31 = arith.constant 0 : index
    %41 = vector.load %arg7[%c0_30, %c0_31] : memref<128x128xbf16, #tpu.memory_space<vmem>>, vector<128x128xbf16>
    %cst_32 = arith.constant dense<0.000000e+00> : vector<128x128xf32>
    %42 = tpu.matmul %40, %41, %cst_32 {dimension_numbers = #tpu.dot_dimension_numbers<[1], [0], [0], [1], [0, 0, 1, 1], [], []>} : vector<128x128xbf16>, vector<128x128xbf16>, vector<128x128xf32> -> vector<128x128xf32>
    %c0_33 = arith.constant 0 : index
    %c0_34 = arith.constant 0 : index
    %43 = vector.load %arg14[%c0_33, %c0_34] : memref<1x128xf32, #tpu.memory_space<vmem>>, vector<1x128xf32>
    %44 = vector.broadcast %43 : vector<1x128xf32> to vector<128x128xf32>
    %45 = arith.addf %42, %44 : vector<128x128xf32>
    %cst_35 = arith.constant 0.000000e+00 : f32
    %46 = vector.broadcast %cst_35 : f32 to vector<128x128xf32>
    %47 = arith.maximumf %45, %46 : vector<128x128xf32>
    %48 = arith.truncf %47 : vector<128x128xf32> to vector<128x128xbf16>
    %c0_36 = arith.constant 0 : index
    %c0_37 = arith.constant 0 : index
    %49 = vector.load %arg8[%c0_36, %c0_37] : memref<128x128xbf16, #tpu.memory_space<vmem>>, vector<128x128xbf16>
    %cst_38 = arith.constant dense<0.000000e+00> : vector<128x128xf32>
    %50 = tpu.matmul %48, %49, %cst_38 {dimension_numbers = #tpu.dot_dimension_numbers<[1], [0], [0], [1], [0, 0, 1, 1], [], []>} : vector<128x128xbf16>, vector<128x128xbf16>, vector<128x128xf32> -> vector<128x128xf32>
    %c0_39 = arith.constant 0 : index
    %c0_40 = arith.constant 0 : index
    %51 = vector.load %arg15[%c0_39, %c0_40] : memref<1x128xf32, #tpu.memory_space<vmem>>, vector<1x128xf32>
    %52 = vector.broadcast %51 : vector<1x128xf32> to vector<128x128xf32>
    %53 = arith.addf %50, %52 : vector<128x128xf32>
    %54 = vector.extract_strided_slice %53 {offsets = [0, 0], sizes = [128, 8], strides = [1, 1]} : vector<128x128xf32> to vector<128x8xf32>
    %c0_41 = arith.constant 0 : index
    %c0_42 = arith.constant 0 : index
    %55 = vector.load %arg16[%c0_41, %c0_42] : memref<128x8xf32, #tpu.memory_space<vmem>>, vector<128x8xf32>
    tpu.vector_store %arg16[%c0_41, %c0_42], %54 {strides = array<i32>} : memref<128x8xf32, #tpu.memory_space<vmem>>, vector<128x8xf32>,
    return
  }
  func.func @transform_0(%arg0: i32) -> (i32, i32) {
    %c0_i32 = arith.constant 0 : i32
    %c0_i32_0 = arith.constant 0 : i32
    return %arg0, %c0_i32 : i32, i32
  }
  func.func @transform_1(%arg0: i32) -> (i32, i32) {
    %c0_i32 = arith.constant 0 : i32
    %c0_i32_0 = arith.constant 0 : i32
    %c0_i32_1 = arith.constant 0 : i32
    return %c0_i32, %c0_i32_0 : i32, i32
  }
  func.func @transform_2(%arg0: i32) -> (i32, i32) {
    %c0_i32 = arith.constant 0 : i32
    %c0_i32_0 = arith.constant 0 : i32
    %c0_i32_1 = arith.constant 0 : i32
    return %c0_i32, %c0_i32_0 : i32, i32
  }
  func.func @transform_3(%arg0: i32) -> (i32, i32) {
    %c0_i32 = arith.constant 0 : i32
    %c0_i32_0 = arith.constant 0 : i32
    %c0_i32_1 = arith.constant 0 : i32
    return %c0_i32, %c0_i32_0 : i32, i32
  }
  func.func @transform_4(%arg0: i32) -> (i32, i32) {
    %c0_i32 = arith.constant 0 : i32
    %c0_i32_0 = arith.constant 0 : i32
    %c0_i32_1 = arith.constant 0 : i32
    return %c0_i32, %c0_i32_0 : i32, i32
  }
  func.func @transform_5(%arg0: i32) -> (i32, i32) {
    %c0_i32 = arith.constant 0 : i32
    %c0_i32_0 = arith.constant 0 : i32
    %c0_i32_1 = arith.constant 0 : i32
    return %c0_i32, %c0_i32_0 : i32, i32
  }
  func.func @transform_6(%arg0: i32) -> (i32, i32) {
    %c0_i32 = arith.constant 0 : i32
    %c0_i32_0 = arith.constant 0 : i32
    %c0_i32_1 = arith.constant 0 : i32
    return %c0_i32, %c0_i32_0 : i32, i32
  }
  func.func @transform_7(%arg0: i32) -> (i32, i32) {
    %c0_i32 = arith.constant 0 : i32
    %c0_i32_0 = arith.constant 0 : i32
    %c0_i32_1 = arith.constant 0 : i32
    return %c0_i32, %c0_i32_0 : i32, i32
  }
  func.func @transform_8(%arg0: i32) -> (i32, i32) {
    %c0_i32 = arith.constant 0 : i32
    %c0_i32_0 = arith.constant 0 : i32
    %c0_i32_1 = arith.constant 0 : i32
    return %c0_i32, %c0_i32_0 : i32, i32
  }
  func.func @transform_9(%arg0: i32) -> (i32, i32) {
    %c0_i32 = arith.constant 0 : i32
    %c0_i32_0 = arith.constant 0 : i32
    %c0_i32_1 = arith.constant 0 : i32
    return %c0_i32, %c0_i32_0 : i32, i32
  }
  func.func @transform_10(%arg0: i32) -> (i32, i32) {
    %c0_i32 = arith.constant 0 : i32
    %c0_i32_0 = arith.constant 0 : i32
    %c0_i32_1 = arith.constant 0 : i32
    return %c0_i32, %c0_i32_0 : i32, i32
  }
  func.func @transform_11(%arg0: i32) -> (i32, i32) {
    %c0_i32 = arith.constant 0 : i32
    %c0_i32_0 = arith.constant 0 : i32
    %c0_i32_1 = arith.constant 0 : i32
    return %c0_i32, %c0_i32_0 : i32, i32
  }
  func.func @transform_12(%arg0: i32) -> (i32, i32) {
    %c0_i32 = arith.constant 0 : i32
    %c0_i32_0 = arith.constant 0 : i32
    %c0_i32_1 = arith.constant 0 : i32
    return %c0_i32, %c0_i32_0 : i32, i32
  }
  func.func @transform_13(%arg0: i32) -> (i32, i32) {
    %c0_i32 = arith.constant 0 : i32
    %c0_i32_0 = arith.constant 0 : i32
    %c0_i32_1 = arith.constant 0 : i32
    return %c0_i32, %c0_i32_0 : i32, i32
  }
  func.func @transform_14(%arg0: i32) -> (i32, i32) {
    %c0_i32 = arith.constant 0 : i32
    %c0_i32_0 = arith.constant 0 : i32
    %c0_i32_1 = arith.constant 0 : i32
    return %c0_i32, %c0_i32_0 : i32, i32
  }
  func.func @transform_15(%arg0: i32) -> (i32, i32) {
    %c0_i32 = arith.constant 0 : i32
    %c0_i32_0 = arith.constant 0 : i32
    return %arg0, %c0_i32 : i32, i32
  }
}

</mosaic_0001>

<bundles_post_ra>
// kernel: _forward.1
= control target key start
LH: loop header
LB: loop body
LE: loop exit
PB: predicated region body
PF: predicated region fallthrough
CT: control target
= control target key end

     0   :  { %s6206_s18 = smov 0   ;;  %s7526_s0 = inlined_call_operand.vmem [shape: bf16[256,512], index: 0, kind: input, shape index: {}]   ;;  %s7527_s1 = inlined_call_operand.vmem [shape: bf16[512,512], index: 1, kind: input, shape index: {}]   ;;  %s7528_s2 = inlined_call_operand.vmem [shape: bf16[512,512], index: 2, kind: input, shape index: {}]   ;;  %s7529_s3 = inlined_call_operand.vmem [shape: bf16[512,128], index: 3, kind: input, shape index: {}]   ;;  %s7530_s4 = inlined_call_operand.vmem [shape: bf16[128,128], index: 4, kind: input, shape index: {}]   ;;  %s7531_s5 = inlined_call_operand.vmem [shape: bf16[128,128], index: 5, kind: input, shape index: {}]   ;;  %s7532_s6 = inlined_call_operand.vmem [shape: bf16[128,128], index: 6, kind: input, shape index: {}]   ;;  %s7533_s7 = inlined_call_operand.vmem [shape: bf16[128,128], index: 7, kind: input, shape index: {}]   ;;  %s7534_s8 = inlined_call_operand.vmem [shape: f32[1,512], index: 8, kind: input, shape index: {}]   ;;  %s7535_s9 = inlined_call_operand.vmem [shape: f32[1,512], index: 9, kind: input, shape index: {}]   ;;  %s7536_s10 = inlined_call_operand.vmem [shape: f32[1,128], index: 10, kind: input, shape index: {}]   ;;  %s7537_s11 = inlined_call_operand.vmem [shape: f32[1,128], index: 11, kind: input, shape index: {}]   ;;  %s7538_s12 = inlined_call_operand.vmem [shape: f32[1,128], index: 12, kind: input, shape index: {}]   ;;  %s7539_s13 = inlined_call_operand.vmem [shape: f32[1,128], index: 13, kind: input, shape index: {}]   ;;  %s7540_s14 = inlined_call_operand.vmem [shape: f32[1,128], index: 14, kind: input, shape index: {}]   ;;  %s7541_s15 = inlined_call_operand.vmem [shape: f32[256,8], index: 15, kind: output, shape index: {}]  }
   0x1 LB: > { %s4668_s19 = sadd.s32 4294967295, %s6124_s18   ;;  %p4672_p0 = scmp.ge.s32.totalorder %s6124_s18, 1  ;;  %s6124_s18 = sphi %s6206_s18, %s25_s18  }
   0x2   : > { %p439_p1 = scmp.lt.s32.totalorder %s6124_s18, 3 }
   0x4   : > { %p440_p2 = pnand %p4672_p0, %p439_p1 }
   0x5   : > { %v5622_v0 = vld [vmem:[%s7527_s1 + $0x4] ss:$16 sps:$4 sm:$0xff] (!%p440_p2)   ;;  %v5624_v1 = vld [vmem:[%s7527_s1 + $0xc] ss:$16 sps:$4 sm:$0xff] (!%p440_p2)   ;;  %v5626_v2 = vld [vmem:[%s7527_s1] ss:$16 sps:$4 sm:$0xff] (!%p440_p2)  }
   0x6   : > { %443 = sbr.rel (%p440_p2) target bundleno = 1807 (0x70f), region = 80  ;;  %1484 = vmatprep.subr.bf16.mxu0 (!%p440_p2), %v5622_v0  ;;  %v5627_v3 = vld [vmem:[%s7527_s1 + $0x8] ss:$16 sps:$4 sm:$0xff] (!%p440_p2)   ;;  %1710 = vmatprep.subr.bf16.mxu1 (!%p440_p2), %v5624_v1  ;;  %v5628_v4 = vld [vmem:[%s7527_s1 + $0x24] ss:$16 sps:$4 sm:$0xff] (!%p440_p2)   ;;  %s4673_s28 = sshll.u32 (!%p440_p2), %s4668_s19, 4 }
   0x7   : > { %1485 = vmatpush1.bf16.msra.mxu0 (!%p440_p2), %v5626_v2  ;;  %1711 = vmatpush1.bf16.msra.mxu1 (!%p440_p2), %v5627_v3  ;;  %v5630_v5 = vld [vmem:[%s7527_s1 + $0x2c] ss:$16 sps:$4 sm:$0xff] (!%p440_p2)   ;;  %v5632_v6 = vld [vmem:[%s7527_s1 + $0x20] ss:$16 sps:$4 sm:$0xff] (!%p440_p2)   ;;  %v5633_v7 = vld [vmem:[%s7527_s1 + $0x28] ss:$16 sps:$4 sm:$0xff] (!%p440_p2)  }
   0x8   : > { %1486 = vmatprep.subr.bf16.mxu0 (!%p440_p2), %v5628_v4  ;;  %1712 = vmatprep.subr.bf16.mxu1 (!%p440_p2), %v5630_v5  ;;  %v5634_v8 = vld [vmem:[%s7527_s1 + $0x44] ss:$16 sps:$4 sm:$0xff] (!%p440_p2)   ;;  %v5636_v9 = vld [vmem:[%s7527_s1 + $0x4c] ss:$16 sps:$4 sm:$0xff] (!%p440_p2)   ;;  %v5638_v10 = vld [vmem:[%s7527_s1 + $0x40] ss:$16 sps:$4 sm:$0xff] (!%p440_p2)  }
   0x9   : > { %v5639_v11 = vld [vmem:[%s7527_s1 + $0x48] ss:$16 sps:$4 sm:$0xff] (!%p440_p2)   ;;  %v5640_v12 = vld [vmem:[%s7527_s1 + $0x64] ss:$16 sps:$4 sm:$0xff] (!%p440_p2)   ;;  %v5642_v13 = vld [vmem:[%s7527_s1 + $0x6c] ss:$16 sps:$4 sm:$0xff] (!%p440_p2)  }
   0xa   : > { %v5644_v14 = vld [vmem:[%s7527_s1 + $0x60] ss:$16 sps:$4 sm:$0xff] (!%p440_p2)   ;;  %v5645_v15 = vld [vmem:[%s7527_s1 + $0x68] ss:$16 sps:$4 sm:$0xff] (!%p440_p2)   ;;  %v5646_v16 = vld [vmem:[%s7527_s1 + $0x84] ss:$16 sps:$4 sm:$0xff] (!%p440_p2)  }
   0xb   : > { %1487 = vmatpush1.bf16.msra.mxu0 (!%p440_p2), %v5632_v6  ;;  %1713 = vmatpush1.bf16.msra.mxu1 (!%p440_p2), %v5633_v7  ;;  %v5648_v17 = vld [vmem:[%s7527_s1 + $0x8c] ss:$16 sps:$4 sm:$0xff] (!%p440_p2)   ;;  %v5650_v18 = vld [vmem:[%s7527_s1 + $0x80] ss:$16 sps:$4 sm:$0xff] (!%p440_p2)   ;;  %v5651_v19 = vld [vmem:[%s7527_s1 + $0x88] ss:$16 sps:$4 sm:$0xff] (!%p440_p2)  }
   0xc   : > { %1488 = vmatprep.subr.bf16.mxu0 (!%p440_p2), %v5634_v8  ;;  %1714 = vmatprep.subr.bf16.mxu1 (!%p440_p2), %v5636_v9  ;;  %v5652_v20 = vld [vmem:[%s7527_s1 + $0xa4] ss:$16 sps:$4 sm:$0xff] (!%p440_p2)   ;;  %v5654_v21 = vld [vmem:[%s7527_s1 + $0xac] ss:$16 sps:$4 sm:$0xff] (!%p440_p2)   ;;  %v5656_v22 = vld [vmem:[%s7527_s1 + $0xa0] ss:$16 sps:$4 sm:$0xff] (!%p440_p2)  }
   0xd   : > { %v5657_v23 = vld [vmem:[%s7527_s1 + $0xa8] ss:$16 sps:$4 sm:$0xff]   ;;  %v5658_v24 = vld [vmem:[%s7527_s1 + $0xc4] ss:$16 sps:$4 sm:$0xff]   ;;  %v5660_v25 = vld [vmem:[%s7527_s1 + $0xcc] ss:$16 sps:$4 sm:$0xff]  }
   0xe   : > { %v5662_v26 = vld [vmem:[%s7527_s1 + $0xc0] ss:$16 sps:$4 sm:$0xff]   ;;  %v5663_v27 = vld [vmem:[%s7527_s1 + $0xc8] ss:$16 sps:$4 sm:$0xff]   ;;  %v5664_v28 = vld [vmem:[%s7527_s1 + $0xe4] ss:$16 sps:$4 sm:$0xff]  }
   0xf   : > { %1489 = vmatpush1.bf16.msra.mxu0 %v5638_v10  ;;  %1715 = vmatpush1.bf16.msra.mxu1 %v5639_v11  ;;  %v5666_v29 = vld [vmem:[%s7527_s1 + $0xec] ss:$16 sps:$4 sm:$0xff]   ;;  %v5668_v30 = vld [vmem:[%s7527_s1 + $0xe0] ss:$16 sps:$4 sm:$0xff]   ;;  %v5669_v31 = vld [vmem:[%s7527_s1 + $0xe8] ss:$16 sps:$4 sm:$0xff]  }
  0x10   : > { %1490 = vmatprep.subr.bf16.mxu0 %v5640_v12  ;;  %1716 = vmatprep.subr.bf16.mxu1 %v5642_v13  ;;  %v5670_v32 = vld [vmem:[%s7527_s1 + $0x104] ss:$16 sps:$4 sm:$0xff]   ;;  %v5672_v33 = vld [vmem:[%s7527_s1 + $0x10c] ss:$16 sps:$4 sm:$0xff]   ;;  %p489_p3 = scmp.lt.s32.totalorder %s4673_s28, 31  ;;  %vm4595_vm0 = vcmask 64512  }
  0x11   : > { %v5674_v34 = vld [vmem:[%s7527_s1 + $0x100] ss:$16 sps:$4 sm:$0xff]   ;;  %v5675_v35 = vld [vmem:[%s7527_s1 + $0x108] ss:$16 sps:$4 sm:$0xff]   ;;  %v5676_v36 = vld [vmem:[%s7527_s1 + $0x124] ss:$16 sps:$4 sm:$0xff]  }
  0x12   : > { %v5678_v37 = vld [vmem:[%s7527_s1 + $0x12c] ss:$16 sps:$4 sm:$0xff]   ;;  %s7543_s28 = smov (!%p489_p3, %s4673_s28), 31  ;;  %v5680_v38 = vld [vmem:[%s7527_s1 + $0x120] ss:$16 sps:$4 sm:$0xff]  }
  0x13   : > { %1491 = vmatpush1.bf16.msra.mxu0 %v5644_v14  ;;  %1717 = vmatpush1.bf16.msra.mxu1 %v5645_v15  ;;  %v5681_v39 = vld [vmem:[%s7527_s1 + $0x128] ss:$16 sps:$4 sm:$0xff]   ;;  %v5682_v40 = vld [vmem:[%s7527_s1 + $0x144] ss:$16 sps:$4 sm:$0xff]   ;;  %v5684_v41 = vld [vmem:[%s7527_s1 + $0x14c] ss:$16 sps:$4 sm:$0xff]  }
  0x14   : > { %1492 = vmatprep.subr.bf16.mxu0 %v5646_v16  ;;  %1718 = vmatprep.subr.bf16.mxu1 %v5648_v17  ;;  %s5037_s26 = sshll.u32 %s7543_s28, 4  ;;  %v5686_v42 = vld [vmem:[%s7527_s1 + $0x140] ss:$16 sps:$4 sm:$0xff]   ;;  %v5687_v43 = vld [vmem:[%s7527_s1 + $0x148] ss:$16 sps:$4 sm:$0xff]   ;;  %s4677_s19 = sshll.u32 %s7543_s28, 3 }
  0x15   : > { %v5688_v44 = vld [vmem:[%s7527_s1 + $0x164] ss:$16 sps:$4 sm:$0xff]   ;;  %s6357_s23 = scalar_lea.vmem %s7526_s0, %s5037_s26  ;;  %v5690_v45 = vld [vmem:[%s7527_s1 + $0x16c] ss:$16 sps:$4 sm:$0xff]   ;;  %v5692_v46 = vld [vmem:[%s7527_s1 + $0x160] ss:$16 sps:$4 sm:$0xff]   ;;  %s7489_s30 = scalar_lea.vmem %s7541_s15, %s4677_s19 }
  0x16   : > { %v5693_v47 = vld [vmem:[%s7527_s1 + $0x168] ss:$16 sps:$4 sm:$0xff]   ;;  %v5720_v48 = vld [vmem:[%s6357_s23 + $0x4] ss:$16 sps:$4 sm:$0xff]   ;;  %v5696_v50 = vld [vmem:[%s7527_s1 + $0x18c] ss:$16 sps:$4 sm:$0xff]  }
  0x17   : > { %1493 = vmatpush1.bf16.msra.mxu0 %v5650_v18  ;;  %1719 = vmatpush1.bf16.msra.mxu1 %v5651_v19  ;;  %v5694_v49 = vld [vmem:[%s7527_s1 + $0x184] ss:$16 sps:$4 sm:$0xff]   ;;  %v5698_v51 = vld [vmem:[%s7527_s1 + $0x180] ss:$16 sps:$4 sm:$0xff]   ;;  %v5699_v52 = vld [vmem:[%s7527_s1 + $0x188] ss:$16 sps:$4 sm:$0xff]  }
  0x18   : > { %1494 = vmatprep.subr.bf16.mxu0 %v5652_v20  ;;  %1720 = vmatprep.subr.bf16.mxu1 %v5654_v21  ;;  %v5700_v53 = vld [vmem:[%s7527_s1 + $0x1a4] ss:$16 sps:$4 sm:$0xff]   ;;  %v5702_v54 = vld [vmem:[%s7527_s1 + $0x1ac] ss:$16 sps:$4 sm:$0xff]   ;;  %v5704_v55 = vld [vmem:[%s7527_s1 + $0x1a0] ss:$16 sps:$4 sm:$0xff]  }
  0x19   : > { %1516 = vmatprep.mubr.bf16.mxu0 %v5720_v48  ;;  %1742 = vmatprep.mubr.bf16.mxu1 %v5720_v48  ;;  %v5705_v56 = vld [vmem:[%s7527_s1 + $0x1a8] ss:$16 sps:$4 sm:$0xff]   ;;  %v5706_v57 = vld [vmem:[%s7527_s1 + $0x1c4] ss:$16 sps:$4 sm:$0xff]   ;;  %v5708_v58 = vld [vmem:[%s7527_s1 + $0x1cc] ss:$16 sps:$4 sm:$0xff]  }
  0x1a   : > { %v5710_v59 = vld [vmem:[%s7527_s1 + $0x1c0] ss:$16 sps:$4 sm:$0xff]   ;;  %v5711_v60 = vld [vmem:[%s7527_s1 + $0x1c8] ss:$16 sps:$4 sm:$0xff]   ;;  %v5712_v61 = vld [vmem:[%s7527_s1 + $0x1e4] ss:$16 sps:$4 sm:$0xff]  }
  0x1b   : > { %1495 = vmatpush1.bf16.msra.mxu0 %v5656_v22  ;;  %1721 = vmatpush1.bf16.msra.mxu1 %v5657_v23  ;;  %v5714_v62 = vld [vmem:[%s7527_s1 + $0x1ec] ss:$16 sps:$4 sm:$0xff]   ;;  %v5716_v63 = vld [vmem:[%s7527_s1 + $0x1e0] ss:$16 sps:$4 sm:$0xff]   ;;  %v5717_v0 = vld [vmem:[%s7527_s1 + $0x1e8] ss:$16 sps:$4 sm:$0xff]  }
  0x1c   : > { %1496 = vmatprep.subr.bf16.mxu0 %v5658_v24  ;;  %1722 = vmatprep.subr.bf16.mxu1 %v5660_v25  ;;  %v5723_v1 = vld [vmem:[%s7527_s1 + $0x204] ss:$16 sps:$4 sm:$0xff]   ;;  %v5726_v2 = vld [vmem:[%s7527_s1 + $0x20c] ss:$16 sps:$4 sm:$0xff]   ;;  %v5718_v3 = vld [vmem:[%s6357_s23] ss:$16 sps:$4 sm:$0xff]  }
  0x1d   : > { %v5721_v4 = vld [vmem:[%s7527_s1 + $0x200] ss:$16 sps:$4 sm:$0xff]   ;;  %v5724_v5 = vld [vmem:[%s7527_s1 + $0x208] ss:$16 sps:$4 sm:$0xff]   ;;  %v5729_v6 = vld [vmem:[%s7527_s1 + $0x224] ss:$16 sps:$4 sm:$0xff]  }
  0x1e   : > { %v5732_v7 = vld [vmem:[%s7527_s1 + $0x22c] ss:$16 sps:$4 sm:$0xff]   ;;  %v5733_v8 = vld [vmem:[%s6357_s23 + $0x24] ss:$16 sps:$4 sm:$0xff]   ;;  %v5727_v9 = vld [vmem:[%s7527_s1 + $0x220] ss:$16 sps:$4 sm:$0xff]  }
  0x1f   : > { %1497 = vmatpush1.bf16.msra.mxu0 %v5662_v26  ;;  %1723 = vmatpush1.bf16.msra.mxu1 %v5663_v27  ;;  %v5730_v10 = vld [vmem:[%s7527_s1 + $0x228] ss:$16 sps:$4 sm:$0xff]   ;;  %v5738_v11 = vld [vmem:[%s7527_s1 + $0x244] ss:$16 sps:$4 sm:$0xff]   ;;  %v5741_v12 = vld [vmem:[%s7527_s1 + $0x24c] ss:$16 sps:$4 sm:$0xff]  }
  0x20   : > { %1498 = vmatprep.subr.bf16.mxu0 %v5664_v28  ;;  %1724 = vmatprep.subr.bf16.mxu1 %v5666_v29  ;;  %v5735_v13 = vld [vmem:[%s6357_s23 + $0x20] ss:$16 sps:$4 sm:$0xff]   ;;  %v5739_v15 = vld [vmem:[%s7527_s1 + $0x248] ss:$16 sps:$4 sm:$0xff]   ;;  %v5744_v16 = vld [vmem:[%s7527_s1 + $0x264] ss:$16 sps:$4 sm:$0xff]  }
  0x21   : > { %v5736_v14 = vld [vmem:[%s7527_s1 + $0x240] ss:$16 sps:$4 sm:$0xff]   ;;  %v5747_v17 = vld [vmem:[%s7527_s1 + $0x26c] ss:$16 sps:$4 sm:$0xff]   ;;  %v5748_v18 = vld [vmem:[%s6357_s23 + $0x44] ss:$16 sps:$4 sm:$0xff]  }
  0x22   : > { %v5742_v19 = vld [vmem:[%s7527_s1 + $0x260] ss:$16 sps:$4 sm:$0xff]   ;;  %v5745_v20 = vld [vmem:[%s7527_s1 + $0x268] ss:$16 sps:$4 sm:$0xff]   ;;  %v5753_v21 = vld [vmem:[%s7527_s1 + $0x284] ss:$16 sps:$4 sm:$0xff]  }
  0x23   : > { %1499 = vmatpush1.bf16.msra.mxu0 %v5668_v30  ;;  %1725 = vmatpush1.bf16.msra.mxu1 %v5669_v31  ;;  %v5756_v22 = vld [vmem:[%s7527_s1 + $0x28c] ss:$16 sps:$4 sm:$0xff]   ;;  %v5750_v23 = vld [vmem:[%s6357_s23 + $0x40] ss:$16 sps:$4 sm:$0xff]   ;;  %v5754_v25 = vld [vmem:[%s7527_s1 + $0x288] ss:$16 sps:$4 sm:$0xff]  }
  0x24   : > { %1500 = vmatprep.subr.bf16.mxu0 %v5670_v32  ;;  %1726 = vmatprep.subr.bf16.mxu1 %v5672_v33  ;;  %v5751_v24 = vld [vmem:[%s7527_s1 + $0x280] ss:$16 sps:$4 sm:$0xff]   ;;  %v5759_v26 = vld [vmem:[%s7527_s1 + $0x2a4] ss:$16 sps:$4 sm:$0xff]   ;;  %v5762_v27 = vld [vmem:[%s7527_s1 + $0x2ac] ss:$16 sps:$4 sm:$0xff]  }
  0x25   : > { %v5763_v28 = vld [vmem:[%s6357_s23 + $0x64] ss:$16 sps:$4 sm:$0xff]   ;;  %v5757_v29 = vld [vmem:[%s7527_s1 + $0x2a0] ss:$16 sps:$4 sm:$0xff]   ;;  %v5760_v30 = vld [vmem:[%s7527_s1 + $0x2a8] ss:$16 sps:$4 sm:$0xff]  }
  0x26   : > { %v5768_v31 = vld [vmem:[%s7527_s1 + $0x2c4] ss:$16 sps:$4 sm:$0xff]   ;;  %v5771_v32 = vld [vmem:[%s7527_s1 + $0x2cc] ss:$16 sps:$4 sm:$0xff]   ;;  %v5765_v33 = vld [vmem:[%s6357_s23 + $0x60] ss:$16 sps:$4 sm:$0xff]  }
  0x27   : > { %1501 = vmatpush1.bf16.msra.mxu0 %v5674_v34  ;;  %1727 = vmatpush1.bf16.msra.mxu1 %v5675_v35  ;;  %v5766_v34 = vld [vmem:[%s7527_s1 + $0x2c0] ss:$16 sps:$4 sm:$0xff]   ;;  %v5769_v35 = vld [vmem:[%s7527_s1 + $0x2c8] ss:$16 sps:$4 sm:$0xff]   ;;  %v5793_v48 = vld [vmem:[%s6357_s23 + $0xa4] ss:$16 sps:$4 sm:$0xff]  }
  0x28   : > { %1502 = vmatprep.subr.bf16.mxu0 %v5676_v36  ;;  %1728 = vmatprep.subr.bf16.mxu1 %v5678_v37  ;;  %v5774_v36 = vld [vmem:[%s7527_s1 + $0x2e4] ss:$16 sps:$4 sm:$0xff]   ;;  %v5777_v37 = vld [vmem:[%s7527_s1 + $0x2ec] ss:$16 sps:$4 sm:$0xff]  }
  0x2b   : > { %1503 = vmatpush1.bf16.msra.mxu0 %v5680_v38  ;;  %1729 = vmatpush1.bf16.msra.mxu1 %v5681_v39  ;;  %v5778_v38 = vld [vmem:[%s6357_s23 + $0x84] ss:$16 sps:$4 sm:$0xff]   ;;  %v5772_v39 = vld [vmem:[%s7527_s1 + $0x2e0] ss:$16 sps:$4 sm:$0xff]  }
  0x2c   : > { %1504 = vmatprep.subr.bf16.mxu0 %v5682_v40  ;;  %1730 = vmatprep.subr.bf16.mxu1 %v5684_v41  ;;  %v5775_v40 = vld [vmem:[%s7527_s1 + $0x2e8] ss:$16 sps:$4 sm:$0xff]   ;;  %v5783_v41 = vld [vmem:[%s7527_s1 + $0x304] ss:$16 sps:$4 sm:$0xff]  }
  0x2f   : > { %1505 = vmatpush1.bf16.msra.mxu0 %v5686_v42  ;;  %1731 = vmatpush1.bf16.msra.mxu1 %v5687_v43  ;;  %v5786_v42 = vld [vmem:[%s7527_s1 + $0x30c] ss:$16 sps:$4 sm:$0xff]   ;;  %v5780_v43 = vld [vmem:[%s6357_s23 + $0x80] ss:$16 sps:$4 sm:$0xff]  }
  0x30   : > { %1506 = vmatprep.subr.bf16.mxu0 %v5688_v44  ;;  %1732 = vmatprep.subr.bf16.mxu1 %v5690_v45  ;;  %v5781_v44 = vld [vmem:[%s7527_s1 + $0x300] ss:$16 sps:$4 sm:$0xff]   ;;  %v5784_v45 = vld [vmem:[%s7527_s1 + $0x308] ss:$16 sps:$4 sm:$0xff]  }
  0x33   : > { %1507 = vmatpush1.bf16.msra.mxu0 %v5692_v46  ;;  %1733 = vmatpush1.bf16.msra.mxu1 %v5693_v47  ;;  %v5789_v46 = vld [vmem:[%s7527_s1 + $0x324] ss:$16 sps:$4 sm:$0xff]   ;;  %v5792_v47 = vld [vmem:[%s7527_s1 + $0x32c] ss:$16 sps:$4 sm:$0xff]  }
  0x34   : > { %1508 = vmatprep.subr.bf16.mxu0 %v5694_v49  ;;  %1734 = vmatprep.subr.bf16.mxu1 %v5696_v50  ;;  %v5787_v49 = vld [vmem:[%s7527_s1 + $0x320] ss:$16 sps:$4 sm:$0xff]   ;;  %v5790_v50 = vld [vmem:[%s7527_s1 + $0x328] ss:$16 sps:$4 sm:$0xff]  }
  0x37   : > { %1509 = vmatpush1.bf16.msra.mxu0 %v5698_v51  ;;  %1735 = vmatpush1.bf16.msra.mxu1 %v5699_v52  ;;  %v5798_v51 = vld [vmem:[%s7527_s1 + $0x344] ss:$16 sps:$4 sm:$0xff]   ;;  %v5801_v52 = vld [vmem:[%s7527_s1 + $0x34c] ss:$16 sps:$4 sm:$0xff]  }
  0x38   : > { %1510 = vmatprep.subr.bf16.mxu0 %v5700_v53  ;;  %1736 = vmatprep.subr.bf16.mxu1 %v5702_v54  ;;  %v5795_v53 = vld [vmem:[%s6357_s23 + $0xa0] ss:$16 sps:$4 sm:$0xff]  }
  0x39   : > { %v5796_v54 = vld [vmem:[%s7527_s1 + $0x340] ss:$16 sps:$4 sm:$0xff]  }
  0x3b   : > { %1511 = vmatpush1.bf16.msra.mxu0 %v5704_v55  ;;  %1737 = vmatpush1.bf16.msra.mxu1 %v5705_v56  ;;  %v5799_v55 = vld [vmem:[%s7527_s1 + $0x348] ss:$16 sps:$4 sm:$0xff]   ;;  %v5804_v56 = vld [vmem:[%s7527_s1 + $0x364] ss:$16 sps:$4 sm:$0xff]  }
  0x3c   : > { %1512 = vmatprep.subr.bf16.mxu0 %v5706_v57  ;;  %1738 = vmatprep.subr.bf16.mxu1 %v5708_v58  ;;  %v5807_v57 = vld [vmem:[%s7527_s1 + $0x36c] ss:$16 sps:$4 sm:$0xff]   ;;  %v5808_v58 = vld [vmem:[%s6357_s23 + $0xc4] ss:$16 sps:$4 sm:$0xff]  }
  0x3f   : > { %1513 = vmatpush1.bf16.msra.mxu0 %v5710_v59  ;;  %1739 = vmatpush1.bf16.msra.mxu1 %v5711_v60  ;;  %v5802_v59 = vld [vmem:[%s7527_s1 + $0x360] ss:$16 sps:$4 sm:$0xff]   ;;  %v5805_v60 = vld [vmem:[%s7527_s1 + $0x368] ss:$16 sps:$4 sm:$0xff]  }
  0x40   : > { %1514 = vmatprep.subr.bf16.mxu0 %v5712_v61  ;;  %1740 = vmatprep.subr.bf16.mxu1 %v5714_v62  ;;  %v5813_v61 = vld [vmem:[%s7527_s1 + $0x384] ss:$16 sps:$4 sm:$0xff]   ;;  %v5816_v62 = vld [vmem:[%s7527_s1 + $0x38c] ss:$16 sps:$4 sm:$0xff]  }
  0x43   : > { %1515 = vmatpush1.bf16.msra.mxu0 %v5716_v63  ;;  %1741 = vmatpush1.bf16.msra.mxu1 %v5717_v0  ;;  %v5810_v63 = vld [vmem:[%s6357_s23 + $0xc0] ss:$16 sps:$4 sm:$0xff]  }
  0x44   : > { %1597 = vmatprep.subr.bf16.mxu0 %v5723_v1  ;;  %1823 = vmatprep.subr.bf16.mxu1 %v5726_v2  ;;  %v5811_v0 = vld [vmem:[%s7527_s1 + $0x380] ss:$16 sps:$4 sm:$0xff]   ;;  %v5814_v1 = vld [vmem:[%s7527_s1 + $0x388] ss:$16 sps:$4 sm:$0xff]   ;;  %v5819_v2 = vld [vmem:[%s7527_s1 + $0x3a4] ss:$16 sps:$4 sm:$0xff]  }
  0x46   : > { %1517 = vmatmul.mubr.bf16.vlgmr.msra.gmra.mrb[0].mxu0 %v5718_v3  ;;  %1743 = vmatmul.mubr.bf16.vlgmr.msra.gmra.mrb[0].mxu1 %v5718_v3  ;;  %v5822_v3 = vld [vmem:[%s7527_s1 + $0x3ac] ss:$16 sps:$4 sm:$0xff]  }
  0x47   : > { %1598 = vmatpush1.bf16.msra.mxu0 %v5721_v4  ;;  %1824 = vmatpush1.bf16.msra.mxu1 %v5724_v5  ;;  %v5823_v4 = vld [vmem:[%s6357_s23 + $0xe4] ss:$16 sps:$4 sm:$0xff]   ;;  %v5817_v5 = vld [vmem:[%s7527_s1 + $0x3a0] ss:$16 sps:$4 sm:$0xff]  }
  0x48   : > { %1599 = vmatprep.subr.bf16.mxu0 %v5729_v6  ;;  %1825 = vmatprep.subr.bf16.mxu1 %v5732_v7  ;;  %v5820_v6 = vld [vmem:[%s7527_s1 + $0x3a8] ss:$16 sps:$4 sm:$0xff]   ;;  %v5828_v7 = vld [vmem:[%s7527_s1 + $0x3c4] ss:$16 sps:$4 sm:$0xff]  }
  0x49   : > { %1526 = vmatprep.mubr.bf16.mxu0 %v5733_v8  ;;  %1752 = vmatprep.mubr.bf16.mxu1 %v5733_v8  ;;  %v5831_v8 = vld [vmem:[%s7527_s1 + $0x3cc] ss:$16 sps:$4 sm:$0xff]  }
  0x4b   : > { %1600 = vmatpush1.bf16.msra.mxu0 %v5727_v9  ;;  %1826 = vmatpush1.bf16.msra.mxu1 %v5730_v10  ;;  %v5825_v9 = vld [vmem:[%s6357_s23 + $0xe0] ss:$16 sps:$4 sm:$0xff]  }
  0x4c   : > { %1601 = vmatprep.subr.bf16.mxu0 %v5738_v11  ;;  %1827 = vmatprep.subr.bf16.mxu1 %v5741_v12  ;;  %v5826_v10 = vld [vmem:[%s7527_s1 + $0x3c0] ss:$16 sps:$4 sm:$0xff]   ;;  %v5829_v11 = vld [vmem:[%s7527_s1 + $0x3c8] ss:$16 sps:$4 sm:$0xff]   ;;  %v5834_v12 = vld [vmem:[%s7527_s1 + $0x3e4] ss:$16 sps:$4 sm:$0xff]  }
  0x4e   : > { %1527 = vmatmul.mubr.bf16.gmra.mrb[4].mxu0 %v5735_v13  ;;  %1753 = vmatmul.mubr.bf16.gmra.mrb[4].mxu1 %v5735_v13  ;;  %v5837_v13 = vld [vmem:[%s7527_s1 + $0x3ec] ss:$16 sps:$4 sm:$0xff]  }
  0x4f   : > { %1602 = vmatpush1.bf16.msra.mxu0 %v5736_v14  ;;  %1828 = vmatpush1.bf16.msra.mxu1 %v5739_v15  ;;  %v5840_v14 = vld [vmem:[%s6357_s23 + $0xc] ss:$16 sps:$4 sm:$0xff]   ;;  %v5832_v15 = vld [vmem:[%s7527_s1 + $0x3e0] ss:$16 sps:$4 sm:$0xff]  }
  0x50   : > { %1603 = vmatprep.subr.bf16.mxu0 %v5744_v16  ;;  %1829 = vmatprep.subr.bf16.mxu1 %v5747_v17  ;;  %v5835_v16 = vld [vmem:[%s7527_s1 + $0x3e8] ss:$16 sps:$4 sm:$0xff]   ;;  %v5864_v17 = vld [vmem:[%s7528_s2 + $0x4] ss:$16 sps:$4 sm:$0xff]  }
  0x51   : > { %1536 = vmatprep.mubr.bf16.mxu0 %v5748_v18  ;;  %1762 = vmatprep.mubr.bf16.mxu1 %v5748_v18  ;;  %v5867_v18 = vld [vmem:[%s7528_s2 + $0xc] ss:$16 sps:$4 sm:$0xff]  }
  0x53   : > { %1604 = vmatpush1.bf16.msra.mxu0 %v5742_v19  ;;  %1830 = vmatpush1.bf16.msra.mxu1 %v5745_v20  ;;  %v5838_v19 = vld [vmem:[%s6357_s23 + $0x8] ss:$16 sps:$4 sm:$0xff]   ;;  %v5841_v20 = vld [vmem:[%s6357_s23 + $0x2c] ss:$16 sps:$4 sm:$0xff]  }
  0x54   : > { %1605 = vmatprep.subr.bf16.mxu0 %v5753_v21  ;;  %1831 = vmatprep.subr.bf16.mxu1 %v5756_v22  ;;  %v5862_v21 = vld [vmem:[%s7528_s2] ss:$16 sps:$4 sm:$0xff]   ;;  %v5865_v22 = vld [vmem:[%s7528_s2 + $0x8] ss:$16 sps:$4 sm:$0xff]  }
  0x56   : > { %1537 = vmatmul.mubr.bf16.gmra.mrb[8].mxu0 %v5750_v23  ;;  %1763 = vmatmul.mubr.bf16.gmra.mrb[8].mxu1 %v5750_v23  ;;  %v5870_v23 = vld [vmem:[%s7528_s2 + $0x24] ss:$16 sps:$4 sm:$0xff]  }
  0x57   : > { %1606 = vmatpush1.bf16.msra.mxu0 %v5751_v24  ;;  %1832 = vmatpush1.bf16.msra.mxu1 %v5754_v25  ;;  %v5873_v24 = vld [vmem:[%s7528_s2 + $0x2c] ss:$16 sps:$4 sm:$0xff]   ;;  %v5868_v25 = vld [vmem:[%s7528_s2 + $0x20] ss:$16 sps:$4 sm:$0xff]  }
  0x58   : > { %1607 = vmatprep.subr.bf16.mxu0 %v5759_v26  ;;  %1833 = vmatprep.subr.bf16.mxu1 %v5762_v27  ;;  %v5871_v26 = vld [vmem:[%s7528_s2 + $0x28] ss:$16 sps:$4 sm:$0xff]   ;;  %v5876_v27 = vld [vmem:[%s7528_s2 + $0x44] ss:$16 sps:$4 sm:$0xff]  }
  0x59   : > { %1546 = vmatprep.mubr.bf16.mxu0 %v5763_v28  ;;  %1772 = vmatprep.mubr.bf16.mxu1 %v5763_v28  ;;  %v5879_v28 = vld [vmem:[%s7528_s2 + $0x4c] ss:$16 sps:$4 sm:$0xff]  }
  0x5b   : > { %1608 = vmatpush1.bf16.msra.mxu0 %v5757_v29  ;;  %1834 = vmatpush1.bf16.msra.mxu1 %v5760_v30  ;;  %v5843_v29 = vld [vmem:[%s6357_s23 + $0x28] ss:$16 sps:$4 sm:$0xff]   ;;  %v5844_v30 = vld [vmem:[%s6357_s23 + $0x4c] ss:$16 sps:$4 sm:$0xff]  }
  0x5c   : > { %1609 = vmatprep.subr.bf16.mxu0 %v5768_v31  ;;  %1835 = vmatprep.subr.bf16.mxu1 %v5771_v32  ;;  %v5874_v31 = vld [vmem:[%s7528_s2 + $0x40] ss:$16 sps:$4 sm:$0xff]   ;;  %v5877_v32 = vld [vmem:[%s7528_s2 + $0x48] ss:$16 sps:$4 sm:$0xff]  }
  0x5e   : > { %1547 = vmatmul.mubr.bf16.gmra.mrb[12].mxu0 %v5765_v33  ;;  %1773 = vmatmul.mubr.bf16.gmra.mrb[12].mxu1 %v5765_v33  ;;  %v5882_v33 = vld [vmem:[%s7528_s2 + $0x64] ss:$16 sps:$4 sm:$0xff]  }
  0x5f   : > { %1610 = vmatpush1.bf16.msra.mxu0 %v5766_v34  ;;  %1836 = vmatpush1.bf16.msra.mxu1 %v5769_v35  ;;  %v5885_v34 = vld [vmem:[%s7528_s2 + $0x6c] ss:$16 sps:$4 sm:$0xff]   ;;  %v5880_v35 = vld [vmem:[%s7528_s2 + $0x60] ss:$16 sps:$4 sm:$0xff]  }
  0x60   : > { %1611 = vmatprep.subr.bf16.mxu0 %v5774_v36  ;;  %1837 = vmatprep.subr.bf16.mxu1 %v5777_v37  ;;  %v5846_v36 = vld [vmem:[%s6357_s23 + $0x48] ss:$16 sps:$4 sm:$0xff]  }
  0x61   : > { %1556 = vmatprep.mubr.bf16.mxu0 %v5778_v38  ;;  %1782 = vmatprep.mubr.bf16.mxu1 %v5778_v38  ;;  %v5883_v37 = vld [vmem:[%s7528_s2 + $0x68] ss:$16 sps:$4 sm:$0xff]   ;;  %v5847_v38 = vld [vmem:[%s6357_s23 + $0x6c] ss:$16 sps:$4 sm:$0xff]  }
  0x63   : > { %1612 = vmatpush1.bf16.msra.mxu0 %v5772_v39  ;;  %1838 = vmatpush1.bf16.msra.mxu1 %v5775_v40  ;;  %v5888_v39 = vld [vmem:[%s7528_s2 + $0x84] ss:$16 sps:$4 sm:$0xff]   ;;  %v5891_v40 = vld [vmem:[%s7528_s2 + $0x8c] ss:$16 sps:$4 sm:$0xff]  }
  0x64   : > { %1613 = vmatprep.subr.bf16.mxu0 %v5783_v41  ;;  %1839 = vmatprep.subr.bf16.mxu1 %v5786_v42  ;;  %v5886_v41 = vld [vmem:[%s7528_s2 + $0x80] ss:$16 sps:$4 sm:$0xff]   ;;  %v5889_v42 = vld [vmem:[%s7528_s2 + $0x88] ss:$16 sps:$4 sm:$0xff]  }
  0x66   : > { %1557 = vmatmul.mubr.bf16.gmra.mrb[16].mxu0 %v5780_v43  ;;  %1783 = vmatmul.mubr.bf16.gmra.mrb[16].mxu1 %v5780_v43  ;;  %v5894_v43 = vld [vmem:[%s7528_s2 + $0xa4] ss:$16 sps:$4 sm:$0xff]  }
  0x67   : > { %1614 = vmatpush1.bf16.msra.mxu0 %v5781_v44  ;;  %1840 = vmatpush1.bf16.msra.mxu1 %v5784_v45  ;;  %v5897_v44 = vld [vmem:[%s7528_s2 + $0xac] ss:$16 sps:$4 sm:$0xff]   ;;  %v5892_v45 = vld [vmem:[%s7528_s2 + $0xa0] ss:$16 sps:$4 sm:$0xff]  }
  0x68   : > { %1615 = vmatprep.subr.bf16.mxu0 %v5789_v46  ;;  %1841 = vmatprep.subr.bf16.mxu1 %v5792_v47  ;;  %v5895_v46 = vld [vmem:[%s7528_s2 + $0xa8] ss:$16 sps:$4 sm:$0xff]   ;;  %v5900_v47 = vld [vmem:[%s7528_s2 + $0xc4] ss:$16 sps:$4 sm:$0xff]  }
  0x69   : > { %1566 = vmatprep.mubr.bf16.mxu0 %v5793_v48  ;;  %1792 = vmatprep.mubr.bf16.mxu1 %v5793_v48  ;;  %v5903_v48 = vld [vmem:[%s7528_s2 + $0xcc] ss:$16 sps:$4 sm:$0xff]  }
  0x6b   : > { %1616 = vmatpush1.bf16.msra.mxu0 %v5787_v49  ;;  %1842 = vmatpush1.bf16.msra.mxu1 %v5790_v50  ;;  %v5849_v49 = vld [vmem:[%s6357_s23 + $0x68] ss:$16 sps:$4 sm:$0xff]   ;;  %v5850_v50 = vld [vmem:[%s6357_s23 + $0x8c] ss:$16 sps:$4 sm:$0xff]  }
  0x6c   : > { %1617 = vmatprep.subr.bf16.mxu0 %v5798_v51  ;;  %1843 = vmatprep.subr.bf16.mxu1 %v5801_v52  ;;  %v5898_v51 = vld [vmem:[%s7528_s2 + $0xc0] ss:$16 sps:$4 sm:$0xff]   ;;  %v5901_v52 = vld [vmem:[%s7528_s2 + $0xc8] ss:$16 sps:$4 sm:$0xff]  }
  0x6e   : > { %1567 = vmatmul.mubr.bf16.gmra.mrb[20].mxu0 %v5795_v53  ;;  %1793 = vmatmul.mubr.bf16.gmra.mrb[20].mxu1 %v5795_v53  ;;  %v5906_v53 = vld [vmem:[%s7528_s2 + $0xe4] ss:$16 sps:$4 sm:$0xff]  }
  0x6f   : > { %1618 = vmatpush1.bf16.msra.mxu0 %v5796_v54  ;;  %1844 = vmatpush1.bf16.msra.mxu1 %v5799_v55  ;;  %v5909_v54 = vld [vmem:[%s7528_s2 + $0xec] ss:$16 sps:$4 sm:$0xff]   ;;  %v5904_v55 = vld [vmem:[%s7528_s2 + $0xe0] ss:$16 sps:$4 sm:$0xff]  }
  0x70   : > { %1619 = vmatprep.subr.bf16.mxu0 %v5804_v56  ;;  %1845 = vmatprep.subr.bf16.mxu1 %v5807_v57  ;;  %v5907_v56 = vld [vmem:[%s7528_s2 + $0xe8] ss:$16 sps:$4 sm:$0xff]   ;;  %v5912_v57 = vld [vmem:[%s7528_s2 + $0x104] ss:$16 sps:$4 sm:$0xff]  }
  0x71   : > { %1576 = vmatprep.mubr.bf16.mxu0 %v5808_v58  ;;  %1802 = vmatprep.mubr.bf16.mxu1 %v5808_v58  ;;  %v5915_v58 = vld [vmem:[%s7528_s2 + $0x10c] ss:$16 sps:$4 sm:$0xff]  }
  0x73   : > { %1620 = vmatpush1.bf16.msra.mxu0 %v5802_v59  ;;  %1846 = vmatpush1.bf16.msra.mxu1 %v5805_v60  ;;  %v5852_v59 = vld [vmem:[%s6357_s23 + $0x88] ss:$16 sps:$4 sm:$0xff]   ;;  %v5853_v60 = vld [vmem:[%s6357_s23 + $0xac] ss:$16 sps:$4 sm:$0xff]  }
  0x74   : > { %1621 = vmatprep.subr.bf16.mxu0 %v5813_v61  ;;  %1847 = vmatprep.subr.bf16.mxu1 %v5816_v62  ;;  %v5910_v61 = vld [vmem:[%s7528_s2 + $0x100] ss:$16 sps:$4 sm:$0xff]   ;;  %v5913_v62 = vld [vmem:[%s7528_s2 + $0x108] ss:$16 sps:$4 sm:$0xff]  }
  0x76   : > { %1577 = vmatmul.mubr.bf16.gmra.mrb[24].mxu0 %v5810_v63  ;;  %1803 = vmatmul.mubr.bf16.gmra.mrb[24].mxu1 %v5810_v63  ;;  %v5918_v63 = vld [vmem:[%s7528_s2 + $0x124] ss:$16 sps:$4 sm:$0xff]  }
  0x77   : > { %1622 = vmatpush1.bf16.msra.mxu0 %v5811_v0  ;;  %1848 = vmatpush1.bf16.msra.mxu1 %v5814_v1  ;;  %v5921_v0 = vld [vmem:[%s7528_s2 + $0x12c] ss:$16 sps:$4 sm:$0xff]   ;;  %v5916_v1 = vld [vmem:[%s7528_s2 + $0x120] ss:$16 sps:$4 sm:$0xff]  }
  0x78   : > { %1623 = vmatprep.subr.bf16.mxu0 %v5819_v2  ;;  %1849 = vmatprep.subr.bf16.mxu1 %v5822_v3  ;;  %v5919_v2 = vld [vmem:[%s7528_s2 + $0x128] ss:$16 sps:$4 sm:$0xff]   ;;  %v5924_v3 = vld [vmem:[%s7528_s2 + $0x144] ss:$16 sps:$4 sm:$0xff]  }
  0x79   : > { %1586 = vmatprep.mubr.bf16.mxu0 %v5823_v4  ;;  %1812 = vmatprep.mubr.bf16.mxu1 %v5823_v4  ;;  %v5927_v4 = vld [vmem:[%s7528_s2 + $0x14c] ss:$16 sps:$4 sm:$0xff]  }
  0x7b   : > { %1624 = vmatpush1.bf16.msra.mxu0 %v5817_v5  ;;  %1850 = vmatpush1.bf16.msra.mxu1 %v5820_v6  ;;  %v5855_v5 = vld [vmem:[%s6357_s23 + $0xa8] ss:$16 sps:$4 sm:$0xff]   ;;  %v5856_v6 = vld [vmem:[%s6357_s23 + $0xcc] ss:$16 sps:$4 sm:$0xff]  }
  0x7c   : > { %1625 = vmatprep.subr.bf16.mxu0 %v5828_v7  ;;  %1851 = vmatprep.subr.bf16.mxu1 %v5831_v8  ;;  %v5922_v7 = vld [vmem:[%s7528_s2 + $0x140] ss:$16 sps:$4 sm:$0xff]   ;;  %v5925_v8 = vld [vmem:[%s7528_s2 + $0x148] ss:$16 sps:$4 sm:$0xff]  }
  0x7e   : > { %1587 = vmatmul.mubr.bf16.gmra.mrb[28].mxu0 %v5825_v9  ;;  %1813 = vmatmul.mubr.bf16.gmra.mrb[28].mxu1 %v5825_v9  ;;  %v5930_v9 = vld [vmem:[%s7528_s2 + $0x164] ss:$16 sps:$4 sm:$0xff]  }
  0x7f   : > { %1626 = vmatpush1.bf16.msra.mxu0 %v5826_v10  ;;  %1852 = vmatpush1.bf16.msra.mxu1 %v5829_v11  ;;  %v5933_v10 = vld [vmem:[%s7528_s2 + $0x16c] ss:$16 sps:$4 sm:$0xff]   ;;  %v5928_v11 = vld [vmem:[%s7528_s2 + $0x160] ss:$16 sps:$4 sm:$0xff]  }
  0x80   : > { %1627 = vmatprep.subr.bf16.mxu0 %v5834_v12  ;;  %1853 = vmatprep.subr.bf16.mxu1 %v5837_v13  ;;  %v5931_v12 = vld [vmem:[%s7528_s2 + $0x168] ss:$16 sps:$4 sm:$0xff]   ;;  %v5936_v13 = vld [vmem:[%s7528_s2 + $0x184] ss:$16 sps:$4 sm:$0xff]  }
  0x81   : > { %1629 = vmatprep.mubr.bf16.mxu0 %v5840_v14  ;;  %1855 = vmatprep.mubr.bf16.mxu1 %v5840_v14  ;;  %v5939_v14 = vld [vmem:[%s7528_s2 + $0x18c] ss:$16 sps:$4 sm:$0xff]  }
  0x83   : > { %1628 = vmatpush1.bf16.msra.mxu0 %v5832_v15  ;;  %1854 = vmatpush1.bf16.msra.mxu1 %v5835_v16  ;;  %v5858_v15 = vld [vmem:[%s6357_s23 + $0xc8] ss:$16 sps:$4 sm:$0xff]   ;;  %v5859_v16 = vld [vmem:[%s6357_s23 + $0xec] ss:$16 sps:$4 sm:$0xff]  }
  0x84   : > { %2822 = vmatprep.subr.bf16.mxu0 %v5864_v17  ;;  %3048 = vmatprep.subr.bf16.mxu1 %v5867_v18  ;;  %v5934_v17 = vld [vmem:[%s7528_s2 + $0x180] ss:$16 sps:$4 sm:$0xff]   ;;  %v5937_v18 = vld [vmem:[%s7528_s2 + $0x188] ss:$16 sps:$4 sm:$0xff]  }
  0x86   : > { %1630 = vmatmul.mubr.bf16.vlgmr.msra.gmra.mrb[0].mxu0 %v5838_v19  ;;  %1856 = vmatmul.mubr.bf16.vlgmr.msra.gmra.mrb[0].mxu1 %v5838_v19  ;;  %v5942_v19 = vld [vmem:[%s7528_s2 + $0x1a4] ss:$16 sps:$4 sm:$0xff]  }
  0x87   : > { %1639 = vmatprep.mubr.bf16.mxu0 %v5841_v20  ;;  %1865 = vmatprep.mubr.bf16.mxu1 %v5841_v20  ;;  %v5945_v20 = vld [vmem:[%s7528_s2 + $0x1ac] ss:$16 sps:$4 sm:$0xff]  }
  0x88   : > { %2823 = vmatpush1.bf16.msra.mxu0 %v5862_v21  ;;  %3049 = vmatpush1.bf16.msra.mxu1 %v5865_v22  ;;  %v5940_v21 = vld [vmem:[%s7528_s2 + $0x1a0] ss:$16 sps:$4 sm:$0xff]   ;;  %v5943_v22 = vld [vmem:[%s7528_s2 + $0x1a8] ss:$16 sps:$4 sm:$0xff]  }
  0x89   : > { %2824 = vmatprep.subr.bf16.mxu0 %v5870_v23  ;;  %3050 = vmatprep.subr.bf16.mxu1 %v5873_v24  ;;  %v5861_v23 = vld [vmem:[%s6357_s23 + $0xe8] ss:$16 sps:$4 sm:$0xff]   ;;  %v5948_v24 = vld [vmem:[%s7528_s2 + $0x1c4] ss:$16 sps:$4 sm:$0xff]  }
  0x8c   : > { %2825 = vmatpush1.bf16.msra.mxu0 %v5868_v25  ;;  %3051 = vmatpush1.bf16.msra.mxu1 %v5871_v26  ;;  %v5951_v25 = vld [vmem:[%s7528_s2 + $0x1cc] ss:$16 sps:$4 sm:$0xff]   ;;  %v5946_v26 = vld [vmem:[%s7528_s2 + $0x1c0] ss:$16 sps:$4 sm:$0xff]  }
  0x8d   : > { %2826 = vmatprep.subr.bf16.mxu0 %v5876_v27  ;;  %3052 = vmatprep.subr.bf16.mxu1 %v5879_v28  ;;  %v5949_v27 = vld [vmem:[%s7528_s2 + $0x1c8] ss:$16 sps:$4 sm:$0xff]   ;;  %v5954_v28 = vld [vmem:[%s7528_s2 + $0x1e4] ss:$16 sps:$4 sm:$0xff]  }
  0x8e   : > { %1640 = vmatmul.mubr.bf16.gmra.mrb[4].mxu0 %v5843_v29  ;;  %1866 = vmatmul.mubr.bf16.gmra.mrb[4].mxu1 %v5843_v29  ;;  %v5957_v29 = vld [vmem:[%s7528_s2 + $0x1ec] ss:$16 sps:$4 sm:$0xff]  }
  0x8f   : > { %1649 = vmatprep.mubr.bf16.mxu0 %v5844_v30  ;;  %1875 = vmatprep.mubr.bf16.mxu1 %v5844_v30  ;;  %v5952_v30 = vld [vmem:[%s7528_s2 + $0x1e0] ss:$16 sps:$4 sm:$0xff]  }
  0x90   : > { %2827 = vmatpush1.bf16.msra.mxu0 %v5874_v31  ;;  %3053 = vmatpush1.bf16.msra.mxu1 %v5877_v32  ;;  %v5955_v31 = vld [vmem:[%s7528_s2 + $0x1e8] ss:$16 sps:$4 sm:$0xff]   ;;  %v5960_v32 = vld [vmem:[%s7528_s2 + $0x204] ss:$16 sps:$4 sm:$0xff]  }
  0x91   : > { %2828 = vmatprep.subr.bf16.mxu0 %v5882_v33  ;;  %3054 = vmatprep.subr.bf16.mxu1 %v5885_v34  ;;  %v5963_v33 = vld [vmem:[%s7528_s2 + $0x20c] ss:$16 sps:$4 sm:$0xff]   ;;  %v664_v34 = vlaneseq }
  0x94   : > { %2829 = vmatpush1.bf16.msra.mxu0 %v5880_v35  ;;  %3055 = vmatpush1.bf16.msra.mxu1 %v5883_v37  ;;  %v6838_v35 = vshrl.u32 %v664_v34, 7 }
  0x95   : > { %2830 = vmatprep.subr.bf16.mxu0 %v5888_v39  ;;  %3056 = vmatprep.subr.bf16.mxu1 %v5891_v40 }
  0x96   : > { %1650 = vmatmul.mubr.bf16.gmra.mrb[8].mxu0 %v5846_v36  ;;  %1876 = vmatmul.mubr.bf16.gmra.mrb[8].mxu1 %v5846_v36  ;;  %v666_v36 = vsub.s32 0, %v6838_v35  ;;  %v674_v37 = vsub.s32 2, %v6838_v35  ;;  %v670_v39 = vsub.s32 1, %v6838_v35  ;;  %v678_v40 = vsub.s32 3, %v6838_v35 }
  0x97   : > { %1659 = vmatprep.mubr.bf16.mxu0 %v5847_v38  ;;  %1885 = vmatprep.mubr.bf16.mxu1 %v5847_v38  ;;  %v662_v38 = vld [vmem:[%s7534_s8] sm:$0xf] }
  0x98   : > { %2831 = vmatpush1.bf16.msra.mxu0 %v5886_v41  ;;  %3057 = vmatpush1.bf16.msra.mxu1 %v5889_v42  ;;  %v6849_v41 = vrot.slane %v662_v38, %v666_v36  ;;  %v6853_v42 = vrot.slane %v662_v38, %v674_v37 }
  0x99   : > { %2832 = vmatprep.subr.bf16.mxu0 %v5894_v43  ;;  %3058 = vmatprep.subr.bf16.mxu1 %v5897_v44  ;;  %v6857_v43 = vrot.slane %v662_v38, %v670_v39  ;;  %v6861_v44 = vrot.slane %v662_v38, %v678_v40 }
  0x9c   : > { %2833 = vmatpush1.bf16.msra.mxu0 %v5892_v45  ;;  %3059 = vmatpush1.bf16.msra.mxu1 %v5895_v46 }
  0x9d   : > { %2834 = vmatprep.subr.bf16.mxu0 %v5900_v47  ;;  %3060 = vmatprep.subr.bf16.mxu1 %v5903_v48 }
  0x9e   : > { %1660 = vmatmul.mubr.bf16.gmra.mrb[12].mxu0 %v5849_v49  ;;  %1886 = vmatmul.mubr.bf16.gmra.mrb[12].mxu1 %v5849_v49 }
  0x9f   : > { %1669 = vmatprep.mubr.bf16.mxu0 %v5850_v50  ;;  %1895 = vmatprep.mubr.bf16.mxu1 %v5850_v50 }
  0xa0   : > { %2835 = vmatpush1.bf16.msra.mxu0 %v5898_v51  ;;  %3061 = vmatpush1.bf16.msra.mxu1 %v5901_v52 }
  0xa1   : > { %2836 = vmatprep.subr.bf16.mxu0 %v5906_v53  ;;  %3062 = vmatprep.subr.bf16.mxu1 %v5909_v54 }
  0xa4   : > { %2837 = vmatpush1.bf16.msra.mxu0 %v5904_v55  ;;  %3063 = vmatpush1.bf16.msra.mxu1 %v5907_v56 }
  0xa5   : > { %2838 = vmatprep.subr.bf16.mxu0 %v5912_v57  ;;  %3064 = vmatprep.subr.bf16.mxu1 %v5915_v58 }
  0xa6   : > { %1670 = vmatmul.mubr.bf16.gmra.mrb[16].mxu0 %v5852_v59  ;;  %1896 = vmatmul.mubr.bf16.gmra.mrb[16].mxu1 %v5852_v59 }
  0xa7   : > { %1679 = vmatprep.mubr.bf16.mxu0 %v5853_v60  ;;  %1905 = vmatprep.mubr.bf16.mxu1 %v5853_v60 }
  0xa8   : > { %2839 = vmatpush1.bf16.msra.mxu0 %v5910_v61  ;;  %3065 = vmatpush1.bf16.msra.mxu1 %v5913_v62 }
  0xa9   : > { %2840 = vmatprep.subr.bf16.mxu0 %v5918_v63  ;;  %3066 = vmatprep.subr.bf16.mxu1 %v5921_v0 }
  0xac   : > { %2841 = vmatpush1.bf16.msra.mxu0 %v5916_v1  ;;  %3067 = vmatpush1.bf16.msra.mxu1 %v5919_v2 }
  0xad   : > { %2842 = vmatprep.subr.bf16.mxu0 %v5924_v3  ;;  %3068 = vmatprep.subr.bf16.mxu1 %v5927_v4 }
  0xae   : > { %1680 = vmatmul.mubr.bf16.gmra.mrb[20].mxu0 %v5855_v5  ;;  %1906 = vmatmul.mubr.bf16.gmra.mrb[20].mxu1 %v5855_v5 }
  0xaf   : > { %1689 = vmatprep.mubr.bf16.mxu0 %v5856_v6  ;;  %1915 = vmatprep.mubr.bf16.mxu1 %v5856_v6 }
  0xb0   : > { %2843 = vmatpush1.bf16.msra.mxu0 %v5922_v7  ;;  %3069 = vmatpush1.bf16.msra.mxu1 %v5925_v8 }
  0xb1   : > { %2844 = vmatprep.subr.bf16.mxu0 %v5930_v9  ;;  %3070 = vmatprep.subr.bf16.mxu1 %v5933_v10 }
  0xb4   : > { %2845 = vmatpush1.bf16.msra.mxu0 %v5928_v11  ;;  %3071 = vmatpush1.bf16.msra.mxu1 %v5931_v12  ;;  %v5958_v11 = vld [vmem:[%s7528_s2 + $0x200] ss:$16 sps:$4 sm:$0xff]   ;;  %v5961_v12 = vld [vmem:[%s7528_s2 + $0x208] ss:$16 sps:$4 sm:$0xff]  }
  0xb5   : > { %2846 = vmatprep.subr.bf16.mxu0 %v5936_v13  ;;  %3072 = vmatprep.subr.bf16.mxu1 %v5939_v14 }
  0xb6   : > { %1690 = vmatmul.mubr.bf16.gmra.mrb[24].mxu0 %v5858_v15  ;;  %1916 = vmatmul.mubr.bf16.gmra.mrb[24].mxu1 %v5858_v15 }
  0xb7   : > { %1699 = vmatprep.mubr.bf16.mxu0 %v5859_v16  ;;  %1925 = vmatprep.mubr.bf16.mxu1 %v5859_v16 }
  0xb8   : > { %2847 = vmatpush1.bf16.msra.mxu0 %v5934_v17  ;;  %3073 = vmatpush1.bf16.msra.mxu1 %v5937_v18  ;;  %v5966_v17 = vld [vmem:[%s7528_s2 + $0x224] ss:$16 sps:$4 sm:$0xff]   ;;  %v5969_v18 = vld [vmem:[%s7528_s2 + $0x22c] ss:$16 sps:$4 sm:$0xff]  }
  0xb9   : > { %2848 = vmatprep.subr.bf16.mxu0 %v5942_v19  ;;  %3074 = vmatprep.subr.bf16.mxu1 %v5945_v20 }
  0xbc   : > { %2849 = vmatpush1.bf16.msra.mxu0 %v5940_v21  ;;  %3075 = vmatpush1.bf16.msra.mxu1 %v5943_v22 }
  0xbd   : > { %2850 = vmatprep.subr.bf16.mxu0 %v5948_v24  ;;  %3076 = vmatprep.subr.bf16.mxu1 %v5951_v25 }
  0xbe   : > { %1700 = vmatmul.mubr.bf16.gmra.mrb[28].mxu0 %v5861_v23  ;;  %1926 = vmatmul.mubr.bf16.gmra.mrb[28].mxu1 %v5861_v23 }
  0xc0   : > { %2851 = vmatpush1.bf16.msra.mxu0 %v5946_v26  ;;  %3077 = vmatpush1.bf16.msra.mxu1 %v5949_v27 }
  0xc1   : > { %2852 = vmatprep.subr.bf16.mxu0 %v5954_v28  ;;  %3078 = vmatprep.subr.bf16.mxu1 %v5957_v29  ;;  %v5964_v29 = vld [vmem:[%s7528_s2 + $0x220] ss:$16 sps:$4 sm:$0xff]  }
  0xc4   : > { %2853 = vmatpush1.bf16.msra.mxu0 %v5952_v30  ;;  %3079 = vmatpush1.bf16.msra.mxu1 %v5955_v31  ;;  %v5967_v30 = vld [vmem:[%s7528_s2 + $0x228] ss:$16 sps:$4 sm:$0xff]   ;;  %v5972_v31 = vld [vmem:[%s7528_s2 + $0x244] ss:$16 sps:$4 sm:$0xff]  }
  0xc5   : > { %2935 = vmatprep.subr.bf16.mxu0 %v5960_v32  ;;  %3161 = vmatprep.subr.bf16.mxu1 %v5963_v33 }
 0x159   : > { %v1631_v45 = vpop.f32.mrb[0].mxu0  ;;  %v1857_v46 = vpop.f32.mrb[0].mxu1 }
 0x15a   : > { %v5358_v47 = vadd.f32 %v1631_v45, %v6849_v41  ;;  %v5390_v48 = vadd.f32 %v1857_v46, %v6853_v42  ;;  %v1633_v49 = vpop.f32.mrb[1].mxu0  ;;  %v1859_v50 = vpop.f32.mrb[1].mxu1  ;;  %v5975_v45 = vld [vmem:[%s7528_s2 + $0x24c] ss:$16 sps:$4 sm:$0xff]  }
 0x15b   : > { %v5359_v51 = vadd.f32 %v1633_v49, %v6857_v43  ;;  %v5391_v52 = vadd.f32 %v1859_v50, %v6861_v44  ;;  %v1635_v53 = vpop.f32.mrb[2].mxu0  ;;  %v1861_v54 = vpop.f32.mrb[2].mxu1 }
 0x15c   : > { %v5360_v55 = vadd.f32 %v1635_v53, %v6849_v41  ;;  %v5392_v56 = vadd.f32 %v1861_v54, %v6853_v42  ;;  %v1637_v57 = vpop.f32.mrb[3].mxu0  ;;  %v1863_v58 = vpop.f32.mrb[3].mxu1  ;;  %v1936_v61 = vmax.f32 %v5358_v47, 0.0  ;;  %v1938_v62 = vmax.f32 %v5390_v48, 0.0 }
 0x15d   : > { %v5361_v59 = vadd.f32 %v1637_v57, %v6857_v43  ;;  %v5393_v60 = vadd.f32 %v1863_v58, %v6861_v44  ;;  %v1937_v1 = vmax.f32 %v5359_v51, 0.0  ;;  %v1939_v2 = vmax.f32 %v5391_v52, 0.0  ;;  %v5973_v57 = vld [vmem:[%s7528_s2 + $0x248] ss:$16 sps:$4 sm:$0xff]  }
 0x15e   : > { %v1940_v63 = vmax.f32 %v5360_v55, 0.0  ;;  %v1942_v0 = vmax.f32 %v5392_v56, 0.0  ;;  %v5970_v56 = vld [vmem:[%s7528_s2 + $0x240] ss:$16 sps:$4 sm:$0xff]  }
 0x15f   : > { %v1941_v3 = vmax.f32 %v5361_v59, 0.0  ;;  %v1943_v4 = vmax.f32 %v5393_v60, 0.0 }
 0x160   : > { %v2000_v5 = vpack.c.bf16 %v1940_v63, %v1936_v61  ;;  %v6871_v6 = vpack.c.bf16 %v1942_v0, %v1938_v62  ;;  %v5978_v62 = vld [vmem:[%s7528_s2 + $0x264] ss:$16 sps:$4 sm:$0xff]   ;;  %v5981_v63 = vld [vmem:[%s7528_s2 + $0x26c] ss:$16 sps:$4 sm:$0xff]  }
 0x161   : > { %v2001_v7 = vpack.c.bf16 %v1941_v3, %v1937_v1  ;;  %v6873_v8 = vpack.c.bf16 %v1943_v4, %v1939_v2  ;;  %v1641_v9 = vpop.f32.mrb[4].mxu0  ;;  %v1867_v10 = vpop.f32.mrb[4].mxu1 }
 0x162   : > { %v5362_v13 = vadd.f32 %v1641_v9, %v6849_v41  ;;  %v5394_v14 = vadd.f32 %v1867_v10, %v6853_v42  ;;  %v1643_v15 = vpop.f32.mrb[5].mxu0  ;;  %v1869_v16 = vpop.f32.mrb[5].mxu1 }
 0x163   : > { %v5363_v19 = vadd.f32 %v1643_v15, %v6857_v43  ;;  %v5395_v20 = vadd.f32 %v1869_v16, %v6861_v44  ;;  %v1645_v21 = vpop.f32.mrb[6].mxu0  ;;  %v1871_v22 = vpop.f32.mrb[6].mxu1  ;;  %2854 = vmatprep.mubr.bf16.mxu0 %v2001_v7  ;;  %3080 = vmatprep.mubr.bf16.mxu1 %v2001_v7 }
 0x164   : > { %v5364_v23 = vadd.f32 %v1645_v21, %v6849_v41  ;;  %v5396_v24 = vadd.f32 %v1871_v22, %v6853_v42  ;;  %v1647_v25 = vpop.f32.mrb[7].mxu0  ;;  %v1873_v26 = vpop.f32.mrb[7].mxu1  ;;  %2855 = vmatmul.mubr.bf16.vlgmr.msra.gmra.mrb[32].mxu0 %v2000_v5  ;;  %3081 = vmatmul.mubr.bf16.vlgmr.msra.gmra.mrb[32].mxu1 %v2000_v5  ;;  %v1944_v32 = vmax.f32 %v5362_v13, 0.0  ;;  %v1946_v33 = vmax.f32 %v5394_v14, 0.0  ;;  %v5979_v13 = vld [vmem:[%s7528_s2 + $0x268] ss:$16 sps:$4 sm:$0xff]  }
 0x165   : > { %v5365_v27 = vadd.f32 %v1647_v25, %v6857_v43  ;;  %v5397_v28 = vadd.f32 %v1873_v26, %v6861_v44  ;;  %2936 = vmatpush1.bf16.msra.mxu0 %v5958_v11  ;;  %3162 = vmatpush1.bf16.msra.mxu1 %v5961_v12  ;;  %v1945_v46 = vmax.f32 %v5363_v19, 0.0  ;;  %v1947_v47 = vmax.f32 %v5395_v20, 0.0  ;;  %v5976_v12 = vld [vmem:[%s7528_s2 + $0x260] ss:$16 sps:$4 sm:$0xff]   ;;  %v5984_v14 = vld [vmem:[%s7528_s2 + $0x284] ss:$16 sps:$4 sm:$0xff]  }
 0x166   : > { %v1948_v34 = vmax.f32 %v5364_v23, 0.0  ;;  %v1950_v38 = vmax.f32 %v5396_v24, 0.0  ;;  %2937 = vmatprep.subr.bf16.mxu0 %v5966_v17  ;;  %3163 = vmatprep.subr.bf16.mxu1 %v5969_v18  ;;  %v5987_v19 = vld [vmem:[%s7528_s2 + $0x28c] ss:$16 sps:$4 sm:$0xff]  }
 0x167   : > { %v1949_v48 = vmax.f32 %v5365_v27, 0.0  ;;  %v1951_v49 = vmax.f32 %v5397_v28, 0.0 }
 0x168   : > { %v2004_v50 = vpack.c.bf16 %v1948_v34, %v1944_v32  ;;  %v6907_v51 = vpack.c.bf16 %v1950_v38, %v1946_v33 }
 0x169   : > { %v2005_v52 = vpack.c.bf16 %v1949_v48, %v1945_v46  ;;  %v6909_v53 = vpack.c.bf16 %v1951_v49, %v1947_v47  ;;  %v1651_v54 = vpop.f32.mrb[8].mxu0  ;;  %v1877_v55 = vpop.f32.mrb[8].mxu1  ;;  %2938 = vmatpush1.bf16.msra.mxu0 %v5964_v29  ;;  %3164 = vmatpush1.bf16.msra.mxu1 %v5967_v30  ;;  %v5982_v30 = vld [vmem:[%s7528_s2 + $0x280] ss:$16 sps:$4 sm:$0xff]   ;;  %v5993_v46 = vld [vmem:[%s7528_s2 + $0x2ac] ss:$16 sps:$4 sm:$0xff]  }
 0x16a   : > { %v5366_v58 = vadd.f32 %v1651_v54, %v6849_v41  ;;  %v5398_v59 = vadd.f32 %v1877_v55, %v6853_v42  ;;  %v1653_v60 = vpop.f32.mrb[9].mxu0  ;;  %v1879_v61 = vpop.f32.mrb[9].mxu1  ;;  %2939 = vmatprep.subr.bf16.mxu0 %v5972_v31  ;;  %3165 = vmatprep.subr.bf16.mxu1 %v5975_v45  ;;  %v5985_v31 = vld [vmem:[%s7528_s2 + $0x288] ss:$16 sps:$4 sm:$0xff]   ;;  %v5990_v45 = vld [vmem:[%s7528_s2 + $0x2a4] ss:$16 sps:$4 sm:$0xff]  }
 0x16b   : > { %v5367_v0 = vadd.f32 %v1653_v60, %v6857_v43  ;;  %v5399_v1 = vadd.f32 %v1879_v61, %v6861_v44  ;;  %v1655_v2 = vpop.f32.mrb[10].mxu0  ;;  %v1881_v3 = vpop.f32.mrb[10].mxu1  ;;  %2864 = vmatprep.mubr.bf16.mxu0 %v2005_v52  ;;  %3090 = vmatprep.mubr.bf16.mxu1 %v2005_v52  ;;  %v5991_v60 = vld [vmem:[%s7528_s2 + $0x2a8] ss:$16 sps:$4 sm:$0xff]   ;;  %v5996_v61 = vld [vmem:[%s7528_s2 + $0x2c4] ss:$16 sps:$4 sm:$0xff]  }
 0x16c   : > { %v5368_v4 = vadd.f32 %v1655_v2, %v6849_v41  ;;  %v5400_v5 = vadd.f32 %v1881_v3, %v6853_v42  ;;  %v1657_v7 = vpop.f32.mrb[11].mxu0  ;;  %v1883_v9 = vpop.f32.mrb[11].mxu1  ;;  %2865 = vmatmul.mubr.bf16.gmra.mrb[36].mxu0 %v2004_v50  ;;  %3091 = vmatmul.mubr.bf16.gmra.mrb[36].mxu1 %v2004_v50  ;;  %v1952_v15 = vmax.f32 %v5366_v58, 0.0  ;;  %v1954_v16 = vmax.f32 %v5398_v59, 0.0  ;;  %v5988_v59 = vld [vmem:[%s7528_s2 + $0x2a0] ss:$16 sps:$4 sm:$0xff]  }
 0x16d   : > { %v5369_v10 = vadd.f32 %v1657_v7, %v6857_v43  ;;  %v5401_v11 = vadd.f32 %v1883_v9, %v6861_v44  ;;  %2940 = vmatpush1.bf16.msra.mxu0 %v5970_v56  ;;  %3166 = vmatpush1.bf16.msra.mxu1 %v5973_v57  ;;  %v1953_v20 = vmax.f32 %v5367_v0, 0.0  ;;  %v1955_v21 = vmax.f32 %v5399_v1, 0.0  ;;  %v5999_v2 = vld [vmem:[%s7528_s2 + $0x2cc] ss:$16 sps:$4 sm:$0xff]  }
 0x16e   : > { %v1956_v17 = vmax.f32 %v5368_v4, 0.0  ;;  %v1958_v18 = vmax.f32 %v5400_v5, 0.0  ;;  %2941 = vmatprep.subr.bf16.mxu0 %v5978_v62  ;;  %3167 = vmatprep.subr.bf16.mxu1 %v5981_v63 }
 0x16f   : > { %v1957_v22 = vmax.f32 %v5369_v10, 0.0  ;;  %v1959_v23 = vmax.f32 %v5401_v11, 0.0 }
 0x170   : > { %v2008_v24 = vpack.c.bf16 %v1956_v17, %v1952_v15  ;;  %v6943_v25 = vpack.c.bf16 %v1958_v18, %v1954_v16  ;;  %v5994_v15 = vld [vmem:[%s7528_s2 + $0x2c0] ss:$16 sps:$4 sm:$0xff]   ;;  %v5997_v16 = vld [vmem:[%s7528_s2 + $0x2c8] ss:$16 sps:$4 sm:$0xff]  }
 0x171   : > { %v2009_v26 = vpack.c.bf16 %v1957_v22, %v1953_v20  ;;  %v6945_v27 = vpack.c.bf16 %v1959_v23, %v1955_v21  ;;  %v1661_v28 = vpop.f32.mrb[12].mxu0  ;;  %v1887_v29 = vpop.f32.mrb[12].mxu1  ;;  %2942 = vmatpush1.bf16.msra.mxu0 %v5976_v12  ;;  %3168 = vmatpush1.bf16.msra.mxu1 %v5979_v13  ;;  %v6002_v21 = vld [vmem:[%s7528_s2 + $0x2e4] ss:$16 sps:$4 sm:$0xff]   ;;  %v6005_v22 = vld [vmem:[%s7528_s2 + $0x2ec] ss:$16 sps:$4 sm:$0xff]  }
 0x172   : > { %v5370_v32 = vadd.f32 %v1661_v28, %v6849_v41  ;;  %v5402_v33 = vadd.f32 %v1887_v29, %v6853_v42  ;;  %v1663_v34 = vpop.f32.mrb[13].mxu0  ;;  %v1889_v38 = vpop.f32.mrb[13].mxu1  ;;  %2943 = vmatprep.subr.bf16.mxu0 %v5984_v14  ;;  %3169 = vmatprep.subr.bf16.mxu1 %v5987_v19 }
 0x173   : > { %v5371_v47 = vadd.f32 %v1663_v34, %v6857_v43  ;;  %v5403_v48 = vadd.f32 %v1889_v38, %v6861_v44  ;;  %v1665_v49 = vpop.f32.mrb[14].mxu0  ;;  %v1891_v50 = vpop.f32.mrb[14].mxu1  ;;  %2874 = vmatprep.mubr.bf16.mxu0 %v2009_v26  ;;  %3100 = vmatprep.mubr.bf16.mxu1 %v2009_v26  ;;  %v6000_v38 = vld [vmem:[%s7528_s2 + $0x2e0] ss:$16 sps:$4 sm:$0xff]  }
 0x174   : > { %v5372_v52 = vadd.f32 %v1665_v49, %v6849_v41  ;;  %v5404_v54 = vadd.f32 %v1891_v50, %v6853_v42  ;;  %v1667_v55 = vpop.f32.mrb[15].mxu0  ;;  %v1893_v56 = vpop.f32.mrb[15].mxu1  ;;  %2875 = vmatmul.mubr.bf16.gmra.mrb[40].mxu0 %v2008_v24  ;;  %3101 = vmatmul.mubr.bf16.gmra.mrb[40].mxu1 %v2008_v24  ;;  %v1960_v62 = vmax.f32 %v5370_v32, 0.0  ;;  %v1962_v63 = vmax.f32 %v5402_v33, 0.0 }
 0x175   : > { %v5373_v57 = vadd.f32 %v1667_v55, %v6857_v43  ;;  %v5405_v58 = vadd.f32 %v1893_v56, %v6861_v44  ;;  %2944 = vmatpush1.bf16.msra.mxu0 %v5982_v30  ;;  %3170 = vmatpush1.bf16.msra.mxu1 %v5985_v31  ;;  %v1961_v3 = vmax.f32 %v5371_v47, 0.0  ;;  %v1963_v4 = vmax.f32 %v5403_v48, 0.0 }
 0x176   : > { %v1964_v0 = vmax.f32 %v5372_v52, 0.0  ;;  %v1966_v1 = vmax.f32 %v5404_v54, 0.0  ;;  %2945 = vmatprep.subr.bf16.mxu0 %v5990_v45  ;;  %3171 = vmatprep.subr.bf16.mxu1 %v5993_v46  ;;  %v6003_v45 = vld [vmem:[%s7528_s2 + $0x2e8] ss:$16 sps:$4 sm:$0xff]   ;;  %v6008_v46 = vld [vmem:[%s7528_s2 + $0x304] ss:$16 sps:$4 sm:$0xff]  }
 0x177   : > { %v1965_v5 = vmax.f32 %v5373_v57, 0.0  ;;  %v1967_v7 = vmax.f32 %v5405_v58, 0.0  ;;  %v6011_v52 = vld [vmem:[%s7528_s2 + $0x30c] ss:$16 sps:$4 sm:$0xff]  }
 0x178   : > { %v2012_v9 = vpack.c.bf16 %v1964_v0, %v1960_v62  ;;  %v6979_v10 = vpack.c.bf16 %v1966_v1, %v1962_v63  ;;  %v6006_v0 = vld [vmem:[%s7528_s2 + $0x300] ss:$16 sps:$4 sm:$0xff]   ;;  %v6009_v1 = vld [vmem:[%s7528_s2 + $0x308] ss:$16 sps:$4 sm:$0xff]  }
 0x179   : > { %v2013_v11 = vpack.c.bf16 %v1965_v5, %v1961_v3  ;;  %v6981_v12 = vpack.c.bf16 %v1967_v7, %v1963_v4  ;;  %v1671_v13 = vpop.f32.mrb[16].mxu0  ;;  %v1897_v14 = vpop.f32.mrb[16].mxu1  ;;  %2946 = vmatpush1.bf16.msra.mxu0 %v5988_v59  ;;  %3172 = vmatpush1.bf16.msra.mxu1 %v5991_v60  ;;  %v6014_v7 = vld [vmem:[%s7528_s2 + $0x324] ss:$16 sps:$4 sm:$0xff]  }
 0x17a   : > { %v5374_v17 = vadd.f32 %v1671_v13, %v6849_v41  ;;  %v5406_v18 = vadd.f32 %v1897_v14, %v6853_v42  ;;  %v1673_v19 = vpop.f32.mrb[17].mxu0  ;;  %v1899_v20 = vpop.f32.mrb[17].mxu1  ;;  %2947 = vmatprep.subr.bf16.mxu0 %v5996_v61  ;;  %3173 = vmatprep.subr.bf16.mxu1 %v5999_v2 }
 0x17b   : > { %v5375_v23 = vadd.f32 %v1673_v19, %v6857_v43  ;;  %v5407_v24 = vadd.f32 %v1899_v20, %v6861_v44  ;;  %v1675_v26 = vpop.f32.mrb[18].mxu0  ;;  %v1901_v28 = vpop.f32.mrb[18].mxu1  ;;  %2884 = vmatprep.mubr.bf16.mxu0 %v2013_v11  ;;  %3110 = vmatprep.mubr.bf16.mxu1 %v2013_v11 }
 0x17c   : > { %v5376_v29 = vadd.f32 %v1675_v26, %v6849_v41  ;;  %v5408_v30 = vadd.f32 %v1901_v28, %v6853_v42  ;;  %v1677_v31 = vpop.f32.mrb[19].mxu0  ;;  %v1903_v32 = vpop.f32.mrb[19].mxu1  ;;  %2885 = vmatmul.mubr.bf16.gmra.mrb[44].mxu0 %v2012_v9  ;;  %3111 = vmatmul.mubr.bf16.gmra.mrb[44].mxu1 %v2012_v9  ;;  %v1968_v47 = vmax.f32 %v5374_v17, 0.0  ;;  %v1970_v48 = vmax.f32 %v5406_v18, 0.0  ;;  %v6017_v9 = vld [vmem:[%s7528_s2 + $0x32c] ss:$16 sps:$4 sm:$0xff]  }
 0x17d   : > { %v5377_v33 = vadd.f32 %v1677_v31, %v6857_v43  ;;  %v5409_v34 = vadd.f32 %v1903_v32, %v6861_v44  ;;  %2948 = vmatpush1.bf16.msra.mxu0 %v5994_v15  ;;  %3174 = vmatpush1.bf16.msra.mxu1 %v5997_v16  ;;  %v1969_v54 = vmax.f32 %v5375_v23, 0.0  ;;  %v1971_v55 = vmax.f32 %v5407_v24, 0.0  ;;  %v6015_v23 = vld [vmem:[%s7528_s2 + $0x328] ss:$16 sps:$4 sm:$0xff]   ;;  %v6020_v24 = vld [vmem:[%s7528_s2 + $0x344] ss:$16 sps:$4 sm:$0xff]  }
 0x17e   : > { %v1972_v49 = vmax.f32 %v5376_v29, 0.0  ;;  %v1974_v50 = vmax.f32 %v5408_v30, 0.0  ;;  %2949 = vmatprep.subr.bf16.mxu0 %v6002_v21  ;;  %3175 = vmatprep.subr.bf16.mxu1 %v6005_v22  ;;  %v6012_v22 = vld [vmem:[%s7528_s2 + $0x320] ss:$16 sps:$4 sm:$0xff]   ;;  %v6023_v31 = vld [vmem:[%s7528_s2 + $0x34c] ss:$16 sps:$4 sm:$0xff]  }
 0x17f   : > { %v1973_v56 = vmax.f32 %v5377_v33, 0.0  ;;  %v1975_v57 = vmax.f32 %v5409_v34, 0.0 }
 0x180   : > { %v2016_v58 = vpack.c.bf16 %v1972_v49, %v1968_v47  ;;  %v7015_v59 = vpack.c.bf16 %v1974_v50, %v1970_v48 }
 0x181   : > { %v2017_v60 = vpack.c.bf16 %v1973_v56, %v1969_v54  ;;  %v7017_v61 = vpack.c.bf16 %v1975_v57, %v1971_v55  ;;  %v1681_v62 = vpop.f32.mrb[20].mxu0  ;;  %v1907_v63 = vpop.f32.mrb[20].mxu1  ;;  %2950 = vmatpush1.bf16.msra.mxu0 %v6000_v38  ;;  %3176 = vmatpush1.bf16.msra.mxu1 %v6003_v45  ;;  %v6021_v54 = vld [vmem:[%s7528_s2 + $0x348] ss:$16 sps:$4 sm:$0xff]  }
 0x182   : > { %v5378_v2 = vadd.f32 %v1681_v62, %v6849_v41  ;;  %v5410_v3 = vadd.f32 %v1907_v63, %v6853_v42  ;;  %v1683_v4 = vpop.f32.mrb[21].mxu0  ;;  %v1909_v5 = vpop.f32.mrb[21].mxu1  ;;  %2951 = vmatprep.subr.bf16.mxu0 %v6008_v46  ;;  %3177 = vmatprep.subr.bf16.mxu1 %v6011_v52  ;;  %v6018_v52 = vld [vmem:[%s7528_s2 + $0x340] ss:$16 sps:$4 sm:$0xff]   ;;  %v6029_v62 = vld [vmem:[%s7528_s2 + $0x36c] ss:$16 sps:$4 sm:$0xff]  }
 0x183   : > { %v5379_v11 = vadd.f32 %v1683_v4, %v6857_v43  ;;  %v5411_v13 = vadd.f32 %v1909_v5, %v6861_v44  ;;  %v1685_v14 = vpop.f32.mrb[22].mxu0  ;;  %v1911_v15 = vpop.f32.mrb[22].mxu1  ;;  %2894 = vmatprep.mubr.bf16.mxu0 %v2017_v60  ;;  %3120 = vmatprep.mubr.bf16.mxu1 %v2017_v60  ;;  %v6026_v60 = vld [vmem:[%s7528_s2 + $0x364] ss:$16 sps:$4 sm:$0xff]  }
 0x184   : > { %v5380_v16 = vadd.f32 %v1685_v14, %v6849_v41  ;;  %v5412_v17 = vadd.f32 %v1911_v15, %v6853_v42  ;;  %v1687_v18 = vpop.f32.mrb[23].mxu0  ;;  %v1913_v19 = vpop.f32.mrb[23].mxu1  ;;  %2895 = vmatmul.mubr.bf16.gmra.mrb[48].mxu0 %v2016_v58  ;;  %3121 = vmatmul.mubr.bf16.gmra.mrb[48].mxu1 %v2016_v58  ;;  %v1976_v26 = vmax.f32 %v5378_v2, 0.0  ;;  %v1978_v28 = vmax.f32 %v5410_v3, 0.0  ;;  %v6027_v14 = vld [vmem:[%s7528_s2 + $0x368] ss:$16 sps:$4 sm:$0xff]  }
 0x185   : > { %v5381_v20 = vadd.f32 %v1687_v18, %v6857_v43  ;;  %v5413_v21 = vadd.f32 %v1913_v19, %v6861_v44  ;;  %2952 = vmatpush1.bf16.msra.mxu0 %v6006_v0  ;;  %3178 = vmatpush1.bf16.msra.mxu1 %v6009_v1  ;;  %v1977_v32 = vmax.f32 %v5379_v11, 0.0  ;;  %v1979_v33 = vmax.f32 %v5411_v13, 0.0  ;;  %v6024_v13 = vld [vmem:[%s7528_s2 + $0x360] ss:$16 sps:$4 sm:$0xff]   ;;  %v6032_v15 = vld [vmem:[%s7528_s2 + $0x384] ss:$16 sps:$4 sm:$0xff]  }
 0x186   : > { %v1980_v29 = vmax.f32 %v5380_v16, 0.0  ;;  %v1982_v30 = vmax.f32 %v5412_v17, 0.0  ;;  %2953 = vmatprep.subr.bf16.mxu0 %v6014_v7  ;;  %3179 = vmatprep.subr.bf16.mxu1 %v6017_v9 }
 0x187   : > { %v1981_v34 = vmax.f32 %v5381_v20, 0.0  ;;  %v1983_v38 = vmax.f32 %v5413_v21, 0.0  ;;  %v6035_v20 = vld [vmem:[%s7528_s2 + $0x38c] ss:$16 sps:$4 sm:$0xff]  }
 0x188   : > { %v2020_v45 = vpack.c.bf16 %v1980_v29, %v1976_v26  ;;  %v7051_v46 = vpack.c.bf16 %v1982_v30, %v1978_v28 }
 0x189   : > { %v2021_v47 = vpack.c.bf16 %v1981_v34, %v1977_v32  ;;  %v7053_v48 = vpack.c.bf16 %v1983_v38, %v1979_v33  ;;  %v1691_v49 = vpop.f32.mrb[24].mxu0  ;;  %v1917_v50 = vpop.f32.mrb[24].mxu1  ;;  %2954 = vmatpush1.bf16.msra.mxu0 %v6012_v22  ;;  %3180 = vmatpush1.bf16.msra.mxu1 %v6015_v23  ;;  %v6030_v33 = vld [vmem:[%s7528_s2 + $0x380] ss:$16 sps:$4 sm:$0xff]   ;;  %v6033_v34 = vld [vmem:[%s7528_s2 + $0x388] ss:$16 sps:$4 sm:$0xff]  }
 0x18a   : > { %v5382_v55 = vadd.f32 %v1691_v49, %v6849_v41  ;;  %v5414_v56 = vadd.f32 %v1917_v50, %v6853_v42  ;;  %v1693_v57 = vpop.f32.mrb[25].mxu0  ;;  %v1919_v58 = vpop.f32.mrb[25].mxu1  ;;  %2955 = vmatprep.subr.bf16.mxu0 %v6020_v24  ;;  %3181 = vmatprep.subr.bf16.mxu1 %v6023_v31  ;;  %v6038_v50 = vld [vmem:[%s7528_s2 + $0x3a4] ss:$16 sps:$4 sm:$0xff]  }
 0x18b   : > { %v5383_v63 = vadd.f32 %v1693_v57, %v6857_v43  ;;  %v5415_v0 = vadd.f32 %v1919_v58, %v6861_v44  ;;  %v1695_v1 = vpop.f32.mrb[26].mxu0  ;;  %v1921_v2 = vpop.f32.mrb[26].mxu1  ;;  %2904 = vmatprep.mubr.bf16.mxu0 %v2021_v47  ;;  %3130 = vmatprep.mubr.bf16.mxu1 %v2021_v47 }
 0x18c   : > { %v5384_v3 = vadd.f32 %v1695_v1, %v6849_v41  ;;  %v5416_v4 = vadd.f32 %v1921_v2, %v6853_v42  ;;  %v1697_v5 = vpop.f32.mrb[27].mxu0  ;;  %v1923_v7 = vpop.f32.mrb[27].mxu1  ;;  %2905 = vmatmul.mubr.bf16.gmra.mrb[52].mxu0 %v2020_v45  ;;  %3131 = vmatmul.mubr.bf16.gmra.mrb[52].mxu1 %v2020_v45  ;;  %v1984_v16 = vmax.f32 %v5382_v55, 0.0  ;;  %v1986_v17 = vmax.f32 %v5414_v56, 0.0  ;;  %v6036_v2 = vld [vmem:[%s7528_s2 + $0x3a0] ss:$16 sps:$4 sm:$0xff]  }
 0x18d   : > { %v5385_v9 = vadd.f32 %v1697_v5, %v6857_v43  ;;  %v5417_v11 = vadd.f32 %v1923_v7, %v6861_v44  ;;  %2956 = vmatpush1.bf16.msra.mxu0 %v6018_v52  ;;  %3182 = vmatpush1.bf16.msra.mxu1 %v6021_v54  ;;  %v1985_v21 = vmax.f32 %v5383_v63, 0.0  ;;  %v1987_v22 = vmax.f32 %v5415_v0, 0.0  ;;  %v6041_v52 = vld [vmem:[%s7528_s2 + $0x3ac] ss:$16 sps:$4 sm:$0xff]  }
 0x18e   : > { %v1988_v18 = vmax.f32 %v5384_v3, 0.0  ;;  %v1990_v19 = vmax.f32 %v5416_v4, 0.0  ;;  %2957 = vmatprep.subr.bf16.mxu0 %v6026_v60  ;;  %3183 = vmatprep.subr.bf16.mxu1 %v6029_v62 }
 0x18f   : > { %v1989_v23 = vmax.f32 %v5385_v9, 0.0  ;;  %v1991_v24 = vmax.f32 %v5417_v11, 0.0 }
 0x190   : > { %v2024_v26 = vpack.c.bf16 %v1988_v18, %v1984_v16  ;;  %v7087_v28 = vpack.c.bf16 %v1990_v19, %v1986_v17  ;;  %v6042_v18 = vld [vmem:[%s7528_s2 + $0x3c0] ss:$16 sps:$4 sm:$0xff]   ;;  %v6045_v19 = vld [vmem:[%s7528_s2 + $0x3c8] ss:$16 sps:$4 sm:$0xff]  }
 0x191   : > { %v2025_v29 = vpack.c.bf16 %v1989_v23, %v1985_v21  ;;  %v7089_v30 = vpack.c.bf16 %v1991_v24, %v1987_v22  ;;  %v1701_v31 = vpop.f32.mrb[28].mxu0  ;;  %v1927_v32 = vpop.f32.mrb[28].mxu1  ;;  %2958 = vmatpush1.bf16.msra.mxu0 %v6024_v13  ;;  %3184 = vmatpush1.bf16.msra.mxu1 %v6027_v14  ;;  %v6053_v21 = vld [vmem:[%s7528_s2 + $0x3ec] ss:$16 sps:$4 sm:$0xff]   ;;  %v6048_v22 = vld [vmem:[%s7528_s2 + $0x3e0] ss:$16 sps:$4 sm:$0xff]  }
 0x192   : > { %v5386_v38 = vadd.f32 %v1701_v31, %v6849_v41  ;;  %v5418_v45 = vadd.f32 %v1927_v32, %v6853_v42  ;;  %v1703_v47 = vpop.f32.mrb[29].mxu0  ;;  %v1929_v49 = vpop.f32.mrb[29].mxu1  ;;  %2959 = vmatprep.subr.bf16.mxu0 %v6032_v15  ;;  %3185 = vmatprep.subr.bf16.mxu1 %v6035_v20  ;;  %v6050_v20 = vld [vmem:[%s7528_s2 + $0x3e4] ss:$16 sps:$4 sm:$0xff]   ;;  %v6051_v23 = vld [vmem:[%s7528_s2 + $0x3e8] ss:$16 sps:$4 sm:$0xff]  }
 0x193   : > { %v5387_v54 = vadd.f32 %v1703_v47, %v6857_v43  ;;  %v5419_v55 = vadd.f32 %v1929_v49, %v6861_v44  ;;  %v1705_v56 = vpop.f32.mrb[30].mxu0  ;;  %v1931_v57 = vpop.f32.mrb[30].mxu1  ;;  %2914 = vmatprep.mubr.bf16.mxu0 %v2025_v29  ;;  %3140 = vmatprep.mubr.bf16.mxu1 %v2025_v29  ;;  %v6054_v24 = vld [vmem:[%s7529_s3 + $0x40] sm:$0xff]   ;;  %v6058_v31 = vld [vmem:[%s7529_s3 + $0x48] sm:$0xff]   ;;  %v6066_v47 = vld [vmem:[%s7529_s3 + $0x58] sm:$0xff]  }
 0x194   : > { %v5388_v58 = vadd.f32 %v1705_v56, %v6849_v41  ;;  %v5420_v60 = vadd.f32 %v1931_v57, %v6853_v42  ;;  %v1707_v62 = vpop.f32.mrb[31].mxu0  ;;  %v1933_v63 = vpop.f32.mrb[31].mxu1  ;;  %2915 = vmatmul.mubr.bf16.gmra.mrb[56].mxu0 %v2024_v26  ;;  %3141 = vmatmul.mubr.bf16.gmra.mrb[56].mxu1 %v2024_v26  ;;  %v6039_v41 = vld [vmem:[%s7528_s2 + $0x3a8] ss:$16 sps:$4 sm:$0xff]   ;;  %v6044_v42 = vld [vmem:[%s7528_s2 + $0x3c4] ss:$16 sps:$4 sm:$0xff]  }
 0x195   : > { %v5389_v0 = vadd.f32 %v1707_v62, %v6857_v43  ;;  %v5421_v1 = vadd.f32 %v1933_v63, %v6861_v44  ;;  %2960 = vmatpush1.bf16.msra.mxu0 %v6030_v33  ;;  %3186 = vmatpush1.bf16.msra.mxu1 %v6033_v34  ;;  %v1992_v3 = vmax.f32 %v5386_v38, 0.0  ;;  %v1994_v4 = vmax.f32 %v5418_v45, 0.0  ;;  %v6047_v44 = vld [vmem:[%s7528_s2 + $0x3cc] ss:$16 sps:$4 sm:$0xff]   ;;  %v6056_v26 = vld [vmem:[%s7529_s3 + $0xc0] sm:$0xff]   ;;  %v6062_v38 = vld [vmem:[%s7529_s3 + $0x50] sm:$0xff]  }
 0x196   : > { %v1996_v5 = vmax.f32 %v5388_v58, 0.0  ;;  %v1998_v43 = vmax.f32 %v5420_v60, 0.0  ;;  %2961 = vmatprep.subr.bf16.mxu0 %v6038_v50  ;;  %3187 = vmatprep.subr.bf16.mxu1 %v6041_v52  ;;  %v1993_v7 = vmax.f32 %v5387_v54, 0.0  ;;  %v1995_v9 = vmax.f32 %v5419_v55, 0.0  ;;  %v6057_v29 = vld [vmem:[%s7529_s3 + $0x80] sm:$0xff]   ;;  %v6060_v32 = vld [vmem:[%s7529_s3 + $0xc8] sm:$0xff]  }
 0x197   : > { %v1997_v11 = vmax.f32 %v5389_v0, 0.0  ;;  %v1999_v13 = vmax.f32 %v5421_v1, 0.0  ;;  %v6059_v33 = vld [vmem:[%s7529_s3 + $0x8] sm:$0xff]   ;;  %v6065_v45 = vld [vmem:[%s7529_s3 + $0x90] sm:$0xff]   ;;  %v6068_v49 = vld [vmem:[%s7529_s3 + $0xd8] sm:$0xff]  }
 0x198   : > { %v2028_v14 = vpack.c.bf16 %v1996_v5, %v1992_v3  ;;  %v7123_v15 = vpack.c.bf16 %v1998_v43, %v1994_v4  ;;  %v6061_v34 = vld [vmem:[%s7529_s3 + $0x88] sm:$0xff]   ;;  %v6067_v50 = vld [vmem:[%s7529_s3 + $0x18] sm:$0xff]   ;;  %v6070_v54 = vld [vmem:[%s7529_s3 + $0x60] sm:$0xff]  }
 0x199   : > { %v2029_v16 = vpack.c.bf16 %v1997_v11, %v1993_v7  ;;  %v7125_v17 = vpack.c.bf16 %v1999_v13, %v1995_v9  ;;  %2962 = vmatpush1.bf16.msra.mxu0 %v6036_v2  ;;  %3188 = vmatpush1.bf16.msra.mxu1 %v6039_v41  ;;  %v6069_v52 = vld [vmem:[%s7529_s3 + $0x98] sm:$0xff]   ;;  %v6073_v55 = vld [vmem:[%s7529_s3 + $0xa0] sm:$0xff]   ;;  %v6074_v56 = vld [vmem:[%s7529_s3 + $0x68] sm:$0xff]  }
 0x19a   : > { %2963 = vmatprep.subr.bf16.mxu0 %v6044_v42  ;;  %3189 = vmatprep.subr.bf16.mxu1 %v6047_v44  ;;  %v6076_v57 = vld [vmem:[%s7529_s3 + $0xe8] sm:$0xff]   ;;  %v6078_v62 = vld [vmem:[%s7529_s3 + $0x70] sm:$0xff]  }
 0x19b   : > { %2924 = vmatprep.mubr.bf16.mxu0 %v2029_v16  ;;  %3150 = vmatprep.mubr.bf16.mxu1 %v2029_v16  ;;  %v6075_v58 = vld [vmem:[%s7529_s3 + $0x28] sm:$0xff]   ;;  %v6081_v63 = vld [vmem:[%s7529_s3 + $0xb0] sm:$0xff]  }
 0x19c   : > { %2925 = vmatmul.mubr.bf16.gmra.mrb[60].mxu0 %v2028_v14  ;;  %3151 = vmatmul.mubr.bf16.gmra.mrb[60].mxu1 %v2028_v14  ;;  %v6077_v60 = vld [vmem:[%s7529_s3 + $0xa8] sm:$0xff]  }
 0x19d   : > { %2964 = vmatpush1.bf16.msra.mxu0 %v6042_v18  ;;  %2967 = vmatprep.mubr.bf16.mxu0 %v6873_v8 }
 0x19e   : > { %3190 = vmatpush1.bf16.msra.mxu1 %v6045_v19  ;;  %3193 = vmatprep.mubr.bf16.mxu1 %v6873_v8  ;;  %v6055_v8 = vld [vmem:[%s7529_s3] sm:$0xff]  }
 0x19f   : > { %2965 = vmatprep.subr.bf16.mxu0 %v6050_v20  ;;  %3191 = vmatprep.subr.bf16.mxu1 %v6053_v21 }
 0x1a1   : > { %2966 = vmatpush1.bf16.msra.mxu0 %v6048_v22 }
 0x1a2   : > { %3192 = vmatpush1.bf16.msra.mxu1 %v6051_v23  ;;  %5038 = vmatprep.subr.bf16.mxu0 %v6054_v24 }
 0x1a3   : > { %5102 = vmatprep.subr.bf16.mxu1 %v6056_v26 }
 0x1a4   : > { %2968 = vmatmul.mubr.bf16.vlgmr.msra.gmra.mrb[32].mxu0 %v6871_v6 }
 0x1a5   : > { %3194 = vmatmul.mubr.bf16.vlgmr.msra.gmra.mrb[32].mxu1 %v6871_v6  ;;  %2977 = vmatprep.mubr.bf16.mxu0 %v6909_v53  ;;  %v6064_v6 = vld [vmem:[%s7529_s3 + $0xd0] sm:$0xff]  }
 0x1a6   : > { %3203 = vmatprep.mubr.bf16.mxu1 %v6909_v53  ;;  %5039 = vmatpush3.bf16.msra.mxu0 %v6055_v8  ;;  %v6063_v53 = vld [vmem:[%s7529_s3 + $0x10] sm:$0xff]  }
 0x1a7   : > { %5103 = vmatpush3.bf16.msra.mxu1 %v6057_v29  ;;  %5040 = vmatprep.subr.bf16.mxu0 %v6058_v31 }
 0x1a8   : > { %5104 = vmatprep.subr.bf16.mxu1 %v6060_v32 }
 0x1aa   : > { %5041 = vmatpush3.bf16.msra.mxu0 %v6059_v33  ;;  %v6087_v33 = vld [vmem:[%s7530_s4 + $0x8] sm:$0xff]  }
 0x1ab   : > { %5105 = vmatpush3.bf16.msra.mxu1 %v6061_v34  ;;  %5042 = vmatprep.subr.bf16.mxu0 %v6062_v38 }
 0x1ac   : > { %2978 = vmatmul.mubr.bf16.gmra.mrb[36].mxu0 %v6907_v51  ;;  %5106 = vmatprep.subr.bf16.mxu1 %v6064_v6 }
 0x1ad   : > { %3204 = vmatmul.mubr.bf16.gmra.mrb[36].mxu1 %v6907_v51  ;;  %2987 = vmatprep.mubr.bf16.mxu0 %v6945_v27  ;;  %v6072_v51 = vld [vmem:[%s7529_s3 + $0xe0] sm:$0xff]  }
 0x1ae   : > { %3213 = vmatprep.mubr.bf16.mxu1 %v6945_v27  ;;  %5043 = vmatpush3.bf16.msra.mxu0 %v6063_v53  ;;  %v6071_v27 = vld [vmem:[%s7529_s3 + $0x20] sm:$0xff]  }
 0x1af   : > { %5107 = vmatpush3.bf16.msra.mxu1 %v6065_v45  ;;  %5044 = vmatprep.subr.bf16.mxu0 %v6066_v47 }
 0x1b0   : > { %5108 = vmatprep.subr.bf16.mxu1 %v6068_v49 }
 0x1b2   : > { %5045 = vmatpush3.bf16.msra.mxu0 %v6067_v50 }
 0x1b3   : > { %5109 = vmatpush3.bf16.msra.mxu1 %v6069_v52  ;;  %5046 = vmatprep.subr.bf16.mxu0 %v6070_v54 }
 0x1b4   : > { %2988 = vmatmul.mubr.bf16.gmra.mrb[40].mxu0 %v6943_v25  ;;  %5110 = vmatprep.subr.bf16.mxu1 %v6072_v51 }
 0x1b5   : > { %3214 = vmatmul.mubr.bf16.gmra.mrb[40].mxu1 %v6943_v25  ;;  %2997 = vmatprep.mubr.bf16.mxu0 %v6981_v12  ;;  %v6080_v25 = vld [vmem:[%s7529_s3 + $0xf0] sm:$0xff]  }
 0x1b6   : > { %3223 = vmatprep.mubr.bf16.mxu1 %v6981_v12  ;;  %5047 = vmatpush3.bf16.msra.mxu0 %v6071_v27  ;;  %v6079_v12 = vld [vmem:[%s7529_s3 + $0x30] sm:$0xff]  }
 0x1b7   : > { %5111 = vmatpush3.bf16.msra.mxu1 %v6073_v55  ;;  %5048 = vmatprep.subr.bf16.mxu0 %v6074_v56 }
 0x1b8   : > { %5112 = vmatprep.subr.bf16.mxu1 %v6076_v57  ;;  %v6088_v57 = vld [vmem:[%s7530_s4 + $0x10] sm:$0xff]  }
 0x1ba   : > { %5049 = vmatpush3.bf16.msra.mxu0 %v6075_v58 }
 0x1bb   : > { %5113 = vmatpush3.bf16.msra.mxu1 %v6077_v60  ;;  %5050 = vmatprep.subr.bf16.mxu0 %v6078_v62 }
 0x1bc   : > { %2998 = vmatmul.mubr.bf16.gmra.mrb[44].mxu0 %v6979_v10  ;;  %5114 = vmatprep.subr.bf16.mxu1 %v6080_v25 }
 0x1bd   : > { %3224 = vmatmul.mubr.bf16.gmra.mrb[44].mxu1 %v6979_v10  ;;  %3007 = vmatprep.mubr.bf16.mxu0 %v7017_v61  ;;  %v6082_v10 = vld [vmem:[%s7529_s3 + $0x78] sm:$0xff]  }
 0x1be   : > { %3233 = vmatprep.mubr.bf16.mxu1 %v7017_v61  ;;  %5051 = vmatpush3.bf16.msra.mxu0 %v6079_v12  ;;  %v6083_v61 = vld [vmem:[%s7529_s3 + $0x38] sm:$0xff]  }
 0x1bf   : > { %5115 = vmatpush3.bf16.msra.mxu1 %v6081_v63  ;;  %5052 = vmatprep.subr.bf16.mxu0 %v6082_v10 }
 0x1c2   : > { %5053 = vmatpush3.bf16.msra.mxu0 %v6083_v61 }
 0x1c4   : > { %3008 = vmatmul.mubr.bf16.gmra.mrb[48].mxu0 %v7015_v59 }
 0x1c5   : > { %3234 = vmatmul.mubr.bf16.gmra.mrb[48].mxu1 %v7015_v59  ;;  %3017 = vmatprep.mubr.bf16.mxu0 %v7053_v48  ;;  %v6084_v59 = vld [vmem:[%s7529_s3 + $0xf8] sm:$0xff]  }
 0x1c6   : > { %3243 = vmatprep.mubr.bf16.mxu1 %v7053_v48  ;;  %5116 = vmatprep.subr.bf16.mxu1 %v6084_v59  ;;  %v6086_v48 = vld [vmem:[%s7530_s4] sm:$0xff]  }
 0x1c7   : > { %5230 = vmatprep.subr.bf16.mxu0 %v6086_v48 }
 0x1cc   : > { %3018 = vmatmul.mubr.bf16.gmra.mrb[52].mxu0 %v7051_v46 }
 0x1cd   : > { %3244 = vmatmul.mubr.bf16.gmra.mrb[52].mxu1 %v7051_v46  ;;  %3027 = vmatprep.mubr.bf16.mxu0 %v7089_v30  ;;  %v6085_v46 = vld [vmem:[%s7529_s3 + $0xb8] sm:$0xff]  }
 0x1ce   : > { %3253 = vmatprep.mubr.bf16.mxu1 %v7089_v30  ;;  %5117 = vmatpush3.bf16.msra.mxu1 %v6085_v46 }
 0x1d4   : > { %3028 = vmatmul.mubr.bf16.gmra.mrb[56].mxu0 %v7087_v28 }
 0x1d5   : > { %3254 = vmatmul.mubr.bf16.gmra.mrb[56].mxu1 %v7087_v28  ;;  %3037 = vmatprep.mubr.bf16.mxu0 %v7125_v17  ;;  %v2160_v28 = vld [vmem:[%s7535_s9] sm:$0xf] }
 0x1d6   : > { %3263 = vmatprep.mubr.bf16.mxu1 %v7125_v17  ;;  %v7281_v30 = vrot.slane %v2160_v28, %v666_v36  ;;  %v7285_v0 = vrot.slane %v2160_v28, %v674_v37  ;;  %v7289_v1 = vrot.slane %v2160_v28, %v670_v39  ;;  %v7293_v2 = vrot.slane %v2160_v28, %v678_v40 }
 0x1dc   : > { %3038 = vmatmul.mubr.bf16.gmra.mrb[60].mxu0 %v7123_v15 }
 0x1dd   : > { %3264 = vmatmul.mubr.bf16.gmra.mrb[60].mxu1 %v7123_v15 }
 0x277   : > { %v2969_v41 = vpop.f32.mrb[32].mxu0 }
 0x278   : > { %v5422_v42 = vadd.f32 %v2969_v41, %v7281_v30  ;;  %v3195_v3 = vpop.f32.mrb[32].mxu1  ;;  %v2971_v4 = vpop.f32.mrb[33].mxu0 }
 0x279   : > { %v5454_v36 = vadd.f32 %v3195_v3, %v7285_v0  ;;  %v5423_v5 = vadd.f32 %v2971_v4, %v7289_v1  ;;  %v3197_v43 = vpop.f32.mrb[33].mxu1  ;;  %v2973_v37 = vpop.f32.mrb[34].mxu0 }
 0x27a   : > { %v5455_v44 = vadd.f32 %v3197_v43, %v7293_v2  ;;  %v5424_v39 = vadd.f32 %v2973_v37, %v7281_v30  ;;  %v3199_v7 = vpop.f32.mrb[34].mxu1  ;;  %v2975_v9 = vpop.f32.mrb[35].mxu0  ;;  %v3274_v13 = vmax.f32 %v5422_v42, 0.0 }
 0x27b   : > { %v5456_v35 = vadd.f32 %v3199_v7, %v7285_v0  ;;  %v5425_v40 = vadd.f32 %v2975_v9, %v7289_v1  ;;  %v3201_v11 = vpop.f32.mrb[35].mxu1  ;;  %v3276_v16 = vmax.f32 %v5454_v36, 0.0  ;;  %v3275_v17 = vmax.f32 %v5423_v5, 0.0 }
 0x27c   : > { %v3278_v14 = vmax.f32 %v5424_v39, 0.0  ;;  %v5457_v15 = vadd.f32 %v3201_v11, %v7293_v2  ;;  %v3277_v20 = vmax.f32 %v5455_v44, 0.0 }
 0x27d   : > { %v3280_v18 = vmax.f32 %v5456_v35, 0.0  ;;  %v3279_v19 = vmax.f32 %v5425_v40, 0.0 }
 0x27e   : > { %v3338_v21 = vpack.c.bf16 %v3278_v14, %v3274_v13  ;;  %v3281_v22 = vmax.f32 %v5457_v15, 0.0 }
 0x27f   : > { %v3340_v23 = vpack.c.bf16 %v3280_v18, %v3276_v16  ;;  %v3339_v24 = vpack.c.bf16 %v3279_v19, %v3275_v17  ;;  %v2979_v26 = vpop.f32.mrb[36].mxu0 }
 0x280   : > { %v3341_v8 = vpack.c.bf16 %v3281_v22, %v3277_v20  ;;  %v5426_v29 = vadd.f32 %v2979_v26, %v7281_v30  ;;  %v3205_v31 = vpop.f32.mrb[36].mxu1  ;;  %v2981_v32 = vpop.f32.mrb[37].mxu0 }
 0x281   : > { %v5458_v34 = vadd.f32 %v3205_v31, %v7285_v0  ;;  %v5427_v38 = vadd.f32 %v2981_v32, %v7289_v1  ;;  %v3207_v6 = vpop.f32.mrb[37].mxu1  ;;  %v2983_v53 = vpop.f32.mrb[38].mxu0  ;;  %3665 = vmatprep.mubr.bf16.mxu0 %v3339_v24 }
 0x282   : > { %v5459_v45 = vadd.f32 %v3207_v6, %v7293_v2  ;;  %v5428_v47 = vadd.f32 %v2983_v53, %v7281_v30  ;;  %v3209_v49 = vpop.f32.mrb[38].mxu1  ;;  %3762 = vmatprep.mubr.bf16.mxu1 %v3341_v8  ;;  %v2985_v50 = vpop.f32.mrb[39].mxu0  ;;  %3666 = vmatmul.mubr.bf16.vlgmr.msra.gmra.mrb[64].mxu0 %v3338_v21  ;;  %v3282_v27 = vmax.f32 %v5426_v29, 0.0 }
 0x283   : > { %v5460_v52 = vadd.f32 %v3209_v49, %v7285_v0  ;;  %v5429_v54 = vadd.f32 %v2985_v50, %v7289_v1  ;;  %v3211_v51 = vpop.f32.mrb[39].mxu1  ;;  %3763 = vmatmul.mubr.bf16.vlgmr.msra.gmra.mrb[64].mxu1 %v3340_v23  ;;  %5231 = vmatpush3.bf16.msra.mxu0 %v6086_v48  ;;  %v3284_v58 = vmax.f32 %v5458_v34, 0.0  ;;  %v3283_v60 = vmax.f32 %v5427_v38, 0.0 }
 0x284   : > { %v3286_v55 = vmax.f32 %v5428_v47, 0.0  ;;  %v5461_v56 = vadd.f32 %v3211_v51, %v7293_v2  ;;  %5232 = vmatprep.subr.bf16.mxu0 %v6087_v33  ;;  %v3285_v12 = vmax.f32 %v5459_v45, 0.0 }
 0x285   : > { %v3288_v62 = vmax.f32 %v5460_v52, 0.0  ;;  %v3287_v25 = vmax.f32 %v5429_v54, 0.0 }
 0x286   : > { %v3342_v63 = vpack.c.bf16 %v3286_v55, %v3282_v27  ;;  %v3289_v10 = vmax.f32 %v5461_v56, 0.0 }
 0x287   : > { %v3344_v59 = vpack.c.bf16 %v3288_v62, %v3284_v58  ;;  %v3343_v61 = vpack.c.bf16 %v3287_v25, %v3283_v60  ;;  %v2989_v46 = vpop.f32.mrb[40].mxu0  ;;  %5233 = vmatpush3.bf16.msra.mxu0 %v6087_v33 }
 0x288   : > { %v3345_v48 = vpack.c.bf16 %v3289_v10, %v3285_v12  ;;  %v5430_v28 = vadd.f32 %v2989_v46, %v7281_v30  ;;  %v3215_v41 = vpop.f32.mrb[40].mxu1  ;;  %v2991_v42 = vpop.f32.mrb[41].mxu0  ;;  %5234 = vmatprep.subr.bf16.mxu0 %v6088_v57 }
 0x289   : > { %v5462_v3 = vadd.f32 %v3215_v41, %v7285_v0  ;;  %v5431_v4 = vadd.f32 %v2991_v42, %v7289_v1  ;;  %v3217_v36 = vpop.f32.mrb[41].mxu1  ;;  %v2993_v5 = vpop.f32.mrb[42].mxu0  ;;  %3673 = vmatprep.mubr.bf16.mxu0 %v3343_v61 }
 0x28a   : > { %v5463_v43 = vadd.f32 %v3217_v36, %v7293_v2  ;;  %v5432_v37 = vadd.f32 %v2993_v5, %v7281_v30  ;;  %v3219_v44 = vpop.f32.mrb[42].mxu1  ;;  %3770 = vmatprep.mubr.bf16.mxu1 %v3345_v48  ;;  %v2995_v39 = vpop.f32.mrb[43].mxu0  ;;  %3674 = vmatmul.mubr.bf16.gmra.mrb[68].mxu0 %v3342_v63  ;;  %v3290_v40 = vmax.f32 %v5430_v28, 0.0 }
 0x28b   : > { %v5464_v7 = vadd.f32 %v3219_v44, %v7285_v0  ;;  %v5433_v9 = vadd.f32 %v2995_v39, %v7289_v1  ;;  %v3221_v35 = vpop.f32.mrb[43].mxu1  ;;  %3771 = vmatmul.mubr.bf16.gmra.mrb[68].mxu1 %v3344_v59  ;;  %5235 = vmatpush3.bf16.msra.mxu0 %v6088_v57  ;;  %v3292_v14 = vmax.f32 %v5462_v3, 0.0  ;;  %v3291_v15 = vmax.f32 %v5431_v4, 0.0 }
 0x28c   : > { %v3294_v11 = vmax.f32 %v5432_v37, 0.0  ;;  %v5465_v13 = vadd.f32 %v3221_v35, %v7293_v2  ;;  %v3293_v18 = vmax.f32 %v5463_v43, 0.0 }
 0x28d   : > { %v3296_v16 = vmax.f32 %v5464_v7, 0.0  ;;  %v3295_v17 = vmax.f32 %v5433_v9, 0.0 }
 0x28e   : > { %v3346_v19 = vpack.c.bf16 %v3294_v11, %v3290_v40  ;;  %v3297_v20 = vmax.f32 %v5465_v13, 0.0 }
 0x28f   : > { %v3348_v21 = vpack.c.bf16 %v3296_v16, %v3292_v14  ;;  %v3347_v22 = vpack.c.bf16 %v3295_v17, %v3291_v15  ;;  %v2999_v23 = vpop.f32.mrb[44].mxu0 }
 0x290   : > { %v3349_v24 = vpack.c.bf16 %v3297_v20, %v3293_v18  ;;  %v5434_v26 = vadd.f32 %v2999_v23, %v7281_v30  ;;  %v3225_v8 = vpop.f32.mrb[44].mxu1  ;;  %v3001_v29 = vpop.f32.mrb[45].mxu0 }
 0x291   : > { %v5466_v31 = vadd.f32 %v3225_v8, %v7285_v0  ;;  %v5435_v32 = vadd.f32 %v3001_v29, %v7289_v1  ;;  %v3227_v33 = vpop.f32.mrb[45].mxu1  ;;  %v3003_v34 = vpop.f32.mrb[46].mxu0  ;;  %3681 = vmatprep.mubr.bf16.mxu0 %v3347_v22 }
 0x292   : > { %v5467_v38 = vadd.f32 %v3227_v33, %v7293_v2  ;;  %v5436_v6 = vadd.f32 %v3003_v34, %v7281_v30  ;;  %v3229_v53 = vpop.f32.mrb[46].mxu1  ;;  %3778 = vmatprep.mubr.bf16.mxu1 %v3349_v24  ;;  %v3005_v45 = vpop.f32.mrb[47].mxu0  ;;  %3682 = vmatmul.mubr.bf16.gmra.mrb[72].mxu0 %v3346_v19  ;;  %v3298_v52 = vmax.f32 %v5434_v26, 0.0 }
 0x293   : > { %v5468_v47 = vadd.f32 %v3229_v53, %v7285_v0  ;;  %v5437_v49 = vadd.f32 %v3005_v45, %v7289_v1  ;;  %v3231_v50 = vpop.f32.mrb[47].mxu1  ;;  %3779 = vmatmul.mubr.bf16.gmra.mrb[72].mxu1 %v3348_v21  ;;  %v3300_v27 = vmax.f32 %v5466_v31, 0.0  ;;  %v3299_v55 = vmax.f32 %v5435_v32, 0.0 }
 0x294   : > { %v3302_v54 = vmax.f32 %v5436_v6, 0.0  ;;  %v5469_v51 = vadd.f32 %v3231_v50, %v7293_v2  ;;  %v3301_v58 = vmax.f32 %v5467_v38, 0.0 }
 0x295   : > { %v3304_v56 = vmax.f32 %v5468_v47, 0.0  ;;  %v3303_v57 = vmax.f32 %v5437_v49, 0.0 }
 0x296   : > { %v3350_v60 = vpack.c.bf16 %v3302_v54, %v3298_v52  ;;  %v3305_v62 = vmax.f32 %v5469_v51, 0.0 }
 0x297   : > { %v3352_v25 = vpack.c.bf16 %v3304_v56, %v3300_v27  ;;  %v3351_v12 = vpack.c.bf16 %v3303_v57, %v3299_v55  ;;  %v3009_v63 = vpop.f32.mrb[48].mxu0 }
 0x298   : > { %v3353_v10 = vpack.c.bf16 %v3305_v62, %v3301_v58  ;;  %v5438_v59 = vadd.f32 %v3009_v63, %v7281_v30  ;;  %v3235_v61 = vpop.f32.mrb[48].mxu1  ;;  %v3011_v46 = vpop.f32.mrb[49].mxu0 }
 0x299   : > { %v5470_v48 = vadd.f32 %v3235_v61, %v7285_v0  ;;  %v5439_v28 = vadd.f32 %v3011_v46, %v7289_v1  ;;  %v3237_v41 = vpop.f32.mrb[49].mxu1  ;;  %v3013_v42 = vpop.f32.mrb[50].mxu0  ;;  %3689 = vmatprep.mubr.bf16.mxu0 %v3351_v12 }
 0x29a   : > { %v5471_v3 = vadd.f32 %v3237_v41, %v7293_v2  ;;  %v5440_v4 = vadd.f32 %v3013_v42, %v7281_v30  ;;  %v3239_v36 = vpop.f32.mrb[50].mxu1  ;;  %3786 = vmatprep.mubr.bf16.mxu1 %v3353_v10  ;;  %v3015_v5 = vpop.f32.mrb[51].mxu0  ;;  %3690 = vmatmul.mubr.bf16.gmra.mrb[76].mxu0 %v3350_v60  ;;  %v3306_v39 = vmax.f32 %v5438_v59, 0.0 }
 0x29b   : > { %v5472_v43 = vadd.f32 %v3239_v36, %v7285_v0  ;;  %v5441_v37 = vadd.f32 %v3015_v5, %v7289_v1  ;;  %v3241_v44 = vpop.f32.mrb[51].mxu1  ;;  %3787 = vmatmul.mubr.bf16.gmra.mrb[76].mxu1 %v3352_v25  ;;  %v3308_v35 = vmax.f32 %v5470_v48, 0.0  ;;  %v3307_v40 = vmax.f32 %v5439_v28, 0.0 }
 0x29c   : > { %v3310_v7 = vmax.f32 %v5440_v4, 0.0  ;;  %v5473_v9 = vadd.f32 %v3241_v44, %v7293_v2  ;;  %v3309_v14 = vmax.f32 %v5471_v3, 0.0 }
 0x29d   : > { %v3312_v11 = vmax.f32 %v5472_v43, 0.0  ;;  %v3311_v13 = vmax.f32 %v5441_v37, 0.0 }
 0x29e   : > { %v3354_v15 = vpack.c.bf16 %v3310_v7, %v3306_v39  ;;  %v3313_v16 = vmax.f32 %v5473_v9, 0.0 }
 0x29f   : > { %v3356_v17 = vpack.c.bf16 %v3312_v11, %v3308_v35  ;;  %v3355_v18 = vpack.c.bf16 %v3311_v13, %v3307_v40  ;;  %v3019_v19 = vpop.f32.mrb[52].mxu0 }
 0x2a0   : > { %v3357_v20 = vpack.c.bf16 %v3313_v16, %v3309_v14  ;;  %v5442_v21 = vadd.f32 %v3019_v19, %v7281_v30  ;;  %v3245_v22 = vpop.f32.mrb[52].mxu1  ;;  %v3021_v23 = vpop.f32.mrb[53].mxu0 }
 0x2a1   : > { %v5474_v24 = vadd.f32 %v3245_v22, %v7285_v0  ;;  %v5443_v26 = vadd.f32 %v3021_v23, %v7289_v1  ;;  %v3247_v8 = vpop.f32.mrb[53].mxu1  ;;  %v3023_v29 = vpop.f32.mrb[54].mxu0  ;;  %3697 = vmatprep.mubr.bf16.mxu0 %v3355_v18 }
 0x2a2   : > { %v5475_v31 = vadd.f32 %v3247_v8, %v7293_v2  ;;  %v5444_v32 = vadd.f32 %v3023_v29, %v7281_v30  ;;  %v3249_v33 = vpop.f32.mrb[54].mxu1  ;;  %3794 = vmatprep.mubr.bf16.mxu1 %v3357_v20  ;;  %v3025_v34 = vpop.f32.mrb[55].mxu0  ;;  %3698 = vmatmul.mubr.bf16.gmra.mrb[80].mxu0 %v3354_v15  ;;  %v3314_v45 = vmax.f32 %v5442_v21, 0.0 }
 0x2a3   : > { %v5476_v38 = vadd.f32 %v3249_v33, %v7285_v0  ;;  %v5445_v6 = vadd.f32 %v3025_v34, %v7289_v1  ;;  %v3251_v53 = vpop.f32.mrb[55].mxu1  ;;  %3795 = vmatmul.mubr.bf16.gmra.mrb[80].mxu1 %v3356_v17  ;;  %v3316_v50 = vmax.f32 %v5474_v24, 0.0  ;;  %v3315_v52 = vmax.f32 %v5443_v26, 0.0 }
 0x2a4   : > { %v3318_v47 = vmax.f32 %v5444_v32, 0.0  ;;  %v5477_v49 = vadd.f32 %v3251_v53, %v7293_v2  ;;  %v3317_v27 = vmax.f32 %v5475_v31, 0.0 }
 0x2a5   : > { %v3320_v54 = vmax.f32 %v5476_v38, 0.0  ;;  %v3319_v51 = vmax.f32 %v5445_v6, 0.0 }
 0x2a6   : > { %v3358_v55 = vpack.c.bf16 %v3318_v47, %v3314_v45  ;;  %v3321_v56 = vmax.f32 %v5477_v49, 0.0 }
 0x2a7   : > { %v3360_v57 = vpack.c.bf16 %v3320_v54, %v3316_v50  ;;  %v3359_v58 = vpack.c.bf16 %v3319_v51, %v3315_v52  ;;  %v3029_v60 = vpop.f32.mrb[56].mxu0 }
 0x2a8   : > { %v3361_v62 = vpack.c.bf16 %v3321_v56, %v3317_v27  ;;  %v5446_v25 = vadd.f32 %v3029_v60, %v7281_v30  ;;  %v3255_v12 = vpop.f32.mrb[56].mxu1  ;;  %v3031_v63 = vpop.f32.mrb[57].mxu0  ;;  %v6093_v56 = vld [vmem:[%s7530_s4 + $0x38] sm:$0xff]   ;;  %v6096_v60 = vld [vmem:[%s7531_s5 + $0x10] sm:$0xff]  }
 0x2a9   : > { %v5478_v10 = vadd.f32 %v3255_v12, %v7285_v0  ;;  %v5447_v59 = vadd.f32 %v3031_v63, %v7289_v1  ;;  %v3257_v61 = vpop.f32.mrb[57].mxu1  ;;  %v3033_v46 = vpop.f32.mrb[58].mxu0  ;;  %3705 = vmatprep.mubr.bf16.mxu0 %v3359_v58  ;;  %v6095_v58 = vld [vmem:[%s7531_s5 + $0x8] sm:$0xff]  }
 0x2aa   : > { %v5479_v48 = vadd.f32 %v3257_v61, %v7293_v2  ;;  %v5448_v28 = vadd.f32 %v3033_v46, %v7281_v30  ;;  %v3259_v41 = vpop.f32.mrb[58].mxu1  ;;  %3802 = vmatprep.mubr.bf16.mxu1 %v3361_v62  ;;  %v3035_v42 = vpop.f32.mrb[59].mxu0  ;;  %3706 = vmatmul.mubr.bf16.gmra.mrb[84].mxu0 %v3358_v55  ;;  %v3322_v5 = vmax.f32 %v5446_v25, 0.0  ;;  %v6092_v55 = vld [vmem:[%s7530_s4 + $0x30] sm:$0xff]   ;;  %v6097_v62 = vld [vmem:[%s7531_s5 + $0x18] sm:$0xff]   ;;  %v6098_v25 = vld [vmem:[%s7531_s5 + $0x20] sm:$0xff]  }
 0x2ab   : > { %v5480_v3 = vadd.f32 %v3259_v41, %v7285_v0  ;;  %v5449_v4 = vadd.f32 %v3035_v42, %v7289_v1  ;;  %v3261_v36 = vpop.f32.mrb[59].mxu1  ;;  %3803 = vmatmul.mubr.bf16.gmra.mrb[84].mxu1 %v3360_v57  ;;  %v3324_v44 = vmax.f32 %v5478_v10, 0.0  ;;  %v3323_v39 = vmax.f32 %v5447_v59, 0.0  ;;  %v6094_v57 = vld [vmem:[%s7531_s5] sm:$0xff]   ;;  %v6099_v12 = vld [vmem:[%s7531_s5 + $0x28] sm:$0xff]  }
 0x2ac   : > { %v3326_v43 = vmax.f32 %v5448_v28, 0.0  ;;  %v5481_v37 = vadd.f32 %v3261_v36, %v7293_v2  ;;  %v3325_v35 = vmax.f32 %v5479_v48, 0.0  ;;  %5262 = vmatprep.subr.bf16.mxu1 %v6094_v57  ;;  %v7401_v59 = vld [vmem:[%s7536_s10] ss:$0 sm:$0xff] }
 0x2ad   : > { %v3328_v7 = vmax.f32 %v5480_v3, 0.0  ;;  %v3327_v9 = vmax.f32 %v5449_v4, 0.0  ;;  %5263 = vmatpush3.bf16.msra.mxu1 %v6094_v57 }
 0x2ae   : > { %v3362_v40 = vpack.c.bf16 %v3326_v43, %v3322_v5  ;;  %v3329_v11 = vmax.f32 %v5481_v37, 0.0  ;;  %5264 = vmatprep.subr.bf16.mxu1 %v6095_v58 }
 0x2af   : > { %v3364_v13 = vpack.c.bf16 %v3328_v7, %v3324_v44  ;;  %v3363_v14 = vpack.c.bf16 %v3327_v9, %v3323_v39  ;;  %v3039_v15 = vpop.f32.mrb[60].mxu0 }
 0x2b0   : > { %v3365_v16 = vpack.c.bf16 %v3329_v11, %v3325_v35  ;;  %v5450_v17 = vadd.f32 %v3039_v15, %v7281_v30  ;;  %v3265_v18 = vpop.f32.mrb[60].mxu1  ;;  %v3041_v19 = vpop.f32.mrb[61].mxu0 }
 0x2b1   : > { %v5482_v20 = vadd.f32 %v3265_v18, %v7285_v0  ;;  %v5451_v21 = vadd.f32 %v3041_v19, %v7289_v1  ;;  %v3267_v22 = vpop.f32.mrb[61].mxu1  ;;  %v3043_v23 = vpop.f32.mrb[62].mxu0  ;;  %3713 = vmatprep.mubr.bf16.mxu0 %v3363_v14  ;;  %5265 = vmatpush3.bf16.msra.mxu1 %v6095_v58 }
 0x2b2   : > { %v5483_v24 = vadd.f32 %v3267_v22, %v7293_v2  ;;  %v5452_v26 = vadd.f32 %v3043_v23, %v7281_v30  ;;  %v3269_v8 = vpop.f32.mrb[62].mxu1  ;;  %3810 = vmatprep.mubr.bf16.mxu1 %v3365_v16  ;;  %v3045_v29 = vpop.f32.mrb[63].mxu0  ;;  %3714 = vmatmul.mubr.bf16.gmra.mrb[88].mxu0 %v3362_v40  ;;  %v3330_v34 = vmax.f32 %v5450_v17, 0.0 }
 0x2b3   : > { %v5484_v31 = vadd.f32 %v3269_v8, %v7285_v0  ;;  %v5453_v32 = vadd.f32 %v3045_v29, %v7289_v1  ;;  %v3271_v33 = vpop.f32.mrb[63].mxu1  ;;  %3811 = vmatmul.mubr.bf16.gmra.mrb[88].mxu1 %v3364_v13  ;;  %v3332_v53 = vmax.f32 %v5482_v20, 0.0  ;;  %v3331_v45 = vmax.f32 %v5451_v21, 0.0  ;;  %v6089_v0 = vld [vmem:[%s7530_s4 + $0x18] sm:$0xff]   ;;  %v6090_v1 = vld [vmem:[%s7530_s4 + $0x20] sm:$0xff]   ;;  %5266 = vmatprep.subr.bf16.mxu1 %v6096_v60 }
 0x2b4   : > { %v3334_v38 = vmax.f32 %v5452_v26, 0.0  ;;  %v5485_v6 = vadd.f32 %v3271_v33, %v7293_v2  ;;  %v3333_v50 = vmax.f32 %v5483_v24, 0.0  ;;  %5236 = vmatprep.subr.bf16.mxu0 %v6089_v0  ;;  %v6091_v2 = vld [vmem:[%s7530_s4 + $0x28] sm:$0xff]  }
 0x2b5   : > { %v3336_v47 = vmax.f32 %v5484_v31, 0.0  ;;  %v3335_v49 = vmax.f32 %v5453_v32, 0.0  ;;  %5237 = vmatpush3.bf16.msra.mxu0 %v6089_v0  ;;  %5267 = vmatpush3.bf16.msra.mxu1 %v6096_v60 }
 0x2b6   : > { %v3366_v30 = vpack.c.bf16 %v3334_v38, %v3330_v34  ;;  %v3337_v52 = vmax.f32 %v5485_v6, 0.0  ;;  %5238 = vmatprep.subr.bf16.mxu0 %v6090_v1  ;;  %5268 = vmatprep.subr.bf16.mxu1 %v6097_v62 }
 0x2b7   : > { %v3368_v54 = vpack.c.bf16 %v3336_v47, %v3332_v53  ;;  %v3367_v51 = vpack.c.bf16 %v3335_v49, %v3331_v45 }
 0x2b8   : > { %v3369_v27 = vpack.c.bf16 %v3337_v52, %v3333_v50 }
 0x2b9   : > { %3721 = vmatprep.mubr.bf16.mxu0 %v3367_v51  ;;  %5239 = vmatpush3.bf16.msra.mxu0 %v6090_v1 }
 0x2ba   : > { %3818 = vmatprep.mubr.bf16.mxu1 %v3369_v27  ;;  %3722 = vmatmul.mubr.bf16.gmra.mrb[92].mxu0 %v3366_v30 }
 0x2bb   : > { %3819 = vmatmul.mubr.bf16.gmra.mrb[92].mxu1 %v3368_v54  ;;  %5240 = vmatprep.subr.bf16.mxu0 %v6091_v2 }
 0x2bc   : > { %5269 = vmatpush3.bf16.msra.mxu1 %v6097_v62 }
 0x2bd   : > { %5241 = vmatpush3.bf16.msra.mxu0 %v6091_v2  ;;  %5270 = vmatprep.subr.bf16.mxu1 %v6098_v25 }
 0x2be   : > { %5242 = vmatprep.subr.bf16.mxu0 %v6092_v55 }
 0x2c0   : > { %5271 = vmatpush3.bf16.msra.mxu1 %v6098_v25 }
 0x2c1   : > { %5243 = vmatpush3.bf16.msra.mxu0 %v6092_v55  ;;  %5272 = vmatprep.subr.bf16.mxu1 %v6099_v12 }
 0x2c2   : > { %5244 = vmatprep.subr.bf16.mxu0 %v6093_v56 }
 0x2c4   : > { %5273 = vmatpush3.bf16.msra.mxu1 %v6099_v12 }
 0x2c5   : > { %5245 = vmatpush3.bf16.msra.mxu0 %v6093_v56 }
 0x355   : > { %v5054_v63 = vpop.f32.mrb[64].mxu0 }
 0x356   : > { %v5118_v10 = vpop.f32.mrb[64].mxu1  ;;  %v5055_v61 = vpop.f32.mrb[65].mxu0 }
 0x357   : > { %v5056_v46 = vadd.f32 %v5055_v61, %v5054_v63  ;;  %v5119_v48 = vpop.f32.mrb[65].mxu1  ;;  %v5057_v28 = vpop.f32.mrb[66].mxu0 }
 0x358   : > { %v5120_v41 = vadd.f32 %v5119_v48, %v5118_v10  ;;  %v5121_v42 = vpop.f32.mrb[66].mxu1  ;;  %v5058_v3 = vpop.f32.mrb[67].mxu0 }
 0x359   : > { %v3668_v4 = vadd.f32 %v5056_v46, %v7401_v59  ;;  %v5059_v36 = vadd.f32 %v5058_v3, %v5057_v28  ;;  %v5122_v5 = vpop.f32.mrb[67].mxu1 }
 0x35a   : > { %v5123_v43 = vadd.f32 %v5122_v5, %v5121_v42 }
 0x35b   : > { %v3765_v37 = vadd.f32 %v5120_v41, %v3668_v4  ;;  %v3671_v44 = vadd.f32 %v5059_v36, %v7401_v59 }
 0x35d   : > { %v3768_v39 = vadd.f32 %v5123_v43, %v3671_v44  ;;  %v5060_v7 = vpop.f32.mrb[68].mxu0  ;;  %v3827_v40 = vmax.f32 %v3765_v37, 0.0 }
 0x35e   : > { %v5124_v9 = vpop.f32.mrb[68].mxu1  ;;  %v5061_v35 = vpop.f32.mrb[69].mxu0 }
 0x35f   : > { %v3828_v11 = vmax.f32 %v3768_v39, 0.0  ;;  %v5062_v13 = vadd.f32 %v5061_v35, %v5060_v7  ;;  %v5125_v14 = vpop.f32.mrb[69].mxu1  ;;  %v5063_v15 = vpop.f32.mrb[70].mxu0 }
 0x360   : > { %v5126_v16 = vadd.f32 %v5125_v14, %v5124_v9  ;;  %v5127_v17 = vpop.f32.mrb[70].mxu1  ;;  %v5064_v18 = vpop.f32.mrb[71].mxu0 }
 0x361   : > { %v3676_v19 = vadd.f32 %v5062_v13, %v7401_v59  ;;  %v5065_v20 = vadd.f32 %v5064_v18, %v5063_v15  ;;  %v5128_v21 = vpop.f32.mrb[71].mxu1  ;;  %v3843_v22 = vpack.c.bf16 %v3828_v11, %v3827_v40 }
 0x362   : > { %v5129_v23 = vadd.f32 %v5128_v21, %v5127_v17 }
 0x363   : > { %v3773_v24 = vadd.f32 %v5126_v16, %v3676_v19  ;;  %v3679_v26 = vadd.f32 %v5065_v20, %v7401_v59  ;;  %5246 = vmatprep.mubr.bf16.mxu0 %v3843_v22 }
 0x365   : > { %v3776_v8 = vadd.f32 %v5129_v23, %v3679_v26  ;;  %v5066_v29 = vpop.f32.mrb[72].mxu0  ;;  %v3829_v33 = vmax.f32 %v3773_v24, 0.0 }
 0x366   : > { %v5130_v31 = vpop.f32.mrb[72].mxu1  ;;  %v5067_v32 = vpop.f32.mrb[73].mxu0 }
 0x367   : > { %v3830_v34 = vmax.f32 %v3776_v8, 0.0  ;;  %v5068_v38 = vadd.f32 %v5067_v32, %v5066_v29  ;;  %v5131_v6 = vpop.f32.mrb[73].mxu1  ;;  %v5069_v53 = vpop.f32.mrb[74].mxu0 }
 0x368   : > { %v5132_v45 = vadd.f32 %v5131_v6, %v5130_v31  ;;  %v5133_v47 = vpop.f32.mrb[74].mxu1  ;;  %v5070_v49 = vpop.f32.mrb[75].mxu0 }
 0x369   : > { %v3844_v50 = vpack.c.bf16 %v3830_v34, %v3829_v33  ;;  %v3684_v30 = vadd.f32 %v5068_v38, %v7401_v59  ;;  %v5071_v52 = vadd.f32 %v5070_v49, %v5069_v53  ;;  %v5134_v54 = vpop.f32.mrb[75].mxu1 }
 0x36a   : > { %v5135_v51 = vadd.f32 %v5134_v54, %v5133_v47 }
 0x36b   : > { %v3781_v27 = vadd.f32 %v5132_v45, %v3684_v30  ;;  %v3687_v0 = vadd.f32 %v5071_v52, %v7401_v59  ;;  %5247 = vmatmul.mubr.bf16.vlgmr.msra.gmra.mrb[96].mxu0 %v3844_v50 }
 0x36d   : > { %v3784_v1 = vadd.f32 %v5135_v51, %v3687_v0  ;;  %v5072_v2 = vpop.f32.mrb[76].mxu0  ;;  %v3831_v57 = vmax.f32 %v3781_v27, 0.0 }
 0x36e   : > { %v5136_v55 = vpop.f32.mrb[76].mxu1  ;;  %v5073_v56 = vpop.f32.mrb[77].mxu0 }
 0x36f   : > { %v3832_v58 = vmax.f32 %v3784_v1, 0.0  ;;  %v5074_v60 = vadd.f32 %v5073_v56, %v5072_v2  ;;  %v5137_v62 = vpop.f32.mrb[77].mxu1  ;;  %v5075_v25 = vpop.f32.mrb[78].mxu0 }
 0x370   : > { %v5138_v12 = vadd.f32 %v5137_v62, %v5136_v55  ;;  %v5139_v63 = vpop.f32.mrb[78].mxu1  ;;  %v5076_v10 = vpop.f32.mrb[79].mxu0 }
 0x371   : > { %v3692_v61 = vadd.f32 %v5074_v60, %v7401_v59  ;;  %v5077_v46 = vadd.f32 %v5076_v10, %v5075_v25  ;;  %v5140_v48 = vpop.f32.mrb[79].mxu1  ;;  %v3845_v28 = vpack.c.bf16 %v3832_v58, %v3831_v57 }
 0x372   : > { %v5141_v41 = vadd.f32 %v5140_v48, %v5139_v63 }
 0x373   : > { %v3789_v42 = vadd.f32 %v5138_v12, %v3692_v61  ;;  %v3695_v3 = vadd.f32 %v5077_v46, %v7401_v59  ;;  %5250 = vmatprep.mubr.bf16.mxu0 %v3845_v28 }
 0x375   : > { %v3792_v4 = vadd.f32 %v5141_v41, %v3695_v3  ;;  %v5078_v36 = vpop.f32.mrb[80].mxu0  ;;  %v3833_v37 = vmax.f32 %v3789_v42, 0.0 }
 0x376   : > { %v5142_v5 = vpop.f32.mrb[80].mxu1  ;;  %v5079_v43 = vpop.f32.mrb[81].mxu0 }
 0x377   : > { %v3834_v44 = vmax.f32 %v3792_v4, 0.0  ;;  %v5080_v39 = vadd.f32 %v5079_v43, %v5078_v36  ;;  %v5143_v7 = vpop.f32.mrb[81].mxu1  ;;  %v5081_v9 = vpop.f32.mrb[82].mxu0 }
 0x378   : > { %v5144_v35 = vadd.f32 %v5143_v7, %v5142_v5  ;;  %v5145_v40 = vpop.f32.mrb[82].mxu1  ;;  %v5082_v11 = vpop.f32.mrb[83].mxu0 }
 0x379   : > { %v3700_v13 = vadd.f32 %v5080_v39, %v7401_v59  ;;  %v5083_v14 = vadd.f32 %v5082_v11, %v5081_v9  ;;  %v5146_v15 = vpop.f32.mrb[83].mxu1  ;;  %v3846_v16 = vpack.c.bf16 %v3834_v44, %v3833_v37 }
 0x37a   : > { %v5147_v17 = vadd.f32 %v5146_v15, %v5145_v40 }
 0x37b   : > { %v3797_v18 = vadd.f32 %v5144_v35, %v3700_v13  ;;  %v3703_v19 = vadd.f32 %v5083_v14, %v7401_v59  ;;  %5251 = vmatmul.mubr.bf16.gmra.mrb[100].mxu0 %v3846_v16 }
 0x37d   : > { %v3800_v20 = vadd.f32 %v5147_v17, %v3703_v19  ;;  %v5084_v21 = vpop.f32.mrb[84].mxu0  ;;  %v3835_v24 = vmax.f32 %v3797_v18, 0.0  ;;  %v6100_v18 = vld [vmem:[%s7531_s5 + $0x30] sm:$0xff]   ;;  %v6101_v19 = vld [vmem:[%s7531_s5 + $0x38] sm:$0xff]  }
 0x37e   : > { %v5148_v22 = vpop.f32.mrb[84].mxu1  ;;  %v5085_v23 = vpop.f32.mrb[85].mxu0  ;;  %5274 = vmatprep.subr.bf16.mxu1 %v6100_v18 }
 0x37f   : > { %v3836_v26 = vmax.f32 %v3800_v20, 0.0  ;;  %v5086_v8 = vadd.f32 %v5085_v23, %v5084_v21  ;;  %v5149_v29 = vpop.f32.mrb[85].mxu1  ;;  %v5087_v31 = vpop.f32.mrb[86].mxu0  ;;  %5275 = vmatpush3.bf16.msra.mxu1 %v6100_v18  ;;  %v6103_v20 = vld [vmem:[%s7532_s6 + $0x8] sm:$0xff]   ;;  %v6104_v21 = vld [vmem:[%s7532_s6 + $0x10] sm:$0xff]   ;;  %v6106_v23 = vld [vmem:[%s7532_s6 + $0x20] sm:$0xff]  }
 0x380   : > { %v5150_v32 = vadd.f32 %v5149_v29, %v5148_v22  ;;  %v5151_v33 = vpop.f32.mrb[86].mxu1  ;;  %v5088_v34 = vpop.f32.mrb[87].mxu0  ;;  %5276 = vmatprep.subr.bf16.mxu1 %v6101_v19  ;;  %v6105_v22 = vld [vmem:[%s7532_s6 + $0x18] sm:$0xff]  }
 0x381   : > { %v3708_v38 = vadd.f32 %v5086_v8, %v7401_v59  ;;  %v5089_v6 = vadd.f32 %v5088_v34, %v5087_v31  ;;  %v5152_v53 = vpop.f32.mrb[87].mxu1  ;;  %v3847_v45 = vpack.c.bf16 %v3836_v26, %v3835_v24  ;;  %v6107_v24 = vld [vmem:[%s7532_s6 + $0x28] sm:$0xff]   ;;  %v4999_v26 = vld [vmem:[%s7537_s11] ss:$0 sm:$0xff] }
 0x382   : > { %v5153_v47 = vadd.f32 %v5152_v53, %v5151_v33 }
 0x383   : > { %v3805_v49 = vadd.f32 %v5150_v32, %v3708_v38  ;;  %v3711_v50 = vadd.f32 %v5089_v6, %v7401_v59  ;;  %5254 = vmatprep.mubr.bf16.mxu0 %v3847_v45  ;;  %5277 = vmatpush3.bf16.msra.mxu1 %v6101_v19  ;;  %v6108_v19 = vld [vmem:[%s7532_s6 + $0x30] sm:$0xff]  }
 0x385   : > { %v3808_v30 = vadd.f32 %v5153_v47, %v3711_v50  ;;  %v5090_v52 = vpop.f32.mrb[88].mxu0  ;;  %v3837_v27 = vmax.f32 %v3805_v49, 0.0 }
 0x386   : > { %v5154_v54 = vpop.f32.mrb[88].mxu1  ;;  %v5091_v51 = vpop.f32.mrb[89].mxu0 }
 0x387   : > { %v3838_v0 = vmax.f32 %v3808_v30, 0.0  ;;  %v5092_v1 = vadd.f32 %v5091_v51, %v5090_v52  ;;  %v5155_v2 = vpop.f32.mrb[89].mxu1  ;;  %v5093_v55 = vpop.f32.mrb[90].mxu0 }
 0x388   : > { %v5156_v56 = vadd.f32 %v5155_v2, %v5154_v54  ;;  %v5157_v57 = vpop.f32.mrb[90].mxu1  ;;  %v5094_v58 = vpop.f32.mrb[91].mxu0 }
 0x389   : > { %v3716_v60 = vadd.f32 %v5092_v1, %v7401_v59  ;;  %v5095_v62 = vadd.f32 %v5094_v58, %v5093_v55  ;;  %v5158_v25 = vpop.f32.mrb[91].mxu1  ;;  %v3848_v12 = vpack.c.bf16 %v3838_v0, %v3837_v27 }
 0x38a   : > { %v5159_v63 = vadd.f32 %v5158_v25, %v5157_v57 }
 0x38b   : > { %v3813_v10 = vadd.f32 %v5156_v56, %v3716_v60  ;;  %v3719_v61 = vadd.f32 %v5095_v62, %v7401_v59  ;;  %5255 = vmatmul.mubr.bf16.gmra.mrb[104].mxu0 %v3848_v12 }
 0x38d   : > { %v3816_v46 = vadd.f32 %v5159_v63, %v3719_v61  ;;  %v5096_v48 = vpop.f32.mrb[92].mxu0  ;;  %v3839_v42 = vmax.f32 %v3813_v10, 0.0 }
 0x38e   : > { %v5160_v28 = vpop.f32.mrb[92].mxu1  ;;  %v5097_v41 = vpop.f32.mrb[93].mxu0 }
 0x38f   : > { %v3840_v3 = vmax.f32 %v3816_v46, 0.0  ;;  %v5098_v4 = vadd.f32 %v5097_v41, %v5096_v48  ;;  %v5161_v36 = vpop.f32.mrb[93].mxu1  ;;  %v5099_v5 = vpop.f32.mrb[94].mxu0 }
 0x390   : > { %v5162_v43 = vadd.f32 %v5161_v36, %v5160_v28  ;;  %v5163_v37 = vpop.f32.mrb[94].mxu1  ;;  %v5100_v44 = vpop.f32.mrb[95].mxu0 }
 0x391   : > { %v3724_v39 = vadd.f32 %v5098_v4, %v7401_v59  ;;  %v5101_v7 = vadd.f32 %v5100_v44, %v5099_v5  ;;  %v5164_v9 = vpop.f32.mrb[95].mxu1  ;;  %v3849_v35 = vpack.c.bf16 %v3840_v3, %v3839_v42 }
 0x392   : > { %v5165_v40 = vadd.f32 %v5164_v9, %v5163_v37 }
 0x393   : > { %v3821_v11 = vadd.f32 %v5162_v43, %v3724_v39  ;;  %v3727_v13 = vadd.f32 %v5101_v7, %v7401_v59  ;;  %5258 = vmatprep.mubr.bf16.mxu0 %v3849_v35  ;;  %v6102_v59 = vld [vmem:[%s7532_s6] sm:$0xff]  }
 0x394   : > { %5294 = vmatprep.subr.bf16.mxu0 %v6102_v59 }
 0x395   : > { %v3824_v14 = vadd.f32 %v5165_v40, %v3727_v13  ;;  %v3841_v15 = vmax.f32 %v3821_v11, 0.0  ;;  %5295 = vmatpush3.bf16.msra.mxu0 %v6102_v59  ;;  %v6109_v59 = vld [vmem:[%s7532_s6 + $0x38] sm:$0xff]  }
 0x396   : > { %5296 = vmatprep.subr.bf16.mxu0 %v6103_v20 }
 0x397   : > { %v3842_v16 = vmax.f32 %v3824_v14, 0.0 }
 0x399   : > { %v3850_v17 = vpack.c.bf16 %v3842_v16, %v3841_v15  ;;  %5297 = vmatpush3.bf16.msra.mxu0 %v6103_v20  ;;  %v6110_v20 = vld [vmem:[%s7533_s7] sm:$0xff]  }
 0x39a   : > { %5298 = vmatprep.subr.bf16.mxu0 %v6104_v21  ;;  %5326 = vmatprep.subr.bf16.mxu1 %v6110_v20 }
 0x39b   : > { %5259 = vmatmul.mubr.bf16.gmra.mrb[108].mxu0 %v3850_v17 }
 0x39d   : > { %5299 = vmatpush3.bf16.msra.mxu0 %v6104_v21  ;;  %v6111_v21 = vld [vmem:[%s7533_s7 + $0x8] sm:$0xff]  }
 0x39e   : > { %5300 = vmatprep.subr.bf16.mxu0 %v6105_v22 }
 0x3a1   : > { %5301 = vmatpush3.bf16.msra.mxu0 %v6105_v22  ;;  %v6112_v22 = vld [vmem:[%s7533_s7 + $0x10] sm:$0xff]  }
 0x3a2   : > { %5302 = vmatprep.subr.bf16.mxu0 %v6106_v23 }
 0x3a5   : > { %5303 = vmatpush3.bf16.msra.mxu0 %v6106_v23  ;;  %v6113_v23 = vld [vmem:[%s7533_s7 + $0x18] sm:$0xff]  }
 0x3a6   : > { %5304 = vmatprep.subr.bf16.mxu0 %v6107_v24 }
 0x3a9   : > { %5305 = vmatpush3.bf16.msra.mxu0 %v6107_v24  ;;  %v6114_v24 = vld [vmem:[%s7533_s7 + $0x20] sm:$0xff]  }
 0x3aa   : > { %5306 = vmatprep.subr.bf16.mxu0 %v6108_v19 }
 0x3ad   : > { %5307 = vmatpush3.bf16.msra.mxu0 %v6108_v19 }
 0x3ae   : > { %5308 = vmatprep.subr.bf16.mxu0 %v6109_v59 }
 0x3b1   : > { %5309 = vmatpush3.bf16.msra.mxu0 %v6109_v59  ;;  %v6116_v59 = vld [vmem:[%s7533_s7 + $0x30] sm:$0xff]  }
 0x43e   : > { %v5248_v8 = vpop.f32.mrb[96].mxu0 }
 0x43f   : > { %v3965_v29 = vadd.f32 %v5248_v8, %v4999_v26  ;;  %v3956_v31 = vpop.f32.mrb[97].mxu0  ;;  %v5008_v8 = vld [vmem:[%s7538_s12] ss:$0 sm:$0xff] }
 0x440   : > { %v3957_v32 = vadd.f32 %v4999_v26, %v3956_v31  ;;  %v5249_v33 = vpop.f32.mrb[98].mxu0 }
 0x441   : > { %v3968_v34 = vadd.f32 %v5249_v33, %v4999_v26  ;;  %v3959_v38 = vpop.f32.mrb[99].mxu0  ;;  %v4021_v53 = vmax.f32 %v3965_v29, 0.0 }
 0x442   : > { %v3960_v6 = vadd.f32 %v4999_v26, %v3959_v38  ;;  %v4019_v47 = vmax.f32 %v3957_v32, 0.0 }
 0x443   : > { %v4022_v45 = vmax.f32 %v3968_v34, 0.0 }
 0x444   : > { %v4020_v49 = vmax.f32 %v3960_v6, 0.0 }
 0x445   : > { %v4036_v50 = vpack.c.bf16 %v4022_v45, %v4021_v53 }
 0x446   : > { %v4035_v30 = vpack.c.bf16 %v4020_v49, %v4019_v47 }
 0x448   : > { %5278 = vmatprep.mubr.bf16.mxu1 %v4035_v30 }
 0x449   : > { %5279 = vmatmul.mubr.bf16.vlgmr.msra.gmra.mrb[96].mxu1 %v4036_v50 }
 0x44a   : > { %5327 = vmatpush3.bf16.msra.mxu1 %v6110_v20  ;;  %v6117_v20 = vld [vmem:[%s7533_s7 + $0x38] sm:$0xff]  }
 0x44b   : > { %5328 = vmatprep.subr.bf16.mxu1 %v6111_v21 }
 0x44e   : > { %v5252_v52 = vpop.f32.mrb[100].mxu0  ;;  %5329 = vmatpush3.bf16.msra.mxu1 %v6111_v21  ;;  %v5017_v21 = vld [vmem:[%s7539_s13] ss:$0 sm:$0xff] }
 0x44f   : > { %v3981_v54 = vadd.f32 %v5252_v52, %v4999_v26  ;;  %v3972_v51 = vpop.f32.mrb[101].mxu0  ;;  %5330 = vmatprep.subr.bf16.mxu1 %v6112_v22 }
 0x450   : > { %v3973_v27 = vadd.f32 %v4999_v26, %v3972_v51  ;;  %v5253_v0 = vpop.f32.mrb[102].mxu0 }
 0x451   : > { %v3984_v1 = vadd.f32 %v5253_v0, %v4999_v26  ;;  %v3975_v2 = vpop.f32.mrb[103].mxu0  ;;  %v4025_v56 = vmax.f32 %v3981_v54, 0.0 }
 0x452   : > { %v3976_v55 = vadd.f32 %v4999_v26, %v3975_v2  ;;  %v4023_v58 = vmax.f32 %v3973_v27, 0.0  ;;  %5331 = vmatpush3.bf16.msra.mxu1 %v6112_v22 }
 0x453   : > { %v4026_v57 = vmax.f32 %v3984_v1, 0.0  ;;  %5332 = vmatprep.subr.bf16.mxu1 %v6113_v23 }
 0x454   : > { %v4024_v60 = vmax.f32 %v3976_v55, 0.0 }
 0x455   : > { %v4038_v62 = vpack.c.bf16 %v4026_v57, %v4025_v56 }
 0x456   : > { %v4037_v25 = vpack.c.bf16 %v4024_v60, %v4023_v58  ;;  %5333 = vmatpush3.bf16.msra.mxu1 %v6113_v23 }
 0x457   : > { %5334 = vmatprep.subr.bf16.mxu1 %v6114_v24 }
 0x458   : > { %5282 = vmatprep.mubr.bf16.mxu1 %v4037_v25 }
 0x459   : > { %5283 = vmatmul.mubr.bf16.gmra.mrb[100].mxu1 %v4038_v62 }
 0x45a   : > { %5335 = vmatpush3.bf16.msra.mxu1 %v6114_v24 }
 0x45e   : > { %v5256_v12 = vpop.f32.mrb[104].mxu0 }
 0x45f   : > { %v3997_v63 = vadd.f32 %v5256_v12, %v4999_v26  ;;  %v3988_v10 = vpop.f32.mrb[105].mxu0 }
 0x460   : > { %v3989_v61 = vadd.f32 %v4999_v26, %v3988_v10  ;;  %v5257_v46 = vpop.f32.mrb[106].mxu0 }
 0x461   : > { %v4000_v48 = vadd.f32 %v5257_v46, %v4999_v26  ;;  %v3991_v28 = vpop.f32.mrb[107].mxu0  ;;  %v4029_v42 = vmax.f32 %v3997_v63, 0.0 }
 0x462   : > { %v3992_v41 = vadd.f32 %v4999_v26, %v3991_v28  ;;  %v4027_v4 = vmax.f32 %v3989_v61, 0.0 }
 0x463   : > { %v4030_v3 = vmax.f32 %v4000_v48, 0.0 }
 0x464   : > { %v4028_v36 = vmax.f32 %v3992_v41, 0.0 }
 0x465   : > { %v4040_v5 = vpack.c.bf16 %v4030_v3, %v4029_v42 }
 0x466   : > { %v4039_v43 = vpack.c.bf16 %v4028_v36, %v4027_v4 }
 0x468   : > { %5286 = vmatprep.mubr.bf16.mxu1 %v4039_v43 }
 0x469   : > { %5287 = vmatmul.mubr.bf16.gmra.mrb[104].mxu1 %v4040_v5 }
 0x46e   : > { %v5260_v37 = vpop.f32.mrb[108].mxu0 }
 0x46f   : > { %v4013_v44 = vadd.f32 %v5260_v37, %v4999_v26  ;;  %v4004_v39 = vpop.f32.mrb[109].mxu0 }
 0x470   : > { %v4005_v7 = vadd.f32 %v4999_v26, %v4004_v39  ;;  %v5261_v9 = vpop.f32.mrb[110].mxu0 }
 0x471   : > { %v4016_v35 = vadd.f32 %v5261_v9, %v4999_v26  ;;  %v4007_v40 = vpop.f32.mrb[111].mxu0  ;;  %v4033_v13 = vmax.f32 %v4013_v44, 0.0 }
 0x472   : > { %v4008_v11 = vadd.f32 %v4999_v26, %v4007_v40  ;;  %v4031_v15 = vmax.f32 %v4005_v7, 0.0  ;;  %v6115_v26 = vld [vmem:[%s7533_s7 + $0x28] sm:$0xff]  }
 0x473   : > { %v4034_v14 = vmax.f32 %v4016_v35, 0.0  ;;  %5336 = vmatprep.subr.bf16.mxu1 %v6115_v26 }
 0x474   : > { %v4032_v16 = vmax.f32 %v4008_v11, 0.0  ;;  %5337 = vmatpush3.bf16.msra.mxu1 %v6115_v26 }
 0x475   : > { %v4042_v17 = vpack.c.bf16 %v4034_v14, %v4033_v13  ;;  %5338 = vmatprep.subr.bf16.mxu1 %v6116_v59 }
 0x476   : > { %v4041_v18 = vpack.c.bf16 %v4032_v16, %v4031_v15 }
 0x478   : > { %5290 = vmatprep.mubr.bf16.mxu1 %v4041_v18  ;;  %5339 = vmatpush3.bf16.msra.mxu1 %v6116_v59 }
 0x479   : > { %5291 = vmatmul.mubr.bf16.gmra.mrb[108].mxu1 %v4042_v17  ;;  %5340 = vmatprep.subr.bf16.mxu1 %v6117_v20 }
 0x47c   : > { %5341 = vmatpush3.bf16.msra.mxu1 %v6117_v20 }
 0x51c   : > { %v5280_v29 = vpop.f32.mrb[96].mxu1 }
 0x51d   : > { %v4157_v31 = vadd.f32 %v5280_v29, %v5008_v8  ;;  %v4148_v32 = vpop.f32.mrb[97].mxu1 }
 0x51e   : > { %v4149_v33 = vadd.f32 %v5008_v8, %v4148_v32  ;;  %v5281_v34 = vpop.f32.mrb[98].mxu1 }
 0x51f   : > { %v4160_v38 = vadd.f32 %v5281_v34, %v5008_v8  ;;  %v4151_v6 = vpop.f32.mrb[99].mxu1  ;;  %v4213_v45 = vmax.f32 %v4157_v31, 0.0 }
 0x520   : > { %v4152_v53 = vadd.f32 %v5008_v8, %v4151_v6  ;;  %v4211_v49 = vmax.f32 %v4149_v33, 0.0 }
 0x521   : > { %v4214_v47 = vmax.f32 %v4160_v38, 0.0 }
 0x522   : > { %v4212_v50 = vmax.f32 %v4152_v53, 0.0 }
 0x523   : > { %v4228_v30 = vpack.c.bf16 %v4214_v47, %v4213_v45 }
 0x524   : > { %v4227_v52 = vpack.c.bf16 %v4212_v50, %v4211_v49 }
 0x526   : > { %5310 = vmatprep.mubr.bf16.mxu0 %v4227_v52 }
 0x527   : > { %5311 = vmatmul.mubr.bf16.vlgmr.msra.gmra.mrb[112].mxu0 %v4228_v30 }
 0x52c   : > { %v5284_v54 = vpop.f32.mrb[100].mxu1 }
 0x52d   : > { %v4173_v51 = vadd.f32 %v5284_v54, %v5008_v8  ;;  %v4164_v27 = vpop.f32.mrb[101].mxu1 }
 0x52e   : > { %v4165_v0 = vadd.f32 %v5008_v8, %v4164_v27  ;;  %v5285_v1 = vpop.f32.mrb[102].mxu1 }
 0x52f   : > { %v4176_v2 = vadd.f32 %v5285_v1, %v5008_v8  ;;  %v4167_v55 = vpop.f32.mrb[103].mxu1  ;;  %v4217_v57 = vmax.f32 %v4173_v51, 0.0 }
 0x530   : > { %v4168_v56 = vadd.f32 %v5008_v8, %v4167_v55  ;;  %v4215_v60 = vmax.f32 %v4165_v0, 0.0 }
 0x531   : > { %v4218_v58 = vmax.f32 %v4176_v2, 0.0 }
 0x532   : > { %v4216_v62 = vmax.f32 %v4168_v56, 0.0 }
 0x533   : > { %v4230_v25 = vpack.c.bf16 %v4218_v58, %v4217_v57 }
 0x534   : > { %v4229_v12 = vpack.c.bf16 %v4216_v62, %v4215_v60 }
 0x536   : > { %5314 = vmatprep.mubr.bf16.mxu0 %v4229_v12 }
 0x537   : > { %5315 = vmatmul.mubr.bf16.gmra.mrb[116].mxu0 %v4230_v25 }
 0x53c   : > { %v5288_v63 = vpop.f32.mrb[104].mxu1 }
 0x53d   : > { %v4189_v10 = vadd.f32 %v5288_v63, %v5008_v8  ;;  %v4180_v61 = vpop.f32.mrb[105].mxu1 }
 0x53e   : > { %v4181_v46 = vadd.f32 %v5008_v8, %v4180_v61  ;;  %v5289_v48 = vpop.f32.mrb[106].mxu1 }
 0x53f   : > { %v4192_v28 = vadd.f32 %v5289_v48, %v5008_v8  ;;  %v4183_v41 = vpop.f32.mrb[107].mxu1  ;;  %v4221_v3 = vmax.f32 %v4189_v10, 0.0 }
 0x540   : > { %v4184_v42 = vadd.f32 %v5008_v8, %v4183_v41  ;;  %v4219_v36 = vmax.f32 %v4181_v46, 0.0 }
 0x541   : > { %v4222_v4 = vmax.f32 %v4192_v28, 0.0 }
 0x542   : > { %v4220_v5 = vmax.f32 %v4184_v42, 0.0 }
 0x543   : > { %v4232_v43 = vpack.c.bf16 %v4222_v4, %v4221_v3 }
 0x544   : > { %v4231_v37 = vpack.c.bf16 %v4220_v5, %v4219_v36 }
 0x546   : > { %5318 = vmatprep.mubr.bf16.mxu0 %v4231_v37 }
 0x547   : > { %5319 = vmatmul.mubr.bf16.gmra.mrb[120].mxu0 %v4232_v43 }
 0x54c   : > { %v5292_v44 = vpop.f32.mrb[108].mxu1 }
 0x54d   : > { %v4205_v39 = vadd.f32 %v5292_v44, %v5008_v8  ;;  %v4196_v7 = vpop.f32.mrb[109].mxu1 }
 0x54e   : > { %v4197_v9 = vadd.f32 %v5008_v8, %v4196_v7  ;;  %v5293_v35 = vpop.f32.mrb[110].mxu1 }
 0x54f   : > { %v4208_v40 = vadd.f32 %v5293_v35, %v5008_v8  ;;  %v4199_v11 = vpop.f32.mrb[111].mxu1  ;;  %v4225_v14 = vmax.f32 %v4205_v39, 0.0 }
 0x550   : > { %v4200_v13 = vadd.f32 %v5008_v8, %v4199_v11  ;;  %v4223_v16 = vmax.f32 %v4197_v9, 0.0 }
 0x551   : > { %v4226_v15 = vmax.f32 %v4208_v40, 0.0 }
 0x552   : > { %v4224_v17 = vmax.f32 %v4200_v13, 0.0 }
 0x553   : > { %v4234_v18 = vpack.c.bf16 %v4226_v15, %v4225_v14  ;;  %v5026_v15 = vld [vmem:[%s7540_s14] ss:$0 sm:$0xff] }
 0x554   : > { %v4233_v19 = vpack.c.bf16 %v4224_v17, %v4223_v16 }
 0x556   : > { %5322 = vmatprep.mubr.bf16.mxu0 %v4233_v19 }
 0x557   : > { %5323 = vmatmul.mubr.bf16.gmra.mrb[124].mxu0 %v4234_v18 }
 0x5fa   : > { %v5312_v22 = vpop.f32.mrb[112].mxu0 }
 0x5fb   : > { %v4349_v23 = vadd.f32 %v5312_v22, %v5017_v21  ;;  %v4340_v24 = vpop.f32.mrb[113].mxu0 }
 0x5fc   : > { %v4341_v26 = vadd.f32 %v5017_v21, %v4340_v24  ;;  %v5313_v8 = vpop.f32.mrb[114].mxu0 }
 0x5fd   : > { %v4352_v29 = vadd.f32 %v5313_v8, %v5017_v21  ;;  %v4343_v31 = vpop.f32.mrb[115].mxu0  ;;  %v4405_v33 = vmax.f32 %v4349_v23, 0.0 }
 0x5fe   : > { %v4344_v32 = vadd.f32 %v5017_v21, %v4343_v31  ;;  %v4403_v38 = vmax.f32 %v4341_v26, 0.0 }
 0x5ff   : > { %v4406_v34 = vmax.f32 %v4352_v29, 0.0 }
 0x600   : > { %v4404_v6 = vmax.f32 %v4344_v32, 0.0 }
 0x601   : > { %v4420_v53 = vpack.c.bf16 %v4406_v34, %v4405_v33 }
 0x602   : > { %v4419_v45 = vpack.c.bf16 %v4404_v6, %v4403_v38 }
 0x604   : > { %5342 = vmatprep.mubr.bf16.mxu1 %v4419_v45 }
 0x605   : > { %5343 = vmatmul.mubr.bf16.vlgmr.msra.gmra.mrb[112].mxu1 %v4420_v53 }
 0x60a   : > { %v5316_v47 = vpop.f32.mrb[116].mxu0 }
 0x60b   : > { %v4365_v49 = vadd.f32 %v5316_v47, %v5017_v21  ;;  %v4356_v50 = vpop.f32.mrb[117].mxu0 }
 0x60c   : > { %v4357_v30 = vadd.f32 %v5017_v21, %v4356_v50  ;;  %v5317_v52 = vpop.f32.mrb[118].mxu0 }
 0x60d   : > { %v4368_v54 = vadd.f32 %v5317_v52, %v5017_v21  ;;  %v4359_v51 = vpop.f32.mrb[119].mxu0  ;;  %v4409_v0 = vmax.f32 %v4365_v49, 0.0 }
 0x60e   : > { %v4360_v27 = vadd.f32 %v5017_v21, %v4359_v51  ;;  %v4407_v2 = vmax.f32 %v4357_v30, 0.0 }
 0x60f   : > { %v4410_v1 = vmax.f32 %v4368_v54, 0.0 }
 0x610   : > { %v4408_v55 = vmax.f32 %v4360_v27, 0.0 }
 0x611   : > { %v4422_v56 = vpack.c.bf16 %v4410_v1, %v4409_v0 }
 0x612   : > { %v4421_v57 = vpack.c.bf16 %v4408_v55, %v4407_v2 }
 0x614   : > { %5346 = vmatprep.mubr.bf16.mxu1 %v4421_v57 }
 0x615   : > { %5347 = vmatmul.mubr.bf16.gmra.mrb[116].mxu1 %v4422_v56 }
 0x61a   : > { %v5320_v58 = vpop.f32.mrb[120].mxu0 }
 0x61b   : > { %v4381_v60 = vadd.f32 %v5320_v58, %v5017_v21  ;;  %v4372_v62 = vpop.f32.mrb[121].mxu0 }
 0x61c   : > { %v4373_v25 = vadd.f32 %v5017_v21, %v4372_v62  ;;  %v5321_v12 = vpop.f32.mrb[122].mxu0 }
 0x61d   : > { %v4384_v63 = vadd.f32 %v5321_v12, %v5017_v21  ;;  %v4375_v10 = vpop.f32.mrb[123].mxu0  ;;  %v4413_v46 = vmax.f32 %v4381_v60, 0.0 }
 0x61e   : > { %v4376_v61 = vadd.f32 %v5017_v21, %v4375_v10  ;;  %v4411_v28 = vmax.f32 %v4373_v25, 0.0 }
 0x61f   : > { %v4414_v48 = vmax.f32 %v4384_v63, 0.0 }
 0x620   : > { %v4412_v41 = vmax.f32 %v4376_v61, 0.0 }
 0x621   : > { %v4424_v42 = vpack.c.bf16 %v4414_v48, %v4413_v46 }
 0x622   : > { %v4423_v3 = vpack.c.bf16 %v4412_v41, %v4411_v28 }
 0x624   : > { %5350 = vmatprep.mubr.bf16.mxu1 %v4423_v3 }
 0x625   : > { %5351 = vmatmul.mubr.bf16.gmra.mrb[120].mxu1 %v4424_v42 }
 0x62a   : > { %v5324_v4 = vpop.f32.mrb[124].mxu0 }
 0x62b   : > { %v4397_v36 = vadd.f32 %v5324_v4, %v5017_v21  ;;  %v4388_v5 = vpop.f32.mrb[125].mxu0 }
 0x62c   : > { %v4389_v43 = vadd.f32 %v5017_v21, %v4388_v5  ;;  %v5325_v37 = vpop.f32.mrb[126].mxu0 }
 0x62d   : > { %v4400_v44 = vadd.f32 %v5325_v37, %v5017_v21  ;;  %v4391_v39 = vpop.f32.mrb[127].mxu0  ;;  %v4417_v9 = vmax.f32 %v4397_v36, 0.0 }
 0x62e   : > { %v4392_v7 = vadd.f32 %v5017_v21, %v4391_v39  ;;  %v4415_v40 = vmax.f32 %v4389_v43, 0.0 }
 0x62f   : > { %v4418_v35 = vmax.f32 %v4400_v44, 0.0 }
 0x630   : > { %v4416_v11 = vmax.f32 %v4392_v7, 0.0 }
 0x631   : > { %v4426_v13 = vpack.c.bf16 %v4418_v35, %v4417_v9 }
 0x632   : > { %v4425_v14 = vpack.c.bf16 %v4416_v11, %v4415_v40 }
 0x634   : > { %5354 = vmatprep.mubr.bf16.mxu1 %v4425_v14 }
 0x635   : > { %5355 = vmatmul.mubr.bf16.gmra.mrb[124].mxu1 %v4426_v13 }
 0x6d8   : > { %v5344_v16 = vpop.f32.mrb[112].mxu1 }
 0x6d9   : > { %v4541_v17 = vadd.f32 %v5344_v16, %v5026_v15  ;;  %v4532_v18 = vpop.f32.mrb[113].mxu1 }
 0x6da   : > { %v4533_v19 = vadd.f32 %v5026_v15, %v4532_v18  ;;  %v5345_v59 = vpop.f32.mrb[114].mxu1 }
 0x6db   : > { %4598 = vst.msk [vmem:[%s7489_s30 + $0x10] sm:$0xff] %vm4595_vm0, %v4541_v17  ;;  %v4544_v20 = vadd.f32 %v5345_v59, %v5026_v15  ;;  %v4535_v21 = vpop.f32.mrb[115].mxu1 }
 0x6dc   : > { %4596 = vst.msk [vmem:[%s7489_s30] sm:$0xff] %vm4595_vm0, %v4533_v19  ;;  %v4536_v22 = vadd.f32 %v5026_v15, %v4535_v21 }
 0x6dd   : > { %4599 = vst.msk [vmem:[%s7489_s30 + $0x18] sm:$0xff] %vm4595_vm0, %v4544_v20 }
 0x6de   : > { %4597 = vst.msk [vmem:[%s7489_s30 + $0x8] sm:$0xff] %vm4595_vm0, %v4536_v22 }
 0x6e8   : > { %v5348_v23 = vpop.f32.mrb[116].mxu1 }
 0x6e9   : > { %v4557_v24 = vadd.f32 %v5348_v23, %v5026_v15  ;;  %v4548_v26 = vpop.f32.mrb[117].mxu1 }
 0x6ea   : > { %v4549_v8 = vadd.f32 %v5026_v15, %v4548_v26  ;;  %v5349_v29 = vpop.f32.mrb[118].mxu1 }
 0x6eb   : > { %4602 = vst.msk [vmem:[%s7489_s30 + $0x30] sm:$0xff] %vm4595_vm0, %v4557_v24  ;;  %v4560_v31 = vadd.f32 %v5349_v29, %v5026_v15  ;;  %v4551_v32 = vpop.f32.mrb[119].mxu1 }
 0x6ec   : > { %4600 = vst.msk [vmem:[%s7489_s30 + $0x20] sm:$0xff] %vm4595_vm0, %v4549_v8  ;;  %v4552_v33 = vadd.f32 %v5026_v15, %v4551_v32 }
 0x6ed   : > { %4603 = vst.msk [vmem:[%s7489_s30 + $0x38] sm:$0xff] %vm4595_vm0, %v4560_v31 }
 0x6ee   : > { %4601 = vst.msk [vmem:[%s7489_s30 + $0x28] sm:$0xff] %vm4595_vm0, %v4552_v33 }
 0x6f8   : > { %v5352_v34 = vpop.f32.mrb[120].mxu1 }
 0x6f9   : > { %v4573_v38 = vadd.f32 %v5352_v34, %v5026_v15  ;;  %v4564_v6 = vpop.f32.mrb[121].mxu1 }
 0x6fa   : > { %v4565_v53 = vadd.f32 %v5026_v15, %v4564_v6  ;;  %v5353_v45 = vpop.f32.mrb[122].mxu1 }
 0x6fb   : > { %4606 = vst.msk [vmem:[%s7489_s30 + $0x50] sm:$0xff] %vm4595_vm0, %v4573_v38  ;;  %v4576_v47 = vadd.f32 %v5353_v45, %v5026_v15  ;;  %v4567_v49 = vpop.f32.mrb[123].mxu1 }
 0x6fc   : > { %4604 = vst.msk [vmem:[%s7489_s30 + $0x40] sm:$0xff] %vm4595_vm0, %v4565_v53  ;;  %v4568_v50 = vadd.f32 %v5026_v15, %v4567_v49 }
 0x6fd   : > { %4607 = vst.msk [vmem:[%s7489_s30 + $0x58] sm:$0xff] %vm4595_vm0, %v4576_v47 }
 0x6fe   : > { %4605 = vst.msk [vmem:[%s7489_s30 + $0x48] sm:$0xff] %vm4595_vm0, %v4568_v50 }
 0x708   : > { %v5356_v30 = vpop.f32.mrb[124].mxu1 }
 0x709   : > { %v4589_v52 = vadd.f32 %v5356_v30, %v5026_v15  ;;  %v4580_v54 = vpop.f32.mrb[125].mxu1 }
 0x70a   : > { %v4581_v51 = vadd.f32 %v5026_v15, %v4580_v54  ;;  %v5357_v27 = vpop.f32.mrb[126].mxu1 }
 0x70b   : > { %4610 = vst.msk [vmem:[%s7489_s30 + $0x70] sm:$0xff] %vm4595_vm0, %v4589_v52  ;;  %v4592_v0 = vadd.f32 %v5357_v27, %v5026_v15  ;;  %v4583_v1 = vpop.f32.mrb[127].mxu1 }
 0x70c   : > { %4608 = vst.msk [vmem:[%s7489_s30 + $0x60] sm:$0xff] %vm4595_vm0, %v4581_v51  ;;  %v4584_v2 = vadd.f32 %v5026_v15, %v4583_v1 }
 0x70d   : > { %4611 = vst.msk [vmem:[%s7489_s30 + $0x78] sm:$0xff] %vm4595_vm0, %v4592_v0 }
 0x70e   : > { %4609 = vst.msk [vmem:[%s7489_s30 + $0x68] sm:$0xff] %vm4595_vm0, %v4584_v2 }
 0x70f PF: > { %s25_s18 = sadd.s32 1, %s6124_s18  }
 0x710   : > { %p22_p4 = scmp.ge.s32.totalorder %s25_s18, 4  }
 0x712   :  { %24 = sbr.rel (!%p22_p4) target bundleno = 1 (0x1), region = 110 }

</bundles_post_ra>
